<compile_context>
chip_gen: v5e
topology: v5e:2x2
jax: 0.10.0
libtpu: 0.0.40
codegen_flags: <defaults>
</compile_context>

<pallas_src>
import jax
import jax.numpy as jnp
from jax.experimental import pallas as pl
from jax.experimental.pallas import tpu as pltpu

SELU_ALPHA = 1.6732632423543772848170429916717
SELU_SCALE = 1.0507009873554804934193349852946


def _selu(y):
    # Clamp the exp argument so the (unselected) negative branch never produces inf.
    neg = SELU_ALPHA * (jnp.exp(jnp.minimum(y, 0.0)) - 1.0)
    return SELU_SCALE * jnp.where(y > 0, y, neg)


def _round_up(x, m):
    return ((x + m - 1) // m) * m


# ---------------------------------------------------------------------------
# Fused kernel factory: all five MLPs for one graph per grid step.
# ---------------------------------------------------------------------------
def _make_global_readout_kernel(n_nodes, chain_lens, bias_widths, n_out, n_out_pad):
    """chain_lens = (len add1, len conn1, len add2, len conn2, len term2);
    bias_widths[i] = out width of flat layer i (same flat order as the weight refs)."""
    offsets = []
    off = 0
    for ln in chain_lens:
        offsets.append(off)
        off += ln

    def kernel(x_ref, g_ref, bias_ref, *rest):
        w_refs = rest[:-1]
        o_ref = rest[-1]

        x = x_ref[...]          # (n_nodes, node_emb_size)
        g = g_ref[...]          # (1, graph_emb_size)

        def run_chain(h, chain_idx):
            base = offsets[chain_idx]
            for l in range(chain_lens[chain_idx]):
                wi = base + l
                w = w_refs[wi][...]
                width = bias_widths[wi]
                b = bias_ref[wi:wi + 1, :width]                     # (1, width)
                h = _selu(jnp.dot(h, w, preferred_element_type=jnp.float32) + b)
            return h

        # ---- tier 1: per-node MLPs (M = n_nodes matmuls) -------------------
        ha = run_chain(x, 0)    # (n_nodes, f_add_elems)
        hc = run_chain(x, 1)    # (n_nodes, f_conn_elems)

        # torch .view((B, Nn*f)) flatten, done entirely in registers:
        # concatenate the per-node rows along the lane axis.
        fa = jnp.concatenate([ha[n:n + 1, :] for n in range(n_nodes)], axis=1)
        fc = jnp.concatenate([hc[n:n + 1, :] for n in range(n_nodes)], axis=1)

        # ---- tier 2: torch.cat((f_*, graph_emb)) is a free lane concat -----
        fa2 = run_chain(jnp.concatenate([fa, g], axis=1), 2)   # (1, Nn*f_add_elems)
        fc2 = run_chain(jnp.concatenate([fc, g], axis=1), 3)   # (1, Nn*f_conn_elems)
        ft2 = run_chain(g, 4)                                  # (1, f_term_elems)

        out = jnp.concatenate([fa2, fc2, ft2], axis=1)         # (1, n_out)
        if n_out_pad > n_out:
            out = jnp.concatenate(
                [out, jnp.zeros((1, n_out_pad - n_out), jnp.float32)], axis=1)
        o_ref[...] = out.astype(o_ref.dtype)                   # lane-dense padded store

    return kernel


# ---------------------------------------------------------------------------
# Explicit VMEM budget (feedback #7): per-(8,128)-tile padded bytes.
# ---------------------------------------------------------------------------
def _tile_bytes(shape, dtype_bytes=4):
    if len(shape) == 1:
        shape = (1, shape[0])
    lead = 1
    for d in shape[:-2]:
        lead *= int(d)
    r = _round_up(int(shape[-2]), 8)
    c = _round_up(int(shape[-1]), 128)
    return lead * r * c * dtype_bytes


def _vmem_budget_bytes(weights, bias_pack, n_nodes, emb, gemb, n_out_pad, weight_buffers):
    total = weight_buffers * sum(_tile_bytes(w.shape) for w in weights)
    total += weight_buffers * _tile_bytes(bias_pack.shape)
    # double-buffered per-graph activation / output blocks
    total += 2 * (_tile_bytes((n_nodes, emb)) + _tile_bytes((1, gemb))
                  + _tile_bytes((1, n_out_pad)))
    total += 2 * 1024 * 1024          # headroom for compiler scratch / spills
    return int(min(max(total, 4 * 1024 * 1024), 64 * 1024 * 1024))


# ---------------------------------------------------------------------------
# Parameter packing (done once at host level)
# ---------------------------------------------------------------------------
def prepare_packed_params(params):
    order = ["fAddNet1", "fConnNet1", "fAddNet2", "fConnNet2", "fTermNet2"]
    weights, biases, chain_lens = [], [], []
    for name in order:
        layers = params[name]
        chain_lens.append(len(layers))
        for w, b in layers:
            weights.append(jnp.asarray(w, jnp.float32))
            biases.append(jnp.asarray(b, jnp.float32))
    bias_widths = tuple(int(b.shape[0]) for b in biases)
    wpad = _round_up(max(bias_widths), 128)
    bias_pack = jnp.stack([jnp.pad(b, (0, wpad - b.shape[0])) for b in biases])  # (L, wpad)
    n_out = (params["fAddNet2"][-1][0].shape[1]
             + params["fConnNet2"][-1][0].shape[1]
             + params["fTermNet2"][-1][0].shape[1])
    return {"weights": weights, "bias_pack": bias_pack, "bias_widths": bias_widths,
            "chain_lens": tuple(chain_lens), "n_out": int(n_out)}


# ---------------------------------------------------------------------------
# Forward wrapper: one pallas_call for the whole readout
# ---------------------------------------------------------------------------
def global_readout_forward(packed, node_level_output, graph_embedding_batch,
                           *, single_buffer_weights=True):
    B, Nn, E = node_level_output.shape
    G = graph_embedding_batch.shape[1]
    weights = packed["weights"]
    bias_pack = packed["bias_pack"]
    n_out = packed["n_out"]
    n_out_pad = _round_up(n_out, 128)

    kernel = _make_global_readout_kernel(
        Nn, packed["chain_lens"], packed["bias_widths"], n_out, n_out_pad)

    const_kwargs = {}
    weight_buffers = 2
    if single_buffer_weights and hasattr(pl, "Buffered"):
        const_kwargs = {"pipeline_mode": pl.Buffered(1)}   # grid-invariant -> 1 VMEM buffer
        weight_buffers = 1

    in_specs = [
        pl.BlockSpec((None, Nn, E), lambda i: (i, 0, 0)),    # one graph's node features
        pl.BlockSpec((None, 1, G), lambda i: (i, 0, 0)),     # its graph embedding
        pl.BlockSpec(bias_pack.shape, lambda i: (0, 0), **const_kwargs),
    ]
    in_specs += [pl.BlockSpec(w.shape, lambda i: (0, 0), **const_kwargs) for w in weights]

    vmem_limit = _vmem_budget_bytes(weights, bias_pack, Nn, E, G, n_out_pad, weight_buffers)

    out = pl.pallas_call(
        kernel,
        out_shape=jax.ShapeDtypeStruct((B, 1, n_out_pad), jnp.float32),
        grid=(B,),
        in_specs=in_specs,
        out_specs=pl.BlockSpec((None, 1, n_out_pad), lambda i: (i, 0, 0)),
        compiler_params=pltpu.CompilerParams(
            dimension_semantics=("parallel",),
            vmem_limit_bytes=vmem_limit),
    )(node_level_output, graph_embedding_batch.reshape(B, 1, G), bias_pack, *weights)

    return out.reshape(B, n_out_pad)[:, :n_out]   # [f_add_2 | f_conn_2 | f_term_2]


# ---------------------------------------------------------------------------
# Pure-JAX reference (mirrors the PyTorch module exactly)
# ---------------------------------------------------------------------------
def reference_forward(params, node_level_output, graph_embedding_batch,
                      f_add_elems, f_conn_elems):
    def mlp(ps, x):
        for w, b in ps:
            x = _selu(jnp.dot(x, w, precision=jax.lax.Precision.HIGHEST) + b)
        return x
    B, Nn, E = node_level_output.shape
    x_nodes = node_level_output.reshape(B * Nn, E)
    f_add_1 = mlp(params["fAddNet1"], x_nodes).reshape(B, Nn * f_add_elems)
    f_conn_1 = mlp(params["fConnNet1"], x_nodes).reshape(B, Nn * f_conn_elems)
    f_add_2 = mlp(params["fAddNet2"], jnp.concatenate([f_add_1, graph_embedding_batch], axis=1))
    f_conn_2 = mlp(params["fConnNet2"], jnp.concatenate([f_conn_1, graph_embedding_batch], axis=1))
    f_term_2 = mlp(params["fTermNet2"], graph_embedding_batch)
    return jnp.concatenate([f_add_2, f_conn_2, f_term_2], axis=1)


# ---------------------------------------------------------------------------
# Deterministic init (xavier_uniform_ weights, default torch Linear bias init).
# Weights stored (in, out).
# ---------------------------------------------------------------------------
def init_mlp_params(key, in_features, hidden_layer_sizes, out_features):
    fs = [in_features, *hidden_layer_sizes, out_features]
    params = []
    for in_f, out_f in zip(fs, fs[1:]):
        key, kw, kb = jax.random.split(key, 3)
        w_bound = (6.0 / (in_f + out_f)) ** 0.5
        w = jax.random.uniform(kw, (in_f, out_f), jnp.float32, -w_bound, w_bound)
        b_bound = 1.0 / (in_f ** 0.5)
        b = jax.random.uniform(kb, (out_f,), jnp.float32, -b_bound, b_bound)
        params.append((w, b))
    return params, key


if __name__ == "__main__":
    # Small, shape-consistent hyperparameters
    batch = 2
    max_n_nodes = 8
    node_emb_size = 32
    graph_emb_size = 32
    f_add_elems = 16
    f_conn_elems = 8
    f_term_elems = 1
    mlp1_depth, mlp1_hidden_dim = 2, 32
    mlp2_depth, mlp2_hidden_dim = 2, 32

    key = jax.random.PRNGKey(0)

    params = {}
    params["fAddNet1"], key = init_mlp_params(
        key, node_emb_size, [mlp1_hidden_dim] * mlp1_depth, f_add_elems)
    params["fConnNet1"], key = init_mlp_params(
        key, node_emb_size, [mlp1_hidden_dim] * mlp1_depth, f_conn_elems)
    params["fAddNet2"], key = init_mlp_params(
        key, max_n_nodes * f_add_elems + graph_emb_size,
        [mlp2_hidden_dim] * mlp2_depth, f_add_elems * max_n_nodes)
    params["fConnNet2"], key = init_mlp_params(
        key, max_n_nodes * f_conn_elems + graph_emb_size,
        [mlp2_hidden_dim] * mlp2_depth, f_conn_elems * max_n_nodes)
    params["fTermNet2"], key = init_mlp_params(
        key, graph_emb_size, [mlp2_hidden_dim] * mlp2_depth, f_term_elems)

    key, k1, k2 = jax.random.split(key, 3)
    node_level_output = jax.random.normal(
        k1, (batch, max_n_nodes, node_emb_size), jnp.float32)
    graph_embedding_batch = jax.random.normal(
        k2, (batch, graph_emb_size), jnp.float32)

    # TODO(synk): AlphaDropout is eval-mode identity here; training-mode dropout not implemented.
    packed = prepare_packed_params(params)

    try:
        out = global_readout_forward(packed, node_level_output, graph_embedding_batch,
                                     single_buffer_weights=True)
        out = jax.block_until_ready(out)
    except Exception:
        # Fallback: this Pallas build rejects single-buffered (Buffered(1)) constant operands.
        out = global_readout_forward(packed, node_level_output, graph_embedding_batch,
                                     single_buffer_weights=False)
        out = jax.block_until_ready(out)

    expected_cols = f_add_elems * max_n_nodes + f_conn_elems * max_n_nodes + f_term_elems
    assert out.shape == (batch, expected_cols), out.shape
    assert bool(jnp.all(jnp.isfinite(out)))

    ref = reference_forward(params, node_level_output, graph_embedding_batch,
                            f_add_elems, f_conn_elems)
    ref = jax.block_until_ready(ref)
    assert bool(jnp.allclose(out, ref, atol=1e-3, rtol=1e-3)), float(jnp.max(jnp.abs(out - ref)))

    print("KERNEL_OK")
</pallas_src>

<mosaic_0001>
module attributes {stable_mosaic.version = 11 : i64} {
  func.func @kernel(%arg0: i32, %arg1: memref<1x8x32xf32, #tpu.memory_space<vmem>>, %arg2: memref<1x1x32xf32, #tpu.memory_space<vmem>>, %arg3: memref<15x128xf32, #tpu.memory_space<vmem>>, %arg4: memref<32x32xf32, #tpu.memory_space<vmem>>, %arg5: memref<32x32xf32, #tpu.memory_space<vmem>>, %arg6: memref<32x16xf32, #tpu.memory_space<vmem>>, %arg7: memref<32x32xf32, #tpu.memory_space<vmem>>, %arg8: memref<32x32xf32, #tpu.memory_space<vmem>>, %arg9: memref<32x8xf32, #tpu.memory_space<vmem>>, %arg10: memref<160x32xf32, #tpu.memory_space<vmem>>, %arg11: memref<32x32xf32, #tpu.memory_space<vmem>>, %arg12: memref<32x128xf32, #tpu.memory_space<vmem>>, %arg13: memref<96x32xf32, #tpu.memory_space<vmem>>, %arg14: memref<32x32xf32, #tpu.memory_space<vmem>>, %arg15: memref<32x64xf32, #tpu.memory_space<vmem>>, %arg16: memref<32x32xf32, #tpu.memory_space<vmem>>, %arg17: memref<32x32xf32, #tpu.memory_space<vmem>>, %arg18: memref<32x1xf32, #tpu.memory_space<vmem>>, %arg19: memref<1x1x256xf32, #tpu.memory_space<vmem>>) attributes {dimension_semantics = [#tpu.dimension_semantics<parallel>], iteration_bounds = array<i64: 2>, scalar_prefetch = 0 : i64, scratch_operands = 0 : i64, tpu.core_type = #tpu.core_type<tc>, window_params = [{transform_indices = @transform_0, window_bounds = array<i64: 1, 8, 32>}, {transform_indices = @transform_1, window_bounds = array<i64: 1, 1, 32>}, {pipeline_mode = #tpu.pipeline_mode<synchronous>, transform_indices = @transform_2, window_bounds = array<i64: 15, 128>}, {pipeline_mode = #tpu.pipeline_mode<synchronous>, transform_indices = @transform_3, window_bounds = array<i64: 32, 32>}, {pipeline_mode = #tpu.pipeline_mode<synchronous>, transform_indices = @transform_4, window_bounds = array<i64: 32, 32>}, {pipeline_mode = #tpu.pipeline_mode<synchronous>, transform_indices = @transform_5, window_bounds = array<i64: 32, 16>}, {pipeline_mode = #tpu.pipeline_mode<synchronous>, transform_indices = @transform_6, window_bounds = array<i64: 32, 32>}, {pipeline_mode = #tpu.pipeline_mode<synchronous>, transform_indices = @transform_7, window_bounds = array<i64: 32, 32>}, {pipeline_mode = #tpu.pipeline_mode<synchronous>, transform_indices = @transform_8, window_bounds = array<i64: 32, 8>}, {pipeline_mode = #tpu.pipeline_mode<synchronous>, transform_indices = @transform_9, window_bounds = array<i64: 160, 32>}, {pipeline_mode = #tpu.pipeline_mode<synchronous>, transform_indices = @transform_10, window_bounds = array<i64: 32, 32>}, {pipeline_mode = #tpu.pipeline_mode<synchronous>, transform_indices = @transform_11, window_bounds = array<i64: 32, 128>}, {pipeline_mode = #tpu.pipeline_mode<synchronous>, transform_indices = @transform_12, window_bounds = array<i64: 96, 32>}, {pipeline_mode = #tpu.pipeline_mode<synchronous>, transform_indices = @transform_13, window_bounds = array<i64: 32, 32>}, {pipeline_mode = #tpu.pipeline_mode<synchronous>, transform_indices = @transform_14, window_bounds = array<i64: 32, 64>}, {pipeline_mode = #tpu.pipeline_mode<synchronous>, transform_indices = @transform_15, window_bounds = array<i64: 32, 32>}, {pipeline_mode = #tpu.pipeline_mode<synchronous>, transform_indices = @transform_16, window_bounds = array<i64: 32, 32>}, {pipeline_mode = #tpu.pipeline_mode<synchronous>, transform_indices = @transform_17, window_bounds = array<i64: 32, 1>}, {transform_indices = @transform_18, window_bounds = array<i64: 1, 1, 256>}]} {
    %c0 = arith.constant 0 : index
    %c0_0 = arith.constant 0 : index
    %c0_1 = arith.constant 0 : index
    %0 = vector.load %arg1[%c0, %c0_0, %c0_1] : memref<1x8x32xf32, #tpu.memory_space<vmem>>, vector<1x8x32xf32>
    %1 = vector.shape_cast %0 : vector<1x8x32xf32> to vector<8x32xf32>
    %c0_2 = arith.constant 0 : index
    %c0_3 = arith.constant 0 : index
    %c0_4 = arith.constant 0 : index
    %2 = vector.load %arg2[%c0_2, %c0_3, %c0_4] : memref<1x1x32xf32, #tpu.memory_space<vmem>>, vector<1x1x32xf32>
    %3 = vector.shape_cast %2 : vector<1x1x32xf32> to vector<1x32xf32>
    %c0_5 = arith.constant 0 : index
    %c0_6 = arith.constant 0 : index
    %4 = vector.load %arg4[%c0_5, %c0_6] : memref<32x32xf32, #tpu.memory_space<vmem>>, vector<32x32xf32>
    %c0_7 = arith.constant 0 : index
    %c0_8 = arith.constant 0 : index
    %5 = vector.load %arg3[%c0_7, %c0_8] : memref<15x128xf32, #tpu.memory_space<vmem>>, vector<1x32xf32>
    %cst = arith.constant dense<0.000000e+00> : vector<8x32xf32>
    %6 = tpu.matmul %1, %4, %cst {dimension_numbers = #tpu.dot_dimension_numbers<[1], [0], [0], [1], [0, 0, 1, 1], [], []>} : vector<8x32xf32>, vector<32x32xf32>, vector<8x32xf32> -> vector<8x32xf32>
    %7 = vector.broadcast %5 : vector<1x32xf32> to vector<8x32xf32>
    %8 = arith.addf %6, %7 : vector<8x32xf32>
    %cst_9 = arith.constant 0.000000e+00 : f32
    %9 = vector.broadcast %cst_9 : f32 to vector<8x32xf32>
    %10 = arith.minimumf %8, %9 : vector<8x32xf32>
    %11 = math.exp %10 : vector<8x32xf32>
    %cst_10 = arith.constant 1.000000e+00 : f32
    %12 = vector.broadcast %cst_10 : f32 to vector<8x32xf32>
    %13 = arith.subf %11, %12 : vector<8x32xf32>
    %cst_11 = arith.constant 1.67326319 : f32
    %14 = vector.broadcast %cst_11 : f32 to vector<8x32xf32>
    %15 = arith.mulf %14, %13 : vector<8x32xf32>
    %cst_12 = arith.constant 0.000000e+00 : f32
    %16 = vector.broadcast %cst_12 : f32 to vector<8x32xf32>
    %17 = arith.cmpf ogt, %8, %16 : vector<8x32xf32>
    %18 = arith.select %17, %8, %15 : vector<8x32xi1>, vector<8x32xf32>
    %cst_13 = arith.constant 1.05070102 : f32
    %19 = vector.broadcast %cst_13 : f32 to vector<8x32xf32>
    %20 = arith.mulf %19, %18 : vector<8x32xf32>
    %c0_14 = arith.constant 0 : index
    %c0_15 = arith.constant 0 : index
    %21 = vector.load %arg5[%c0_14, %c0_15] : memref<32x32xf32, #tpu.memory_space<vmem>>, vector<32x32xf32>
    %c1 = arith.constant 1 : index
    %c0_16 = arith.constant 0 : index
    %22 = vector.load %arg3[%c1, %c0_16] : memref<15x128xf32, #tpu.memory_space<vmem>>, vector<1x32xf32>
    %cst_17 = arith.constant dense<0.000000e+00> : vector<8x32xf32>
    %23 = tpu.matmul %20, %21, %cst_17 {dimension_numbers = #tpu.dot_dimension_numbers<[1], [0], [0], [1], [0, 0, 1, 1], [], []>} : vector<8x32xf32>, vector<32x32xf32>, vector<8x32xf32> -> vector<8x32xf32>
    %24 = vector.broadcast %22 : vector<1x32xf32> to vector<8x32xf32>
    %25 = arith.addf %23, %24 : vector<8x32xf32>
    %cst_18 = arith.constant 0.000000e+00 : f32
    %26 = vector.broadcast %cst_18 : f32 to vector<8x32xf32>
    %27 = arith.minimumf %25, %26 : vector<8x32xf32>
    %28 = math.exp %27 : vector<8x32xf32>
    %cst_19 = arith.constant 1.000000e+00 : f32
    %29 = vector.broadcast %cst_19 : f32 to vector<8x32xf32>
    %30 = arith.subf %28, %29 : vector<8x32xf32>
    %cst_20 = arith.constant 1.67326319 : f32
    %31 = vector.broadcast %cst_20 : f32 to vector<8x32xf32>
    %32 = arith.mulf %31, %30 : vector<8x32xf32>
    %cst_21 = arith.constant 0.000000e+00 : f32
    %33 = vector.broadcast %cst_21 : f32 to vector<8x32xf32>
    %34 = arith.cmpf ogt, %25, %33 : vector<8x32xf32>
    %35 = arith.select %34, %25, %32 : vector<8x32xi1>, vector<8x32xf32>
    %cst_22 = arith.constant 1.05070102 : f32
    %36 = vector.broadcast %cst_22 : f32 to vector<8x32xf32>
    %37 = arith.mulf %36, %35 : vector<8x32xf32>
    %c0_23 = arith.constant 0 : index
    %c0_24 = arith.constant 0 : index
    %38 = vector.load %arg6[%c0_23, %c0_24] : memref<32x16xf32, #tpu.memory_space<vmem>>, vector<32x16xf32>
    %c2 = arith.constant 2 : index
    %c0_25 = arith.constant 0 : index
    %39 = vector.load %arg3[%c2, %c0_25] : memref<15x128xf32, #tpu.memory_space<vmem>>, vector<1x16xf32>
    %cst_26 = arith.constant dense<0.000000e+00> : vector<8x16xf32>
    %40 = tpu.matmul %37, %38, %cst_26 {dimension_numbers = #tpu.dot_dimension_numbers<[1], [0], [0], [1], [0, 0, 1, 1], [], []>} : vector<8x32xf32>, vector<32x16xf32>, vector<8x16xf32> -> vector<8x16xf32>
    %41 = vector.broadcast %39 : vector<1x16xf32> to vector<8x16xf32>
    %42 = arith.addf %40, %41 : vector<8x16xf32>
    %cst_27 = arith.constant 0.000000e+00 : f32
    %43 = vector.broadcast %cst_27 : f32 to vector<8x16xf32>
    %44 = arith.minimumf %42, %43 : vector<8x16xf32>
    %45 = math.exp %44 : vector<8x16xf32>
    %cst_28 = arith.constant 1.000000e+00 : f32
    %46 = vector.broadcast %cst_28 : f32 to vector<8x16xf32>
    %47 = arith.subf %45, %46 : vector<8x16xf32>
    %cst_29 = arith.constant 1.67326319 : f32
    %48 = vector.broadcast %cst_29 : f32 to vector<8x16xf32>
    %49 = arith.mulf %48, %47 : vector<8x16xf32>
    %cst_30 = arith.constant 0.000000e+00 : f32
    %50 = vector.broadcast %cst_30 : f32 to vector<8x16xf32>
    %51 = arith.cmpf ogt, %42, %50 : vector<8x16xf32>
    %52 = arith.select %51, %42, %49 : vector<8x16xi1>, vector<8x16xf32>
    %cst_31 = arith.constant 1.05070102 : f32
    %53 = vector.broadcast %cst_31 : f32 to vector<8x16xf32>
    %54 = arith.mulf %53, %52 : vector<8x16xf32>
    %c0_32 = arith.constant 0 : index
    %c0_33 = arith.constant 0 : index
    %55 = vector.load %arg7[%c0_32, %c0_33] : memref<32x32xf32, #tpu.memory_space<vmem>>, vector<32x32xf32>
    %c3 = arith.constant 3 : index
    %c0_34 = arith.constant 0 : index
    %56 = vector.load %arg3[%c3, %c0_34] : memref<15x128xf32, #tpu.memory_space<vmem>>, vector<1x32xf32>
    %cst_35 = arith.constant dense<0.000000e+00> : vector<8x32xf32>
    %57 = tpu.matmul %1, %55, %cst_35 {dimension_numbers = #tpu.dot_dimension_numbers<[1], [0], [0], [1], [0, 0, 1, 1], [], []>} : vector<8x32xf32>, vector<32x32xf32>, vector<8x32xf32> -> vector<8x32xf32>
    %58 = vector.broadcast %56 : vector<1x32xf32> to vector<8x32xf32>
    %59 = arith.addf %57, %58 : vector<8x32xf32>
    %cst_36 = arith.constant 0.000000e+00 : f32
    %60 = vector.broadcast %cst_36 : f32 to vector<8x32xf32>
    %61 = arith.minimumf %59, %60 : vector<8x32xf32>
    %62 = math.exp %61 : vector<8x32xf32>
    %cst_37 = arith.constant 1.000000e+00 : f32
    %63 = vector.broadcast %cst_37 : f32 to vector<8x32xf32>
    %64 = arith.subf %62, %63 : vector<8x32xf32>
    %cst_38 = arith.constant 1.67326319 : f32
    %65 = vector.broadcast %cst_38 : f32 to vector<8x32xf32>
    %66 = arith.mulf %65, %64 : vector<8x32xf32>
    %cst_39 = arith.constant 0.000000e+00 : f32
    %67 = vector.broadcast %cst_39 : f32 to vector<8x32xf32>
    %68 = arith.cmpf ogt, %59, %67 : vector<8x32xf32>
    %69 = arith.select %68, %59, %66 : vector<8x32xi1>, vector<8x32xf32>
    %cst_40 = arith.constant 1.05070102 : f32
    %70 = vector.broadcast %cst_40 : f32 to vector<8x32xf32>
    %71 = arith.mulf %70, %69 : vector<8x32xf32>
    %c0_41 = arith.constant 0 : index
    %c0_42 = arith.constant 0 : index
    %72 = vector.load %arg8[%c0_41, %c0_42] : memref<32x32xf32, #tpu.memory_space<vmem>>, vector<32x32xf32>
    %c4 = arith.constant 4 : index
    %c0_43 = arith.constant 0 : index
    %73 = vector.load %arg3[%c4, %c0_43] : memref<15x128xf32, #tpu.memory_space<vmem>>, vector<1x32xf32>
    %cst_44 = arith.constant dense<0.000000e+00> : vector<8x32xf32>
    %74 = tpu.matmul %71, %72, %cst_44 {dimension_numbers = #tpu.dot_dimension_numbers<[1], [0], [0], [1], [0, 0, 1, 1], [], []>} : vector<8x32xf32>, vector<32x32xf32>, vector<8x32xf32> -> vector<8x32xf32>
    %75 = vector.broadcast %73 : vector<1x32xf32> to vector<8x32xf32>
    %76 = arith.addf %74, %75 : vector<8x32xf32>
    %cst_45 = arith.constant 0.000000e+00 : f32
    %77 = vector.broadcast %cst_45 : f32 to vector<8x32xf32>
    %78 = arith.minimumf %76, %77 : vector<8x32xf32>
    %79 = math.exp %78 : vector<8x32xf32>
    %cst_46 = arith.constant 1.000000e+00 : f32
    %80 = vector.broadcast %cst_46 : f32 to vector<8x32xf32>
    %81 = arith.subf %79, %80 : vector<8x32xf32>
    %cst_47 = arith.constant 1.67326319 : f32
    %82 = vector.broadcast %cst_47 : f32 to vector<8x32xf32>
    %83 = arith.mulf %82, %81 : vector<8x32xf32>
    %cst_48 = arith.constant 0.000000e+00 : f32
    %84 = vector.broadcast %cst_48 : f32 to vector<8x32xf32>
    %85 = arith.cmpf ogt, %76, %84 : vector<8x32xf32>
    %86 = arith.select %85, %76, %83 : vector<8x32xi1>, vector<8x32xf32>
    %cst_49 = arith.constant 1.05070102 : f32
    %87 = vector.broadcast %cst_49 : f32 to vector<8x32xf32>
    %88 = arith.mulf %87, %86 : vector<8x32xf32>
    %c0_50 = arith.constant 0 : index
    %c0_51 = arith.constant 0 : index
    %89 = vector.load %arg9[%c0_50, %c0_51] : memref<32x8xf32, #tpu.memory_space<vmem>>, vector<32x8xf32>
    %c5 = arith.constant 5 : index
    %c0_52 = arith.constant 0 : index
    %90 = vector.load %arg3[%c5, %c0_52] : memref<15x128xf32, #tpu.memory_space<vmem>>, vector<1x8xf32>
    %cst_53 = arith.constant dense<0.000000e+00> : vector<8x8xf32>
    %91 = tpu.matmul %88, %89, %cst_53 {dimension_numbers = #tpu.dot_dimension_numbers<[1], [0], [0], [1], [0, 0, 1, 1], [], []>} : vector<8x32xf32>, vector<32x8xf32>, vector<8x8xf32> -> vector<8x8xf32>
    %92 = vector.broadcast %90 : vector<1x8xf32> to vector<8x8xf32>
    %93 = arith.addf %91, %92 : vector<8x8xf32>
    %cst_54 = arith.constant 0.000000e+00 : f32
    %94 = vector.broadcast %cst_54 : f32 to vector<8x8xf32>
    %95 = arith.minimumf %93, %94 : vector<8x8xf32>
    %96 = math.exp %95 : vector<8x8xf32>
    %cst_55 = arith.constant 1.000000e+00 : f32
    %97 = vector.broadcast %cst_55 : f32 to vector<8x8xf32>
    %98 = arith.subf %96, %97 : vector<8x8xf32>
    %cst_56 = arith.constant 1.67326319 : f32
    %99 = vector.broadcast %cst_56 : f32 to vector<8x8xf32>
    %100 = arith.mulf %99, %98 : vector<8x8xf32>
    %cst_57 = arith.constant 0.000000e+00 : f32
    %101 = vector.broadcast %cst_57 : f32 to vector<8x8xf32>
    %102 = arith.cmpf ogt, %93, %101 : vector<8x8xf32>
    %103 = arith.select %102, %93, %100 : vector<8x8xi1>, vector<8x8xf32>
    %cst_58 = arith.constant 1.05070102 : f32
    %104 = vector.broadcast %cst_58 : f32 to vector<8x8xf32>
    %105 = arith.mulf %104, %103 : vector<8x8xf32>
    %106 = vector.extract_strided_slice %54 {offsets = [0, 0], sizes = [1, 16], strides = [1, 1]} : vector<8x16xf32> to vector<1x16xf32>
    %107 = vector.extract_strided_slice %54 {offsets = [1, 0], sizes = [1, 16], strides = [1, 1]} : vector<8x16xf32> to vector<1x16xf32>
    %108 = vector.extract_strided_slice %54 {offsets = [2, 0], sizes = [1, 16], strides = [1, 1]} : vector<8x16xf32> to vector<1x16xf32>
    %109 = vector.extract_strided_slice %54 {offsets = [3, 0], sizes = [1, 16], strides = [1, 1]} : vector<8x16xf32> to vector<1x16xf32>
    %110 = vector.extract_strided_slice %54 {offsets = [4, 0], sizes = [1, 16], strides = [1, 1]} : vector<8x16xf32> to vector<1x16xf32>
    %111 = vector.extract_strided_slice %54 {offsets = [5, 0], sizes = [1, 16], strides = [1, 1]} : vector<8x16xf32> to vector<1x16xf32>
    %112 = vector.extract_strided_slice %54 {offsets = [6, 0], sizes = [1, 16], strides = [1, 1]} : vector<8x16xf32> to vector<1x16xf32>
    %113 = vector.extract_strided_slice %54 {offsets = [7, 0], sizes = [1, 16], strides = [1, 1]} : vector<8x16xf32> to vector<1x16xf32>
    %114 = tpu.concatenate %106, %107, %108, %109, %110, %111, %112, %113 in 1 : vector<1x16xf32>, vector<1x16xf32>, vector<1x16xf32>, vector<1x16xf32>, vector<1x16xf32>, vector<1x16xf32>, vector<1x16xf32>, vector<1x16xf32> -> vector<1x128xf32>
    %115 = vector.extract_strided_slice %105 {offsets = [0, 0], sizes = [1, 8], strides = [1, 1]} : vector<8x8xf32> to vector<1x8xf32>
    %116 = vector.extract_strided_slice %105 {offsets = [1, 0], sizes = [1, 8], strides = [1, 1]} : vector<8x8xf32> to vector<1x8xf32>
    %117 = vector.extract_strided_slice %105 {offsets = [2, 0], sizes = [1, 8], strides = [1, 1]} : vector<8x8xf32> to vector<1x8xf32>
    %118 = vector.extract_strided_slice %105 {offsets = [3, 0], sizes = [1, 8], strides = [1, 1]} : vector<8x8xf32> to vector<1x8xf32>
    %119 = vector.extract_strided_slice %105 {offsets = [4, 0], sizes = [1, 8], strides = [1, 1]} : vector<8x8xf32> to vector<1x8xf32>
    %120 = vector.extract_strided_slice %105 {offsets = [5, 0], sizes = [1, 8], strides = [1, 1]} : vector<8x8xf32> to vector<1x8xf32>
    %121 = vector.extract_strided_slice %105 {offsets = [6, 0], sizes = [1, 8], strides = [1, 1]} : vector<8x8xf32> to vector<1x8xf32>
    %122 = vector.extract_strided_slice %105 {offsets = [7, 0], sizes = [1, 8], strides = [1, 1]} : vector<8x8xf32> to vector<1x8xf32>
    %123 = tpu.concatenate %115, %116, %117, %118, %119, %120, %121, %122 in 1 : vector<1x8xf32>, vector<1x8xf32>, vector<1x8xf32>, vector<1x8xf32>, vector<1x8xf32>, vector<1x8xf32>, vector<1x8xf32>, vector<1x8xf32> -> vector<1x64xf32>
    %124 = tpu.concatenate %114, %3 in 1 : vector<1x128xf32>, vector<1x32xf32> -> vector<1x160xf32>
    %c0_59 = arith.constant 0 : index
    %c0_60 = arith.constant 0 : index
    %125 = vector.load %arg10[%c0_59, %c0_60] : memref<160x32xf32, #tpu.memory_space<vmem>>, vector<160x32xf32>
    %c6 = arith.constant 6 : index
    %c0_61 = arith.constant 0 : index
    %126 = vector.load %arg3[%c6, %c0_61] : memref<15x128xf32, #tpu.memory_space<vmem>>, vector<1x32xf32>
    %cst_62 = arith.constant dense<0.000000e+00> : vector<1x32xf32>
    %127 = tpu.matmul %124, %125, %cst_62 {dimension_numbers = #tpu.dot_dimension_numbers<[1], [0], [0], [1], [0, 0, 1, 1], [], []>} : vector<1x160xf32>, vector<160x32xf32>, vector<1x32xf32> -> vector<1x32xf32>
    %128 = arith.addf %127, %126 : vector<1x32xf32>
    %cst_63 = arith.constant 0.000000e+00 : f32
    %129 = vector.broadcast %cst_63 : f32 to vector<1x32xf32>
    %130 = arith.minimumf %128, %129 : vector<1x32xf32>
    %131 = math.exp %130 : vector<1x32xf32>
    %cst_64 = arith.constant 1.000000e+00 : f32
    %132 = vector.broadcast %cst_64 : f32 to vector<1x32xf32>
    %133 = arith.subf %131, %132 : vector<1x32xf32>
    %cst_65 = arith.constant 1.67326319 : f32
    %134 = vector.broadcast %cst_65 : f32 to vector<1x32xf32>
    %135 = arith.mulf %134, %133 : vector<1x32xf32>
    %cst_66 = arith.constant 0.000000e+00 : f32
    %136 = vector.broadcast %cst_66 : f32 to vector<1x32xf32>
    %137 = arith.cmpf ogt, %128, %136 : vector<1x32xf32>
    %138 = arith.select %137, %128, %135 : vector<1x32xi1>, vector<1x32xf32>
    %cst_67 = arith.constant 1.05070102 : f32
    %139 = vector.broadcast %cst_67 : f32 to vector<1x32xf32>
    %140 = arith.mulf %139, %138 : vector<1x32xf32>
    %c0_68 = arith.constant 0 : index
    %c0_69 = arith.constant 0 : index
    %141 = vector.load %arg11[%c0_68, %c0_69] : memref<32x32xf32, #tpu.memory_space<vmem>>, vector<32x32xf32>
    %c7 = arith.constant 7 : index
    %c0_70 = arith.constant 0 : index
    %142 = vector.load %arg3[%c7, %c0_70] : memref<15x128xf32, #tpu.memory_space<vmem>>, vector<1x32xf32>
    %cst_71 = arith.constant dense<0.000000e+00> : vector<1x32xf32>
    %143 = tpu.matmul %140, %141, %cst_71 {dimension_numbers = #tpu.dot_dimension_numbers<[1], [0], [0], [1], [0, 0, 1, 1], [], []>} : vector<1x32xf32>, vector<32x32xf32>, vector<1x32xf32> -> vector<1x32xf32>
    %144 = arith.addf %143, %142 : vector<1x32xf32>
    %cst_72 = arith.constant 0.000000e+00 : f32
    %145 = vector.broadcast %cst_72 : f32 to vector<1x32xf32>
    %146 = arith.minimumf %144, %145 : vector<1x32xf32>
    %147 = math.exp %146 : vector<1x32xf32>
    %cst_73 = arith.constant 1.000000e+00 : f32
    %148 = vector.broadcast %cst_73 : f32 to vector<1x32xf32>
    %149 = arith.subf %147, %148 : vector<1x32xf32>
    %cst_74 = arith.constant 1.67326319 : f32
    %150 = vector.broadcast %cst_74 : f32 to vector<1x32xf32>
    %151 = arith.mulf %150, %149 : vector<1x32xf32>
    %cst_75 = arith.constant 0.000000e+00 : f32
    %152 = vector.broadcast %cst_75 : f32 to vector<1x32xf32>
    %153 = arith.cmpf ogt, %144, %152 : vector<1x32xf32>
    %154 = arith.select %153, %144, %151 : vector<1x32xi1>, vector<1x32xf32>
    %cst_76 = arith.constant 1.05070102 : f32
    %155 = vector.broadcast %cst_76 : f32 to vector<1x32xf32>
    %156 = arith.mulf %155, %154 : vector<1x32xf32>
    %c0_77 = arith.constant 0 : index
    %c0_78 = arith.constant 0 : index
    %157 = vector.load %arg12[%c0_77, %c0_78] : memref<32x128xf32, #tpu.memory_space<vmem>>, vector<32x128xf32>
    %c8 = arith.constant 8 : index
    %c0_79 = arith.constant 0 : index
    %158 = vector.load %arg3[%c8, %c0_79] : memref<15x128xf32, #tpu.memory_space<vmem>>, vector<1x128xf32>
    %cst_80 = arith.constant dense<0.000000e+00> : vector<1x128xf32>
    %159 = tpu.matmul %156, %157, %cst_80 {dimension_numbers = #tpu.dot_dimension_numbers<[1], [0], [0], [1], [0, 0, 1, 1], [], []>} : vector<1x32xf32>, vector<32x128xf32>, vector<1x128xf32> -> vector<1x128xf32>
    %160 = arith.addf %159, %158 : vector<1x128xf32>
    %cst_81 = arith.constant 0.000000e+00 : f32
    %161 = vector.broadcast %cst_81 : f32 to vector<1x128xf32>
    %162 = arith.minimumf %160, %161 : vector<1x128xf32>
    %163 = math.exp %162 : vector<1x128xf32>
    %cst_82 = arith.constant 1.000000e+00 : f32
    %164 = vector.broadcast %cst_82 : f32 to vector<1x128xf32>
    %165 = arith.subf %163, %164 : vector<1x128xf32>
    %cst_83 = arith.constant 1.67326319 : f32
    %166 = vector.broadcast %cst_83 : f32 to vector<1x128xf32>
    %167 = arith.mulf %166, %165 : vector<1x128xf32>
    %cst_84 = arith.constant 0.000000e+00 : f32
    %168 = vector.broadcast %cst_84 : f32 to vector<1x128xf32>
    %169 = arith.cmpf ogt, %160, %168 : vector<1x128xf32>
    %170 = arith.select %169, %160, %167 : vector<1x128xi1>, vector<1x128xf32>
    %cst_85 = arith.constant 1.05070102 : f32
    %171 = vector.broadcast %cst_85 : f32 to vector<1x128xf32>
    %172 = arith.mulf %171, %170 : vector<1x128xf32>
    %173 = tpu.concatenate %123, %3 in 1 : vector<1x64xf32>, vector<1x32xf32> -> vector<1x96xf32>
    %c0_86 = arith.constant 0 : index
    %c0_87 = arith.constant 0 : index
    %174 = vector.load %arg13[%c0_86, %c0_87] : memref<96x32xf32, #tpu.memory_space<vmem>>, vector<96x32xf32>
    %c9 = arith.constant 9 : index
    %c0_88 = arith.constant 0 : index
    %175 = vector.load %arg3[%c9, %c0_88] : memref<15x128xf32, #tpu.memory_space<vmem>>, vector<1x32xf32>
    %cst_89 = arith.constant dense<0.000000e+00> : vector<1x32xf32>
    %176 = tpu.matmul %173, %174, %cst_89 {dimension_numbers = #tpu.dot_dimension_numbers<[1], [0], [0], [1], [0, 0, 1, 1], [], []>} : vector<1x96xf32>, vector<96x32xf32>, vector<1x32xf32> -> vector<1x32xf32>
    %177 = arith.addf %176, %175 : vector<1x32xf32>
    %cst_90 = arith.constant 0.000000e+00 : f32
    %178 = vector.broadcast %cst_90 : f32 to vector<1x32xf32>
    %179 = arith.minimumf %177, %178 : vector<1x32xf32>
    %180 = math.exp %179 : vector<1x32xf32>
    %cst_91 = arith.constant 1.000000e+00 : f32
    %181 = vector.broadcast %cst_91 : f32 to vector<1x32xf32>
    %182 = arith.subf %180, %181 : vector<1x32xf32>
    %cst_92 = arith.constant 1.67326319 : f32
    %183 = vector.broadcast %cst_92 : f32 to vector<1x32xf32>
    %184 = arith.mulf %183, %182 : vector<1x32xf32>
    %cst_93 = arith.constant 0.000000e+00 : f32
    %185 = vector.broadcast %cst_93 : f32 to vector<1x32xf32>
    %186 = arith.cmpf ogt, %177, %185 : vector<1x32xf32>
    %187 = arith.select %186, %177, %184 : vector<1x32xi1>, vector<1x32xf32>
    %cst_94 = arith.constant 1.05070102 : f32
    %188 = vector.broadcast %cst_94 : f32 to vector<1x32xf32>
    %189 = arith.mulf %188, %187 : vector<1x32xf32>
    %c0_95 = arith.constant 0 : index
    %c0_96 = arith.constant 0 : index
    %190 = vector.load %arg14[%c0_95, %c0_96] : memref<32x32xf32, #tpu.memory_space<vmem>>, vector<32x32xf32>
    %c10 = arith.constant 10 : index
    %c0_97 = arith.constant 0 : index
    %191 = vector.load %arg3[%c10, %c0_97] : memref<15x128xf32, #tpu.memory_space<vmem>>, vector<1x32xf32>
    %cst_98 = arith.constant dense<0.000000e+00> : vector<1x32xf32>
    %192 = tpu.matmul %189, %190, %cst_98 {dimension_numbers = #tpu.dot_dimension_numbers<[1], [0], [0], [1], [0, 0, 1, 1], [], []>} : vector<1x32xf32>, vector<32x32xf32>, vector<1x32xf32> -> vector<1x32xf32>
    %193 = arith.addf %192, %191 : vector<1x32xf32>
    %cst_99 = arith.constant 0.000000e+00 : f32
    %194 = vector.broadcast %cst_99 : f32 to vector<1x32xf32>
    %195 = arith.minimumf %193, %194 : vector<1x32xf32>
    %196 = math.exp %195 : vector<1x32xf32>
    %cst_100 = arith.constant 1.000000e+00 : f32
    %197 = vector.broadcast %cst_100 : f32 to vector<1x32xf32>
    %198 = arith.subf %196, %197 : vector<1x32xf32>
    %cst_101 = arith.constant 1.67326319 : f32
    %199 = vector.broadcast %cst_101 : f32 to vector<1x32xf32>
    %200 = arith.mulf %199, %198 : vector<1x32xf32>
    %cst_102 = arith.constant 0.000000e+00 : f32
    %201 = vector.broadcast %cst_102 : f32 to vector<1x32xf32>
    %202 = arith.cmpf ogt, %193, %201 : vector<1x32xf32>
    %203 = arith.select %202, %193, %200 : vector<1x32xi1>, vector<1x32xf32>
    %cst_103 = arith.constant 1.05070102 : f32
    %204 = vector.broadcast %cst_103 : f32 to vector<1x32xf32>
    %205 = arith.mulf %204, %203 : vector<1x32xf32>
    %c0_104 = arith.constant 0 : index
    %c0_105 = arith.constant 0 : index
    %206 = vector.load %arg15[%c0_104, %c0_105] : memref<32x64xf32, #tpu.memory_space<vmem>>, vector<32x64xf32>
    %c11 = arith.constant 11 : index
    %c0_106 = arith.constant 0 : index
    %207 = vector.load %arg3[%c11, %c0_106] : memref<15x128xf32, #tpu.memory_space<vmem>>, vector<1x64xf32>
    %cst_107 = arith.constant dense<0.000000e+00> : vector<1x64xf32>
    %208 = tpu.matmul %205, %206, %cst_107 {dimension_numbers = #tpu.dot_dimension_numbers<[1], [0], [0], [1], [0, 0, 1, 1], [], []>} : vector<1x32xf32>, vector<32x64xf32>, vector<1x64xf32> -> vector<1x64xf32>
    %209 = arith.addf %208, %207 : vector<1x64xf32>
    %cst_108 = arith.constant 0.000000e+00 : f32
    %210 = vector.broadcast %cst_108 : f32 to vector<1x64xf32>
    %211 = arith.minimumf %209, %210 : vector<1x64xf32>
    %212 = math.exp %211 : vector<1x64xf32>
    %cst_109 = arith.constant 1.000000e+00 : f32
    %213 = vector.broadcast %cst_109 : f32 to vector<1x64xf32>
    %214 = arith.subf %212, %213 : vector<1x64xf32>
    %cst_110 = arith.constant 1.67326319 : f32
    %215 = vector.broadcast %cst_110 : f32 to vector<1x64xf32>
    %216 = arith.mulf %215, %214 : vector<1x64xf32>
    %cst_111 = arith.constant 0.000000e+00 : f32
    %217 = vector.broadcast %cst_111 : f32 to vector<1x64xf32>
    %218 = arith.cmpf ogt, %209, %217 : vector<1x64xf32>
    %219 = arith.select %218, %209, %216 : vector<1x64xi1>, vector<1x64xf32>
    %cst_112 = arith.constant 1.05070102 : f32
    %220 = vector.broadcast %cst_112 : f32 to vector<1x64xf32>
    %221 = arith.mulf %220, %219 : vector<1x64xf32>
    %c0_113 = arith.constant 0 : index
    %c0_114 = arith.constant 0 : index
    %222 = vector.load %arg16[%c0_113, %c0_114] : memref<32x32xf32, #tpu.memory_space<vmem>>, vector<32x32xf32>
    %c12 = arith.constant 12 : index
    %c0_115 = arith.constant 0 : index
    %223 = vector.load %arg3[%c12, %c0_115] : memref<15x128xf32, #tpu.memory_space<vmem>>, vector<1x32xf32>
    %cst_116 = arith.constant dense<0.000000e+00> : vector<1x32xf32>
    %224 = tpu.matmul %3, %222, %cst_116 {dimension_numbers = #tpu.dot_dimension_numbers<[1], [0], [0], [1], [0, 0, 1, 1], [], []>} : vector<1x32xf32>, vector<32x32xf32>, vector<1x32xf32> -> vector<1x32xf32>
    %225 = arith.addf %224, %223 : vector<1x32xf32>
    %cst_117 = arith.constant 0.000000e+00 : f32
    %226 = vector.broadcast %cst_117 : f32 to vector<1x32xf32>
    %227 = arith.minimumf %225, %226 : vector<1x32xf32>
    %228 = math.exp %227 : vector<1x32xf32>
    %cst_118 = arith.constant 1.000000e+00 : f32
    %229 = vector.broadcast %cst_118 : f32 to vector<1x32xf32>
    %230 = arith.subf %228, %229 : vector<1x32xf32>
    %cst_119 = arith.constant 1.67326319 : f32
    %231 = vector.broadcast %cst_119 : f32 to vector<1x32xf32>
    %232 = arith.mulf %231, %230 : vector<1x32xf32>
    %cst_120 = arith.constant 0.000000e+00 : f32
    %233 = vector.broadcast %cst_120 : f32 to vector<1x32xf32>
    %234 = arith.cmpf ogt, %225, %233 : vector<1x32xf32>
    %235 = arith.select %234, %225, %232 : vector<1x32xi1>, vector<1x32xf32>
    %cst_121 = arith.constant 1.05070102 : f32
    %236 = vector.broadcast %cst_121 : f32 to vector<1x32xf32>
    %237 = arith.mulf %236, %235 : vector<1x32xf32>
    %c0_122 = arith.constant 0 : index
    %c0_123 = arith.constant 0 : index
    %238 = vector.load %arg17[%c0_122, %c0_123] : memref<32x32xf32, #tpu.memory_space<vmem>>, vector<32x32xf32>
    %c13 = arith.constant 13 : index
    %c0_124 = arith.constant 0 : index
    %239 = vector.load %arg3[%c13, %c0_124] : memref<15x128xf32, #tpu.memory_space<vmem>>, vector<1x32xf32>
    %cst_125 = arith.constant dense<0.000000e+00> : vector<1x32xf32>
    %240 = tpu.matmul %237, %238, %cst_125 {dimension_numbers = #tpu.dot_dimension_numbers<[1], [0], [0], [1], [0, 0, 1, 1], [], []>} : vector<1x32xf32>, vector<32x32xf32>, vector<1x32xf32> -> vector<1x32xf32>
    %241 = arith.addf %240, %239 : vector<1x32xf32>
    %cst_126 = arith.constant 0.000000e+00 : f32
    %242 = vector.broadcast %cst_126 : f32 to vector<1x32xf32>
    %243 = arith.minimumf %241, %242 : vector<1x32xf32>
    %244 = math.exp %243 : vector<1x32xf32>
    %cst_127 = arith.constant 1.000000e+00 : f32
    %245 = vector.broadcast %cst_127 : f32 to vector<1x32xf32>
    %246 = arith.subf %244, %245 : vector<1x32xf32>
    %cst_128 = arith.constant 1.67326319 : f32
    %247 = vector.broadcast %cst_128 : f32 to vector<1x32xf32>
    %248 = arith.mulf %247, %246 : vector<1x32xf32>
    %cst_129 = arith.constant 0.000000e+00 : f32
    %249 = vector.broadcast %cst_129 : f32 to vector<1x32xf32>
    %250 = arith.cmpf ogt, %241, %249 : vector<1x32xf32>
    %251 = arith.select %250, %241, %248 : vector<1x32xi1>, vector<1x32xf32>
    %cst_130 = arith.constant 1.05070102 : f32
    %252 = vector.broadcast %cst_130 : f32 to vector<1x32xf32>
    %253 = arith.mulf %252, %251 : vector<1x32xf32>
    %c0_131 = arith.constant 0 : index
    %c0_132 = arith.constant 0 : index
    %254 = vector.load %arg18[%c0_131, %c0_132] : memref<32x1xf32, #tpu.memory_space<vmem>>, vector<32x1xf32>
    %c14 = arith.constant 14 : index
    %c0_133 = arith.constant 0 : index
    %255 = vector.load %arg3[%c14, %c0_133] : memref<15x128xf32, #tpu.memory_space<vmem>>, vector<1x1xf32>
    %cst_134 = arith.constant dense<0.000000e+00> : vector<1x1xf32>
    %256 = tpu.matmul %253, %254, %cst_134 {dimension_numbers = #tpu.dot_dimension_numbers<[1], [0], [0], [1], [0, 0, 1, 1], [], []>} : vector<1x32xf32>, vector<32x1xf32>, vector<1x1xf32> -> vector<1x1xf32>
    %257 = arith.addf %256, %255 : vector<1x1xf32>
    %cst_135 = arith.constant 0.000000e+00 : f32
    %258 = vector.broadcast %cst_135 : f32 to vector<1x1xf32>
    %259 = arith.minimumf %257, %258 : vector<1x1xf32>
    %260 = math.exp %259 : vector<1x1xf32>
    %cst_136 = arith.constant 1.000000e+00 : f32
    %261 = vector.broadcast %cst_136 : f32 to vector<1x1xf32>
    %262 = arith.subf %260, %261 : vector<1x1xf32>
    %cst_137 = arith.constant 1.67326319 : f32
    %263 = vector.broadcast %cst_137 : f32 to vector<1x1xf32>
    %264 = arith.mulf %263, %262 : vector<1x1xf32>
    %cst_138 = arith.constant 0.000000e+00 : f32
    %265 = vector.broadcast %cst_138 : f32 to vector<1x1xf32>
    %266 = arith.cmpf ogt, %257, %265 : vector<1x1xf32>
    %267 = arith.select %266, %257, %264 : vector<1x1xi1>, vector<1x1xf32>
    %cst_139 = arith.constant 1.05070102 : f32
    %268 = vector.broadcast %cst_139 : f32 to vector<1x1xf32>
    %269 = arith.mulf %268, %267 : vector<1x1xf32>
    %270 = tpu.concatenate %172, %221, %269 in 1 : vector<1x128xf32>, vector<1x64xf32>, vector<1x1xf32> -> vector<1x193xf32>
    %cst_140 = arith.constant 0.000000e+00 : f32
    %271 = vector.broadcast %cst_140 : f32 to vector<1x63xf32>
    %272 = tpu.concatenate %270, %271 in 1 : vector<1x193xf32>, vector<1x63xf32> -> vector<1x256xf32>
    %c0_141 = arith.constant 0 : index
    %c0_142 = arith.constant 0 : index
    %c0_143 = arith.constant 0 : index
    %273 = vector.load %arg19[%c0_141, %c0_142, %c0_143] : memref<1x1x256xf32, #tpu.memory_space<vmem>>, vector<1x1x256xf32>
    %274 = vector.shape_cast %273 : vector<1x1x256xf32> to vector<1x256xf32>
    %275 = vector.shape_cast %272 : vector<1x256xf32> to vector<1x1x256xf32>
    tpu.vector_store %arg19[%c0_141, %c0_142, %c0_143], %275 {strides = array<i32>} : memref<1x1x256xf32, #tpu.memory_space<vmem>>, vector<1x1x256xf32>,
    return
  }
  func.func @transform_0(%arg0: i32) -> (i32, i32, i32) {
    %c0_i32 = arith.constant 0 : i32
    %c0_i32_0 = arith.constant 0 : i32
    %c0_i32_1 = arith.constant 0 : i32
    return %arg0, %c0_i32, %c0_i32_0 : i32, i32, i32
  }
  func.func @transform_1(%arg0: i32) -> (i32, i32, i32) {
    %c0_i32 = arith.constant 0 : i32
    %c0_i32_0 = arith.constant 0 : i32
    %c0_i32_1 = arith.constant 0 : i32
    return %arg0, %c0_i32, %c0_i32_0 : i32, i32, i32
  }
  func.func @transform_2(%arg0: i32) -> (i32, i32) {
    %c0_i32 = arith.constant 0 : i32
    %c0_i32_0 = arith.constant 0 : i32
    %c0_i32_1 = arith.constant 0 : i32
    return %c0_i32, %c0_i32_0 : i32, i32
  }
  func.func @transform_3(%arg0: i32) -> (i32, i32) {
    %c0_i32 = arith.constant 0 : i32
    %c0_i32_0 = arith.constant 0 : i32
    %c0_i32_1 = arith.constant 0 : i32
    return %c0_i32, %c0_i32_0 : i32, i32
  }
  func.func @transform_4(%arg0: i32) -> (i32, i32) {
    %c0_i32 = arith.constant 0 : i32
    %c0_i32_0 = arith.constant 0 : i32
    %c0_i32_1 = arith.constant 0 : i32
    return %c0_i32, %c0_i32_0 : i32, i32
  }
  func.func @transform_5(%arg0: i32) -> (i32, i32) {
    %c0_i32 = arith.constant 0 : i32
    %c0_i32_0 = arith.constant 0 : i32
    %c0_i32_1 = arith.constant 0 : i32
    return %c0_i32, %c0_i32_0 : i32, i32
  }
  func.func @transform_6(%arg0: i32) -> (i32, i32) {
    %c0_i32 = arith.constant 0 : i32
    %c0_i32_0 = arith.constant 0 : i32
    %c0_i32_1 = arith.constant 0 : i32
    return %c0_i32, %c0_i32_0 : i32, i32
  }
  func.func @transform_7(%arg0: i32) -> (i32, i32) {
    %c0_i32 = arith.constant 0 : i32
    %c0_i32_0 = arith.constant 0 : i32
    %c0_i32_1 = arith.constant 0 : i32
    return %c0_i32, %c0_i32_0 : i32, i32
  }
  func.func @transform_8(%arg0: i32) -> (i32, i32) {
    %c0_i32 = arith.constant 0 : i32
    %c0_i32_0 = arith.constant 0 : i32
    %c0_i32_1 = arith.constant 0 : i32
    return %c0_i32, %c0_i32_0 : i32, i32
  }
  func.func @transform_9(%arg0: i32) -> (i32, i32) {
    %c0_i32 = arith.constant 0 : i32
    %c0_i32_0 = arith.constant 0 : i32
    %c0_i32_1 = arith.constant 0 : i32
    return %c0_i32, %c0_i32_0 : i32, i32
  }
  func.func @transform_10(%arg0: i32) -> (i32, i32) {
    %c0_i32 = arith.constant 0 : i32
    %c0_i32_0 = arith.constant 0 : i32
    %c0_i32_1 = arith.constant 0 : i32
    return %c0_i32, %c0_i32_0 : i32, i32
  }
  func.func @transform_11(%arg0: i32) -> (i32, i32) {
    %c0_i32 = arith.constant 0 : i32
    %c0_i32_0 = arith.constant 0 : i32
    %c0_i32_1 = arith.constant 0 : i32
    return %c0_i32, %c0_i32_0 : i32, i32
  }
  func.func @transform_12(%arg0: i32) -> (i32, i32) {
    %c0_i32 = arith.constant 0 : i32
    %c0_i32_0 = arith.constant 0 : i32
    %c0_i32_1 = arith.constant 0 : i32
    return %c0_i32, %c0_i32_0 : i32, i32
  }
  func.func @transform_13(%arg0: i32) -> (i32, i32) {
    %c0_i32 = arith.constant 0 : i32
    %c0_i32_0 = arith.constant 0 : i32
    %c0_i32_1 = arith.constant 0 : i32
    return %c0_i32, %c0_i32_0 : i32, i32
  }
  func.func @transform_14(%arg0: i32) -> (i32, i32) {
    %c0_i32 = arith.constant 0 : i32
    %c0_i32_0 = arith.constant 0 : i32
    %c0_i32_1 = arith.constant 0 : i32
    return %c0_i32, %c0_i32_0 : i32, i32
  }
  func.func @transform_15(%arg0: i32) -> (i32, i32) {
    %c0_i32 = arith.constant 0 : i32
    %c0_i32_0 = arith.constant 0 : i32
    %c0_i32_1 = arith.constant 0 : i32
    return %c0_i32, %c0_i32_0 : i32, i32
  }
  func.func @transform_16(%arg0: i32) -> (i32, i32) {
    %c0_i32 = arith.constant 0 : i32
    %c0_i32_0 = arith.constant 0 : i32
    %c0_i32_1 = arith.constant 0 : i32
    return %c0_i32, %c0_i32_0 : i32, i32
  }
  func.func @transform_17(%arg0: i32) -> (i32, i32) {
    %c0_i32 = arith.constant 0 : i32
    %c0_i32_0 = arith.constant 0 : i32
    %c0_i32_1 = arith.constant 0 : i32
    return %c0_i32, %c0_i32_0 : i32, i32
  }
  func.func @transform_18(%arg0: i32) -> (i32, i32, i32) {
    %c0_i32 = arith.constant 0 : i32
    %c0_i32_0 = arith.constant 0 : i32
    %c0_i32_1 = arith.constant 0 : i32
    return %arg0, %c0_i32, %c0_i32_0 : i32, i32, i32
  }
}

module attributes {stable_mosaic.version = 11 : i64} {
  func.func @kernel(%arg0: i32, %arg1: memref<1x8x32xf32, #tpu.memory_space<vmem>>, %arg2: memref<1x1x32xf32, #tpu.memory_space<vmem>>, %arg3: memref<15x128xf32, #tpu.memory_space<vmem>>, %arg4: memref<32x32xf32, #tpu.memory_space<vmem>>, %arg5: memref<32x32xf32, #tpu.memory_space<vmem>>, %arg6: memref<32x16xf32, #tpu.memory_space<vmem>>, %arg7: memref<32x32xf32, #tpu.memory_space<vmem>>, %arg8: memref<32x32xf32, #tpu.memory_space<vmem>>, %arg9: memref<32x8xf32, #tpu.memory_space<vmem>>, %arg10: memref<160x32xf32, #tpu.memory_space<vmem>>, %arg11: memref<32x32xf32, #tpu.memory_space<vmem>>, %arg12: memref<32x128xf32, #tpu.memory_space<vmem>>, %arg13: memref<96x32xf32, #tpu.memory_space<vmem>>, %arg14: memref<32x32xf32, #tpu.memory_space<vmem>>, %arg15: memref<32x64xf32, #tpu.memory_space<vmem>>, %arg16: memref<32x32xf32, #tpu.memory_space<vmem>>, %arg17: memref<32x32xf32, #tpu.memory_space<vmem>>, %arg18: memref<32x1xf32, #tpu.memory_space<vmem>>, %arg19: memref<1x1x256xf32, #tpu.memory_space<vmem>>) attributes {dimension_semantics = [#tpu.dimension_semantics<parallel>], iteration_bounds = array<i64: 2>, scalar_prefetch = 0 : i64, scratch_operands = 0 : i64, tpu.core_type = #tpu.core_type<tc>, window_params = [{transform_indices = @transform_0, window_bounds = array<i64: 1, 8, 32>}, {transform_indices = @transform_1, window_bounds = array<i64: 1, 1, 32>}, {pipeline_mode = #tpu.pipeline_mode<synchronous>, transform_indices = @transform_2, window_bounds = array<i64: 15, 128>}, {pipeline_mode = #tpu.pipeline_mode<synchronous>, transform_indices = @transform_3, window_bounds = array<i64: 32, 32>}, {pipeline_mode = #tpu.pipeline_mode<synchronous>, transform_indices = @transform_4, window_bounds = array<i64: 32, 32>}, {pipeline_mode = #tpu.pipeline_mode<synchronous>, transform_indices = @transform_5, window_bounds = array<i64: 32, 16>}, {pipeline_mode = #tpu.pipeline_mode<synchronous>, transform_indices = @transform_6, window_bounds = array<i64: 32, 32>}, {pipeline_mode = #tpu.pipeline_mode<synchronous>, transform_indices = @transform_7, window_bounds = array<i64: 32, 32>}, {pipeline_mode = #tpu.pipeline_mode<synchronous>, transform_indices = @transform_8, window_bounds = array<i64: 32, 8>}, {pipeline_mode = #tpu.pipeline_mode<synchronous>, transform_indices = @transform_9, window_bounds = array<i64: 160, 32>}, {pipeline_mode = #tpu.pipeline_mode<synchronous>, transform_indices = @transform_10, window_bounds = array<i64: 32, 32>}, {pipeline_mode = #tpu.pipeline_mode<synchronous>, transform_indices = @transform_11, window_bounds = array<i64: 32, 128>}, {pipeline_mode = #tpu.pipeline_mode<synchronous>, transform_indices = @transform_12, window_bounds = array<i64: 96, 32>}, {pipeline_mode = #tpu.pipeline_mode<synchronous>, transform_indices = @transform_13, window_bounds = array<i64: 32, 32>}, {pipeline_mode = #tpu.pipeline_mode<synchronous>, transform_indices = @transform_14, window_bounds = array<i64: 32, 64>}, {pipeline_mode = #tpu.pipeline_mode<synchronous>, transform_indices = @transform_15, window_bounds = array<i64: 32, 32>}, {pipeline_mode = #tpu.pipeline_mode<synchronous>, transform_indices = @transform_16, window_bounds = array<i64: 32, 32>}, {pipeline_mode = #tpu.pipeline_mode<synchronous>, transform_indices = @transform_17, window_bounds = array<i64: 32, 1>}, {transform_indices = @transform_18, window_bounds = array<i64: 1, 1, 256>}]} {
    %c0 = arith.constant 0 : index
    %c0_0 = arith.constant 0 : index
    %c0_1 = arith.constant 0 : index
    %0 = vector.load %arg1[%c0, %c0_0, %c0_1] : memref<1x8x32xf32, #tpu.memory_space<vmem>>, vector<1x8x32xf32>
    %1 = vector.shape_cast %0 : vector<1x8x32xf32> to vector<8x32xf32>
    %c0_2 = arith.constant 0 : index
    %c0_3 = arith.constant 0 : index
    %c0_4 = arith.constant 0 : index
    %2 = vector.load %arg2[%c0_2, %c0_3, %c0_4] : memref<1x1x32xf32, #tpu.memory_space<vmem>>, vector<1x1x32xf32>
    %3 = vector.shape_cast %2 : vector<1x1x32xf32> to vector<1x32xf32>
    %c0_5 = arith.constant 0 : index
    %c0_6 = arith.constant 0 : index
    %4 = vector.load %arg4[%c0_5, %c0_6] : memref<32x32xf32, #tpu.memory_space<vmem>>, vector<32x32xf32>
    %c0_7 = arith.constant 0 : index
    %c0_8 = arith.constant 0 : index
    %5 = vector.load %arg3[%c0_7, %c0_8] : memref<15x128xf32, #tpu.memory_space<vmem>>, vector<1x32xf32>
    %cst = arith.constant dense<0.000000e+00> : vector<8x32xf32>
    %6 = tpu.matmul %1, %4, %cst {dimension_numbers = #tpu.dot_dimension_numbers<[1], [0], [0], [1], [0, 0, 1, 1], [], []>} : vector<8x32xf32>, vector<32x32xf32>, vector<8x32xf32> -> vector<8x32xf32>
    %7 = vector.broadcast %5 : vector<1x32xf32> to vector<8x32xf32>
    %8 = arith.addf %6, %7 : vector<8x32xf32>
    %cst_9 = arith.constant 0.000000e+00 : f32
    %9 = vector.broadcast %cst_9 : f32 to vector<8x32xf32>
    %10 = arith.minimumf %8, %9 : vector<8x32xf32>
    %11 = math.exp %10 : vector<8x32xf32>
    %cst_10 = arith.constant 1.000000e+00 : f32
    %12 = vector.broadcast %cst_10 : f32 to vector<8x32xf32>
    %13 = arith.subf %11, %12 : vector<8x32xf32>
    %cst_11 = arith.constant 1.67326319 : f32
    %14 = vector.broadcast %cst_11 : f32 to vector<8x32xf32>
    %15 = arith.mulf %14, %13 : vector<8x32xf32>
    %cst_12 = arith.constant 0.000000e+00 : f32
    %16 = vector.broadcast %cst_12 : f32 to vector<8x32xf32>
    %17 = arith.cmpf ogt, %8, %16 : vector<8x32xf32>
    %18 = arith.select %17, %8, %15 : vector<8x32xi1>, vector<8x32xf32>
    %cst_13 = arith.constant 1.05070102 : f32
    %19 = vector.broadcast %cst_13 : f32 to vector<8x32xf32>
    %20 = arith.mulf %19, %18 : vector<8x32xf32>
    %c0_14 = arith.constant 0 : index
    %c0_15 = arith.constant 0 : index
    %21 = vector.load %arg5[%c0_14, %c0_15] : memref<32x32xf32, #tpu.memory_space<vmem>>, vector<32x32xf32>
    %c1 = arith.constant 1 : index
    %c0_16 = arith.constant 0 : index
    %22 = vector.load %arg3[%c1, %c0_16] : memref<15x128xf32, #tpu.memory_space<vmem>>, vector<1x32xf32>
    %cst_17 = arith.constant dense<0.000000e+00> : vector<8x32xf32>
    %23 = tpu.matmul %20, %21, %cst_17 {dimension_numbers = #tpu.dot_dimension_numbers<[1], [0], [0], [1], [0, 0, 1, 1], [], []>} : vector<8x32xf32>, vector<32x32xf32>, vector<8x32xf32> -> vector<8x32xf32>
    %24 = vector.broadcast %22 : vector<1x32xf32> to vector<8x32xf32>
    %25 = arith.addf %23, %24 : vector<8x32xf32>
    %cst_18 = arith.constant 0.000000e+00 : f32
    %26 = vector.broadcast %cst_18 : f32 to vector<8x32xf32>
    %27 = arith.minimumf %25, %26 : vector<8x32xf32>
    %28 = math.exp %27 : vector<8x32xf32>
    %cst_19 = arith.constant 1.000000e+00 : f32
    %29 = vector.broadcast %cst_19 : f32 to vector<8x32xf32>
    %30 = arith.subf %28, %29 : vector<8x32xf32>
    %cst_20 = arith.constant 1.67326319 : f32
    %31 = vector.broadcast %cst_20 : f32 to vector<8x32xf32>
    %32 = arith.mulf %31, %30 : vector<8x32xf32>
    %cst_21 = arith.constant 0.000000e+00 : f32
    %33 = vector.broadcast %cst_21 : f32 to vector<8x32xf32>
    %34 = arith.cmpf ogt, %25, %33 : vector<8x32xf32>
    %35 = arith.select %34, %25, %32 : vector<8x32xi1>, vector<8x32xf32>
    %cst_22 = arith.constant 1.05070102 : f32
    %36 = vector.broadcast %cst_22 : f32 to vector<8x32xf32>
    %37 = arith.mulf %36, %35 : vector<8x32xf32>
    %c0_23 = arith.constant 0 : index
    %c0_24 = arith.constant 0 : index
    %38 = vector.load %arg6[%c0_23, %c0_24] : memref<32x16xf32, #tpu.memory_space<vmem>>, vector<32x16xf32>
    %c2 = arith.constant 2 : index
    %c0_25 = arith.constant 0 : index
    %39 = vector.load %arg3[%c2, %c0_25] : memref<15x128xf32, #tpu.memory_space<vmem>>, vector<1x16xf32>
    %cst_26 = arith.constant dense<0.000000e+00> : vector<8x16xf32>
    %40 = tpu.matmul %37, %38, %cst_26 {dimension_numbers = #tpu.dot_dimension_numbers<[1], [0], [0], [1], [0, 0, 1, 1], [], []>} : vector<8x32xf32>, vector<32x16xf32>, vector<8x16xf32> -> vector<8x16xf32>
    %41 = vector.broadcast %39 : vector<1x16xf32> to vector<8x16xf32>
    %42 = arith.addf %40, %41 : vector<8x16xf32>
    %cst_27 = arith.constant 0.000000e+00 : f32
    %43 = vector.broadcast %cst_27 : f32 to vector<8x16xf32>
    %44 = arith.minimumf %42, %43 : vector<8x16xf32>
    %45 = math.exp %44 : vector<8x16xf32>
    %cst_28 = arith.constant 1.000000e+00 : f32
    %46 = vector.broadcast %cst_28 : f32 to vector<8x16xf32>
    %47 = arith.subf %45, %46 : vector<8x16xf32>
    %cst_29 = arith.constant 1.67326319 : f32
    %48 = vector.broadcast %cst_29 : f32 to vector<8x16xf32>
    %49 = arith.mulf %48, %47 : vector<8x16xf32>
    %cst_30 = arith.constant 0.000000e+00 : f32
    %50 = vector.broadcast %cst_30 : f32 to vector<8x16xf32>
    %51 = arith.cmpf ogt, %42, %50 : vector<8x16xf32>
    %52 = arith.select %51, %42, %49 : vector<8x16xi1>, vector<8x16xf32>
    %cst_31 = arith.constant 1.05070102 : f32
    %53 = vector.broadcast %cst_31 : f32 to vector<8x16xf32>
    %54 = arith.mulf %53, %52 : vector<8x16xf32>
    %c0_32 = arith.constant 0 : index
    %c0_33 = arith.constant 0 : index
    %55 = vector.load %arg7[%c0_32, %c0_33] : memref<32x32xf32, #tpu.memory_space<vmem>>, vector<32x32xf32>
    %c3 = arith.constant 3 : index
    %c0_34 = arith.constant 0 : index
    %56 = vector.load %arg3[%c3, %c0_34] : memref<15x128xf32, #tpu.memory_space<vmem>>, vector<1x32xf32>
    %cst_35 = arith.constant dense<0.000000e+00> : vector<8x32xf32>
    %57 = tpu.matmul %1, %55, %cst_35 {dimension_numbers = #tpu.dot_dimension_numbers<[1], [0], [0], [1], [0, 0, 1, 1], [], []>} : vector<8x32xf32>, vector<32x32xf32>, vector<8x32xf32> -> vector<8x32xf32>
    %58 = vector.broadcast %56 : vector<1x32xf32> to vector<8x32xf32>
    %59 = arith.addf %57, %58 : vector<8x32xf32>
    %cst_36 = arith.constant 0.000000e+00 : f32
    %60 = vector.broadcast %cst_36 : f32 to vector<8x32xf32>
    %61 = arith.minimumf %59, %60 : vector<8x32xf32>
    %62 = math.exp %61 : vector<8x32xf32>
    %cst_37 = arith.constant 1.000000e+00 : f32
    %63 = vector.broadcast %cst_37 : f32 to vector<8x32xf32>
    %64 = arith.subf %62, %63 : vector<8x32xf32>
    %cst_38 = arith.constant 1.67326319 : f32
    %65 = vector.broadcast %cst_38 : f32 to vector<8x32xf32>
    %66 = arith.mulf %65, %64 : vector<8x32xf32>
    %cst_39 = arith.constant 0.000000e+00 : f32
    %67 = vector.broadcast %cst_39 : f32 to vector<8x32xf32>
    %68 = arith.cmpf ogt, %59, %67 : vector<8x32xf32>
    %69 = arith.select %68, %59, %66 : vector<8x32xi1>, vector<8x32xf32>
    %cst_40 = arith.constant 1.05070102 : f32
    %70 = vector.broadcast %cst_40 : f32 to vector<8x32xf32>
    %71 = arith.mulf %70, %69 : vector<8x32xf32>
    %c0_41 = arith.constant 0 : index
    %c0_42 = arith.constant 0 : index
    %72 = vector.load %arg8[%c0_41, %c0_42] : memref<32x32xf32, #tpu.memory_space<vmem>>, vector<32x32xf32>
    %c4 = arith.constant 4 : index
    %c0_43 = arith.constant 0 : index
    %73 = vector.load %arg3[%c4, %c0_43] : memref<15x128xf32, #tpu.memory_space<vmem>>, vector<1x32xf32>
    %cst_44 = arith.constant dense<0.000000e+00> : vector<8x32xf32>
    %74 = tpu.matmul %71, %72, %cst_44 {dimension_numbers = #tpu.dot_dimension_numbers<[1], [0], [0], [1], [0, 0, 1, 1], [], []>} : vector<8x32xf32>, vector<32x32xf32>, vector<8x32xf32> -> vector<8x32xf32>
    %75 = vector.broadcast %73 : vector<1x32xf32> to vector<8x32xf32>
    %76 = arith.addf %74, %75 : vector<8x32xf32>
    %cst_45 = arith.constant 0.000000e+00 : f32
    %77 = vector.broadcast %cst_45 : f32 to vector<8x32xf32>
    %78 = arith.minimumf %76, %77 : vector<8x32xf32>
    %79 = math.exp %78 : vector<8x32xf32>
    %cst_46 = arith.constant 1.000000e+00 : f32
    %80 = vector.broadcast %cst_46 : f32 to vector<8x32xf32>
    %81 = arith.subf %79, %80 : vector<8x32xf32>
    %cst_47 = arith.constant 1.67326319 : f32
    %82 = vector.broadcast %cst_47 : f32 to vector<8x32xf32>
    %83 = arith.mulf %82, %81 : vector<8x32xf32>
    %cst_48 = arith.constant 0.000000e+00 : f32
    %84 = vector.broadcast %cst_48 : f32 to vector<8x32xf32>
    %85 = arith.cmpf ogt, %76, %84 : vector<8x32xf32>
    %86 = arith.select %85, %76, %83 : vector<8x32xi1>, vector<8x32xf32>
    %cst_49 = arith.constant 1.05070102 : f32
    %87 = vector.broadcast %cst_49 : f32 to vector<8x32xf32>
    %88 = arith.mulf %87, %86 : vector<8x32xf32>
    %c0_50 = arith.constant 0 : index
    %c0_51 = arith.constant 0 : index
    %89 = vector.load %arg9[%c0_50, %c0_51] : memref<32x8xf32, #tpu.memory_space<vmem>>, vector<32x8xf32>
    %c5 = arith.constant 5 : index
    %c0_52 = arith.constant 0 : index
    %90 = vector.load %arg3[%c5, %c0_52] : memref<15x128xf32, #tpu.memory_space<vmem>>, vector<1x8xf32>
    %cst_53 = arith.constant dense<0.000000e+00> : vector<8x8xf32>
    %91 = tpu.matmul %88, %89, %cst_53 {dimension_numbers = #tpu.dot_dimension_numbers<[1], [0], [0], [1], [0, 0, 1, 1], [], []>} : vector<8x32xf32>, vector<32x8xf32>, vector<8x8xf32> -> vector<8x8xf32>
    %92 = vector.broadcast %90 : vector<1x8xf32> to vector<8x8xf32>
    %93 = arith.addf %91, %92 : vector<8x8xf32>
    %cst_54 = arith.constant 0.000000e+00 : f32
    %94 = vector.broadcast %cst_54 : f32 to vector<8x8xf32>
    %95 = arith.minimumf %93, %94 : vector<8x8xf32>
    %96 = math.exp %95 : vector<8x8xf32>
    %cst_55 = arith.constant 1.000000e+00 : f32
    %97 = vector.broadcast %cst_55 : f32 to vector<8x8xf32>
    %98 = arith.subf %96, %97 : vector<8x8xf32>
    %cst_56 = arith.constant 1.67326319 : f32
    %99 = vector.broadcast %cst_56 : f32 to vector<8x8xf32>
    %100 = arith.mulf %99, %98 : vector<8x8xf32>
    %cst_57 = arith.constant 0.000000e+00 : f32
    %101 = vector.broadcast %cst_57 : f32 to vector<8x8xf32>
    %102 = arith.cmpf ogt, %93, %101 : vector<8x8xf32>
    %103 = arith.select %102, %93, %100 : vector<8x8xi1>, vector<8x8xf32>
    %cst_58 = arith.constant 1.05070102 : f32
    %104 = vector.broadcast %cst_58 : f32 to vector<8x8xf32>
    %105 = arith.mulf %104, %103 : vector<8x8xf32>
    %106 = vector.extract_strided_slice %54 {offsets = [0, 0], sizes = [1, 16], strides = [1, 1]} : vector<8x16xf32> to vector<1x16xf32>
    %107 = vector.extract_strided_slice %54 {offsets = [1, 0], sizes = [1, 16], strides = [1, 1]} : vector<8x16xf32> to vector<1x16xf32>
    %108 = vector.extract_strided_slice %54 {offsets = [2, 0], sizes = [1, 16], strides = [1, 1]} : vector<8x16xf32> to vector<1x16xf32>
    %109 = vector.extract_strided_slice %54 {offsets = [3, 0], sizes = [1, 16], strides = [1, 1]} : vector<8x16xf32> to vector<1x16xf32>
    %110 = vector.extract_strided_slice %54 {offsets = [4, 0], sizes = [1, 16], strides = [1, 1]} : vector<8x16xf32> to vector<1x16xf32>
    %111 = vector.extract_strided_slice %54 {offsets = [5, 0], sizes = [1, 16], strides = [1, 1]} : vector<8x16xf32> to vector<1x16xf32>
    %112 = vector.extract_strided_slice %54 {offsets = [6, 0], sizes = [1, 16], strides = [1, 1]} : vector<8x16xf32> to vector<1x16xf32>
    %113 = vector.extract_strided_slice %54 {offsets = [7, 0], sizes = [1, 16], strides = [1, 1]} : vector<8x16xf32> to vector<1x16xf32>
    %114 = tpu.concatenate %106, %107, %108, %109, %110, %111, %112, %113 in 1 : vector<1x16xf32>, vector<1x16xf32>, vector<1x16xf32>, vector<1x16xf32>, vector<1x16xf32>, vector<1x16xf32>, vector<1x16xf32>, vector<1x16xf32> -> vector<1x128xf32>
    %115 = vector.extract_strided_slice %105 {offsets = [0, 0], sizes = [1, 8], strides = [1, 1]} : vector<8x8xf32> to vector<1x8xf32>
    %116 = vector.extract_strided_slice %105 {offsets = [1, 0], sizes = [1, 8], strides = [1, 1]} : vector<8x8xf32> to vector<1x8xf32>
    %117 = vector.extract_strided_slice %105 {offsets = [2, 0], sizes = [1, 8], strides = [1, 1]} : vector<8x8xf32> to vector<1x8xf32>
    %118 = vector.extract_strided_slice %105 {offsets = [3, 0], sizes = [1, 8], strides = [1, 1]} : vector<8x8xf32> to vector<1x8xf32>
    %119 = vector.extract_strided_slice %105 {offsets = [4, 0], sizes = [1, 8], strides = [1, 1]} : vector<8x8xf32> to vector<1x8xf32>
    %120 = vector.extract_strided_slice %105 {offsets = [5, 0], sizes = [1, 8], strides = [1, 1]} : vector<8x8xf32> to vector<1x8xf32>
    %121 = vector.extract_strided_slice %105 {offsets = [6, 0], sizes = [1, 8], strides = [1, 1]} : vector<8x8xf32> to vector<1x8xf32>
    %122 = vector.extract_strided_slice %105 {offsets = [7, 0], sizes = [1, 8], strides = [1, 1]} : vector<8x8xf32> to vector<1x8xf32>
    %123 = tpu.concatenate %115, %116, %117, %118, %119, %120, %121, %122 in 1 : vector<1x8xf32>, vector<1x8xf32>, vector<1x8xf32>, vector<1x8xf32>, vector<1x8xf32>, vector<1x8xf32>, vector<1x8xf32>, vector<1x8xf32> -> vector<1x64xf32>
    %124 = tpu.concatenate %114, %3 in 1 : vector<1x128xf32>, vector<1x32xf32> -> vector<1x160xf32>
    %c0_59 = arith.constant 0 : index
    %c0_60 = arith.constant 0 : index
    %125 = vector.load %arg10[%c0_59, %c0_60] : memref<160x32xf32, #tpu.memory_space<vmem>>, vector<160x32xf32>
    %c6 = arith.constant 6 : index
    %c0_61 = arith.constant 0 : index
    %126 = vector.load %arg3[%c6, %c0_61] : memref<15x128xf32, #tpu.memory_space<vmem>>, vector<1x32xf32>
    %cst_62 = arith.constant dense<0.000000e+00> : vector<1x32xf32>
    %127 = tpu.matmul %124, %125, %cst_62 {dimension_numbers = #tpu.dot_dimension_numbers<[1], [0], [0], [1], [0, 0, 1, 1], [], []>} : vector<1x160xf32>, vector<160x32xf32>, vector<1x32xf32> -> vector<1x32xf32>
    %128 = arith.addf %127, %126 : vector<1x32xf32>
    %cst_63 = arith.constant 0.000000e+00 : f32
    %129 = vector.broadcast %cst_63 : f32 to vector<1x32xf32>
    %130 = arith.minimumf %128, %129 : vector<1x32xf32>
    %131 = math.exp %130 : vector<1x32xf32>
    %cst_64 = arith.constant 1.000000e+00 : f32
    %132 = vector.broadcast %cst_64 : f32 to vector<1x32xf32>
    %133 = arith.subf %131, %132 : vector<1x32xf32>
    %cst_65 = arith.constant 1.67326319 : f32
    %134 = vector.broadcast %cst_65 : f32 to vector<1x32xf32>
    %135 = arith.mulf %134, %133 : vector<1x32xf32>
    %cst_66 = arith.constant 0.000000e+00 : f32
    %136 = vector.broadcast %cst_66 : f32 to vector<1x32xf32>
    %137 = arith.cmpf ogt, %128, %136 : vector<1x32xf32>
    %138 = arith.select %137, %128, %135 : vector<1x32xi1>, vector<1x32xf32>
    %cst_67 = arith.constant 1.05070102 : f32
    %139 = vector.broadcast %cst_67 : f32 to vector<1x32xf32>
    %140 = arith.mulf %139, %138 : vector<1x32xf32>
    %c0_68 = arith.constant 0 : index
    %c0_69 = arith.constant 0 : index
    %141 = vector.load %arg11[%c0_68, %c0_69] : memref<32x32xf32, #tpu.memory_space<vmem>>, vector<32x32xf32>
    %c7 = arith.constant 7 : index
    %c0_70 = arith.constant 0 : index
    %142 = vector.load %arg3[%c7, %c0_70] : memref<15x128xf32, #tpu.memory_space<vmem>>, vector<1x32xf32>
    %cst_71 = arith.constant dense<0.000000e+00> : vector<1x32xf32>
    %143 = tpu.matmul %140, %141, %cst_71 {dimension_numbers = #tpu.dot_dimension_numbers<[1], [0], [0], [1], [0, 0, 1, 1], [], []>} : vector<1x32xf32>, vector<32x32xf32>, vector<1x32xf32> -> vector<1x32xf32>
    %144 = arith.addf %143, %142 : vector<1x32xf32>
    %cst_72 = arith.constant 0.000000e+00 : f32
    %145 = vector.broadcast %cst_72 : f32 to vector<1x32xf32>
    %146 = arith.minimumf %144, %145 : vector<1x32xf32>
    %147 = math.exp %146 : vector<1x32xf32>
    %cst_73 = arith.constant 1.000000e+00 : f32
    %148 = vector.broadcast %cst_73 : f32 to vector<1x32xf32>
    %149 = arith.subf %147, %148 : vector<1x32xf32>
    %cst_74 = arith.constant 1.67326319 : f32
    %150 = vector.broadcast %cst_74 : f32 to vector<1x32xf32>
    %151 = arith.mulf %150, %149 : vector<1x32xf32>
    %cst_75 = arith.constant 0.000000e+00 : f32
    %152 = vector.broadcast %cst_75 : f32 to vector<1x32xf32>
    %153 = arith.cmpf ogt, %144, %152 : vector<1x32xf32>
    %154 = arith.select %153, %144, %151 : vector<1x32xi1>, vector<1x32xf32>
    %cst_76 = arith.constant 1.05070102 : f32
    %155 = vector.broadcast %cst_76 : f32 to vector<1x32xf32>
    %156 = arith.mulf %155, %154 : vector<1x32xf32>
    %c0_77 = arith.constant 0 : index
    %c0_78 = arith.constant 0 : index
    %157 = vector.load %arg12[%c0_77, %c0_78] : memref<32x128xf32, #tpu.memory_space<vmem>>, vector<32x128xf32>
    %c8 = arith.constant 8 : index
    %c0_79 = arith.constant 0 : index
    %158 = vector.load %arg3[%c8, %c0_79] : memref<15x128xf32, #tpu.memory_space<vmem>>, vector<1x128xf32>
    %cst_80 = arith.constant dense<0.000000e+00> : vector<1x128xf32>
    %159 = tpu.matmul %156, %157, %cst_80 {dimension_numbers = #tpu.dot_dimension_numbers<[1], [0], [0], [1], [0, 0, 1, 1], [], []>} : vector<1x32xf32>, vector<32x128xf32>, vector<1x128xf32> -> vector<1x128xf32>
    %160 = arith.addf %159, %158 : vector<1x128xf32>
    %cst_81 = arith.constant 0.000000e+00 : f32
    %161 = vector.broadcast %cst_81 : f32 to vector<1x128xf32>
    %162 = arith.minimumf %160, %161 : vector<1x128xf32>
    %163 = math.exp %162 : vector<1x128xf32>
    %cst_82 = arith.constant 1.000000e+00 : f32
    %164 = vector.broadcast %cst_82 : f32 to vector<1x128xf32>
    %165 = arith.subf %163, %164 : vector<1x128xf32>
    %cst_83 = arith.constant 1.67326319 : f32
    %166 = vector.broadcast %cst_83 : f32 to vector<1x128xf32>
    %167 = arith.mulf %166, %165 : vector<1x128xf32>
    %cst_84 = arith.constant 0.000000e+00 : f32
    %168 = vector.broadcast %cst_84 : f32 to vector<1x128xf32>
    %169 = arith.cmpf ogt, %160, %168 : vector<1x128xf32>
    %170 = arith.select %169, %160, %167 : vector<1x128xi1>, vector<1x128xf32>
    %cst_85 = arith.constant 1.05070102 : f32
    %171 = vector.broadcast %cst_85 : f32 to vector<1x128xf32>
    %172 = arith.mulf %171, %170 : vector<1x128xf32>
    %173 = tpu.concatenate %123, %3 in 1 : vector<1x64xf32>, vector<1x32xf32> -> vector<1x96xf32>
    %c0_86 = arith.constant 0 : index
    %c0_87 = arith.constant 0 : index
    %174 = vector.load %arg13[%c0_86, %c0_87] : memref<96x32xf32, #tpu.memory_space<vmem>>, vector<96x32xf32>
    %c9 = arith.constant 9 : index
    %c0_88 = arith.constant 0 : index
    %175 = vector.load %arg3[%c9, %c0_88] : memref<15x128xf32, #tpu.memory_space<vmem>>, vector<1x32xf32>
    %cst_89 = arith.constant dense<0.000000e+00> : vector<1x32xf32>
    %176 = tpu.matmul %173, %174, %cst_89 {dimension_numbers = #tpu.dot_dimension_numbers<[1], [0], [0], [1], [0, 0, 1, 1], [], []>} : vector<1x96xf32>, vector<96x32xf32>, vector<1x32xf32> -> vector<1x32xf32>
    %177 = arith.addf %176, %175 : vector<1x32xf32>
    %cst_90 = arith.constant 0.000000e+00 : f32
    %178 = vector.broadcast %cst_90 : f32 to vector<1x32xf32>
    %179 = arith.minimumf %177, %178 : vector<1x32xf32>
    %180 = math.exp %179 : vector<1x32xf32>
    %cst_91 = arith.constant 1.000000e+00 : f32
    %181 = vector.broadcast %cst_91 : f32 to vector<1x32xf32>
    %182 = arith.subf %180, %181 : vector<1x32xf32>
    %cst_92 = arith.constant 1.67326319 : f32
    %183 = vector.broadcast %cst_92 : f32 to vector<1x32xf32>
    %184 = arith.mulf %183, %182 : vector<1x32xf32>
    %cst_93 = arith.constant 0.000000e+00 : f32
    %185 = vector.broadcast %cst_93 : f32 to vector<1x32xf32>
    %186 = arith.cmpf ogt, %177, %185 : vector<1x32xf32>
    %187 = arith.select %186, %177, %184 : vector<1x32xi1>, vector<1x32xf32>
    %cst_94 = arith.constant 1.05070102 : f32
    %188 = vector.broadcast %cst_94 : f32 to vector<1x32xf32>
    %189 = arith.mulf %188, %187 : vector<1x32xf32>
    %c0_95 = arith.constant 0 : index
    %c0_96 = arith.constant 0 : index
    %190 = vector.load %arg14[%c0_95, %c0_96] : memref<32x32xf32, #tpu.memory_space<vmem>>, vector<32x32xf32>
    %c10 = arith.constant 10 : index
    %c0_97 = arith.constant 0 : index
    %191 = vector.load %arg3[%c10, %c0_97] : memref<15x128xf32, #tpu.memory_space<vmem>>, vector<1x32xf32>
    %cst_98 = arith.constant dense<0.000000e+00> : vector<1x32xf32>
    %192 = tpu.matmul %189, %190, %cst_98 {dimension_numbers = #tpu.dot_dimension_numbers<[1], [0], [0], [1], [0, 0, 1, 1], [], []>} : vector<1x32xf32>, vector<32x32xf32>, vector<1x32xf32> -> vector<1x32xf32>
    %193 = arith.addf %192, %191 : vector<1x32xf32>
    %cst_99 = arith.constant 0.000000e+00 : f32
    %194 = vector.broadcast %cst_99 : f32 to vector<1x32xf32>
    %195 = arith.minimumf %193, %194 : vector<1x32xf32>
    %196 = math.exp %195 : vector<1x32xf32>
    %cst_100 = arith.constant 1.000000e+00 : f32
    %197 = vector.broadcast %cst_100 : f32 to vector<1x32xf32>
    %198 = arith.subf %196, %197 : vector<1x32xf32>
    %cst_101 = arith.constant 1.67326319 : f32
    %199 = vector.broadcast %cst_101 : f32 to vector<1x32xf32>
    %200 = arith.mulf %199, %198 : vector<1x32xf32>
    %cst_102 = arith.constant 0.000000e+00 : f32
    %201 = vector.broadcast %cst_102 : f32 to vector<1x32xf32>
    %202 = arith.cmpf ogt, %193, %201 : vector<1x32xf32>
    %203 = arith.select %202, %193, %200 : vector<1x32xi1>, vector<1x32xf32>
    %cst_103 = arith.constant 1.05070102 : f32
    %204 = vector.broadcast %cst_103 : f32 to vector<1x32xf32>
    %205 = arith.mulf %204, %203 : vector<1x32xf32>
    %c0_104 = arith.constant 0 : index
    %c0_105 = arith.constant 0 : index
    %206 = vector.load %arg15[%c0_104, %c0_105] : memref<32x64xf32, #tpu.memory_space<vmem>>, vector<32x64xf32>
    %c11 = arith.constant 11 : index
    %c0_106 = arith.constant 0 : index
    %207 = vector.load %arg3[%c11, %c0_106] : memref<15x128xf32, #tpu.memory_space<vmem>>, vector<1x64xf32>
    %cst_107 = arith.constant dense<0.000000e+00> : vector<1x64xf32>
    %208 = tpu.matmul %205, %206, %cst_107 {dimension_numbers = #tpu.dot_dimension_numbers<[1], [0], [0], [1], [0, 0, 1, 1], [], []>} : vector<1x32xf32>, vector<32x64xf32>, vector<1x64xf32> -> vector<1x64xf32>
    %209 = arith.addf %208, %207 : vector<1x64xf32>
    %cst_108 = arith.constant 0.000000e+00 : f32
    %210 = vector.broadcast %cst_108 : f32 to vector<1x64xf32>
    %211 = arith.minimumf %209, %210 : vector<1x64xf32>
    %212 = math.exp %211 : vector<1x64xf32>
    %cst_109 = arith.constant 1.000000e+00 : f32
    %213 = vector.broadcast %cst_109 : f32 to vector<1x64xf32>
    %214 = arith.subf %212, %213 : vector<1x64xf32>
    %cst_110 = arith.constant 1.67326319 : f32
    %215 = vector.broadcast %cst_110 : f32 to vector<1x64xf32>
    %216 = arith.mulf %215, %214 : vector<1x64xf32>
    %cst_111 = arith.constant 0.000000e+00 : f32
    %217 = vector.broadcast %cst_111 : f32 to vector<1x64xf32>
    %218 = arith.cmpf ogt, %209, %217 : vector<1x64xf32>
    %219 = arith.select %218, %209, %216 : vector<1x64xi1>, vector<1x64xf32>
    %cst_112 = arith.constant 1.05070102 : f32
    %220 = vector.broadcast %cst_112 : f32 to vector<1x64xf32>
    %221 = arith.mulf %220, %219 : vector<1x64xf32>
    %c0_113 = arith.constant 0 : index
    %c0_114 = arith.constant 0 : index
    %222 = vector.load %arg16[%c0_113, %c0_114] : memref<32x32xf32, #tpu.memory_space<vmem>>, vector<32x32xf32>
    %c12 = arith.constant 12 : index
    %c0_115 = arith.constant 0 : index
    %223 = vector.load %arg3[%c12, %c0_115] : memref<15x128xf32, #tpu.memory_space<vmem>>, vector<1x32xf32>
    %cst_116 = arith.constant dense<0.000000e+00> : vector<1x32xf32>
    %224 = tpu.matmul %3, %222, %cst_116 {dimension_numbers = #tpu.dot_dimension_numbers<[1], [0], [0], [1], [0, 0, 1, 1], [], []>} : vector<1x32xf32>, vector<32x32xf32>, vector<1x32xf32> -> vector<1x32xf32>
    %225 = arith.addf %224, %223 : vector<1x32xf32>
    %cst_117 = arith.constant 0.000000e+00 : f32
    %226 = vector.broadcast %cst_117 : f32 to vector<1x32xf32>
    %227 = arith.minimumf %225, %226 : vector<1x32xf32>
    %228 = math.exp %227 : vector<1x32xf32>
    %cst_118 = arith.constant 1.000000e+00 : f32
    %229 = vector.broadcast %cst_118 : f32 to vector<1x32xf32>
    %230 = arith.subf %228, %229 : vector<1x32xf32>
    %cst_119 = arith.constant 1.67326319 : f32
    %231 = vector.broadcast %cst_119 : f32 to vector<1x32xf32>
    %232 = arith.mulf %231, %230 : vector<1x32xf32>
    %cst_120 = arith.constant 0.000000e+00 : f32
    %233 = vector.broadcast %cst_120 : f32 to vector<1x32xf32>
    %234 = arith.cmpf ogt, %225, %233 : vector<1x32xf32>
    %235 = arith.select %234, %225, %232 : vector<1x32xi1>, vector<1x32xf32>
    %cst_121 = arith.constant 1.05070102 : f32
    %236 = vector.broadcast %cst_121 : f32 to vector<1x32xf32>
    %237 = arith.mulf %236, %235 : vector<1x32xf32>
    %c0_122 = arith.constant 0 : index
    %c0_123 = arith.constant 0 : index
    %238 = vector.load %arg17[%c0_122, %c0_123] : memref<32x32xf32, #tpu.memory_space<vmem>>, vector<32x32xf32>
    %c13 = arith.constant 13 : index
    %c0_124 = arith.constant 0 : index
    %239 = vector.load %arg3[%c13, %c0_124] : memref<15x128xf32, #tpu.memory_space<vmem>>, vector<1x32xf32>
    %cst_125 = arith.constant dense<0.000000e+00> : vector<1x32xf32>
    %240 = tpu.matmul %237, %238, %cst_125 {dimension_numbers = #tpu.dot_dimension_numbers<[1], [0], [0], [1], [0, 0, 1, 1], [], []>} : vector<1x32xf32>, vector<32x32xf32>, vector<1x32xf32> -> vector<1x32xf32>
    %241 = arith.addf %240, %239 : vector<1x32xf32>
    %cst_126 = arith.constant 0.000000e+00 : f32
    %242 = vector.broadcast %cst_126 : f32 to vector<1x32xf32>
    %243 = arith.minimumf %241, %242 : vector<1x32xf32>
    %244 = math.exp %243 : vector<1x32xf32>
    %cst_127 = arith.constant 1.000000e+00 : f32
    %245 = vector.broadcast %cst_127 : f32 to vector<1x32xf32>
    %246 = arith.subf %244, %245 : vector<1x32xf32>
    %cst_128 = arith.constant 1.67326319 : f32
    %247 = vector.broadcast %cst_128 : f32 to vector<1x32xf32>
    %248 = arith.mulf %247, %246 : vector<1x32xf32>
    %cst_129 = arith.constant 0.000000e+00 : f32
    %249 = vector.broadcast %cst_129 : f32 to vector<1x32xf32>
    %250 = arith.cmpf ogt, %241, %249 : vector<1x32xf32>
    %251 = arith.select %250, %241, %248 : vector<1x32xi1>, vector<1x32xf32>
    %cst_130 = arith.constant 1.05070102 : f32
    %252 = vector.broadcast %cst_130 : f32 to vector<1x32xf32>
    %253 = arith.mulf %252, %251 : vector<1x32xf32>
    %c0_131 = arith.constant 0 : index
    %c0_132 = arith.constant 0 : index
    %254 = vector.load %arg18[%c0_131, %c0_132] : memref<32x1xf32, #tpu.memory_space<vmem>>, vector<32x1xf32>
    %c14 = arith.constant 14 : index
    %c0_133 = arith.constant 0 : index
    %255 = vector.load %arg3[%c14, %c0_133] : memref<15x128xf32, #tpu.memory_space<vmem>>, vector<1x1xf32>
    %cst_134 = arith.constant dense<0.000000e+00> : vector<1x1xf32>
    %256 = tpu.matmul %253, %254, %cst_134 {dimension_numbers = #tpu.dot_dimension_numbers<[1], [0], [0], [1], [0, 0, 1, 1], [], []>} : vector<1x32xf32>, vector<32x1xf32>, vector<1x1xf32> -> vector<1x1xf32>
    %257 = arith.addf %256, %255 : vector<1x1xf32>
    %cst_135 = arith.constant 0.000000e+00 : f32
    %258 = vector.broadcast %cst_135 : f32 to vector<1x1xf32>
    %259 = arith.minimumf %257, %258 : vector<1x1xf32>
    %260 = math.exp %259 : vector<1x1xf32>
    %cst_136 = arith.constant 1.000000e+00 : f32
    %261 = vector.broadcast %cst_136 : f32 to vector<1x1xf32>
    %262 = arith.subf %260, %261 : vector<1x1xf32>
    %cst_137 = arith.constant 1.67326319 : f32
    %263 = vector.broadcast %cst_137 : f32 to vector<1x1xf32>
    %264 = arith.mulf %263, %262 : vector<1x1xf32>
    %cst_138 = arith.constant 0.000000e+00 : f32
    %265 = vector.broadcast %cst_138 : f32 to vector<1x1xf32>
    %266 = arith.cmpf ogt, %257, %265 : vector<1x1xf32>
    %267 = arith.select %266, %257, %264 : vector<1x1xi1>, vector<1x1xf32>
    %cst_139 = arith.constant 1.05070102 : f32
    %268 = vector.broadcast %cst_139 : f32 to vector<1x1xf32>
    %269 = arith.mulf %268, %267 : vector<1x1xf32>
    %270 = tpu.concatenate %172, %221, %269 in 1 : vector<1x128xf32>, vector<1x64xf32>, vector<1x1xf32> -> vector<1x193xf32>
    %cst_140 = arith.constant 0.000000e+00 : f32
    %271 = vector.broadcast %cst_140 : f32 to vector<1x63xf32>
    %272 = tpu.concatenate %270, %271 in 1 : vector<1x193xf32>, vector<1x63xf32> -> vector<1x256xf32>
    %c0_141 = arith.constant 0 : index
    %c0_142 = arith.constant 0 : index
    %c0_143 = arith.constant 0 : index
    %273 = vector.load %arg19[%c0_141, %c0_142, %c0_143] : memref<1x1x256xf32, #tpu.memory_space<vmem>>, vector<1x1x256xf32>
    %274 = vector.shape_cast %273 : vector<1x1x256xf32> to vector<1x256xf32>
    %275 = vector.shape_cast %272 : vector<1x256xf32> to vector<1x1x256xf32>
    tpu.vector_store %arg19[%c0_141, %c0_142, %c0_143], %275 {strides = array<i32>} : memref<1x1x256xf32, #tpu.memory_space<vmem>>, vector<1x1x256xf32>,
    return
  }
  func.func @transform_0(%arg0: i32) -> (i32, i32, i32) {
    %c0_i32 = arith.constant 0 : i32
    %c0_i32_0 = arith.constant 0 : i32
    %c0_i32_1 = arith.constant 0 : i32
    return %arg0, %c0_i32, %c0_i32_0 : i32, i32, i32
  }
  func.func @transform_1(%arg0: i32) -> (i32, i32, i32) {
    %c0_i32 = arith.constant 0 : i32
    %c0_i32_0 = arith.constant 0 : i32
    %c0_i32_1 = arith.constant 0 : i32
    return %arg0, %c0_i32, %c0_i32_0 : i32, i32, i32
  }
  func.func @transform_2(%arg0: i32) -> (i32, i32) {
    %c0_i32 = arith.constant 0 : i32
    %c0_i32_0 = arith.constant 0 : i32
    %c0_i32_1 = arith.constant 0 : i32
    return %c0_i32, %c0_i32_0 : i32, i32
  }
  func.func @transform_3(%arg0: i32) -> (i32, i32) {
    %c0_i32 = arith.constant 0 : i32
    %c0_i32_0 = arith.constant 0 : i32
    %c0_i32_1 = arith.constant 0 : i32
    return %c0_i32, %c0_i32_0 : i32, i32
  }
  func.func @transform_4(%arg0: i32) -> (i32, i32) {
    %c0_i32 = arith.constant 0 : i32
    %c0_i32_0 = arith.constant 0 : i32
    %c0_i32_1 = arith.constant 0 : i32
    return %c0_i32, %c0_i32_0 : i32, i32
  }
  func.func @transform_5(%arg0: i32) -> (i32, i32) {
    %c0_i32 = arith.constant 0 : i32
    %c0_i32_0 = arith.constant 0 : i32
    %c0_i32_1 = arith.constant 0 : i32
    return %c0_i32, %c0_i32_0 : i32, i32
  }
  func.func @transform_6(%arg0: i32) -> (i32, i32) {
    %c0_i32 = arith.constant 0 : i32
    %c0_i32_0 = arith.constant 0 : i32
    %c0_i32_1 = arith.constant 0 : i32
    return %c0_i32, %c0_i32_0 : i32, i32
  }
  func.func @transform_7(%arg0: i32) -> (i32, i32) {
    %c0_i32 = arith.constant 0 : i32
    %c0_i32_0 = arith.constant 0 : i32
    %c0_i32_1 = arith.constant 0 : i32
    return %c0_i32, %c0_i32_0 : i32, i32
  }
  func.func @transform_8(%arg0: i32) -> (i32, i32) {
    %c0_i32 = arith.constant 0 : i32
    %c0_i32_0 = arith.constant 0 : i32
    %c0_i32_1 = arith.constant 0 : i32
    return %c0_i32, %c0_i32_0 : i32, i32
  }
  func.func @transform_9(%arg0: i32) -> (i32, i32) {
    %c0_i32 = arith.constant 0 : i32
    %c0_i32_0 = arith.constant 0 : i32
    %c0_i32_1 = arith.constant 0 : i32
    return %c0_i32, %c0_i32_0 : i32, i32
  }
  func.func @transform_10(%arg0: i32) -> (i32, i32) {
    %c0_i32 = arith.constant 0 : i32
    %c0_i32_0 = arith.constant 0 : i32
    %c0_i32_1 = arith.constant 0 : i32
    return %c0_i32, %c0_i32_0 : i32, i32
  }
  func.func @transform_11(%arg0: i32) -> (i32, i32) {
    %c0_i32 = arith.constant 0 : i32
    %c0_i32_0 = arith.constant 0 : i32
    %c0_i32_1 = arith.constant 0 : i32
    return %c0_i32, %c0_i32_0 : i32, i32
  }
  func.func @transform_12(%arg0: i32) -> (i32, i32) {
    %c0_i32 = arith.constant 0 : i32
    %c0_i32_0 = arith.constant 0 : i32
    %c0_i32_1 = arith.constant 0 : i32
    return %c0_i32, %c0_i32_0 : i32, i32
  }
  func.func @transform_13(%arg0: i32) -> (i32, i32) {
    %c0_i32 = arith.constant 0 : i32
    %c0_i32_0 = arith.constant 0 : i32
    %c0_i32_1 = arith.constant 0 : i32
    return %c0_i32, %c0_i32_0 : i32, i32
  }
  func.func @transform_14(%arg0: i32) -> (i32, i32) {
    %c0_i32 = arith.constant 0 : i32
    %c0_i32_0 = arith.constant 0 : i32
    %c0_i32_1 = arith.constant 0 : i32
    return %c0_i32, %c0_i32_0 : i32, i32
  }
  func.func @transform_15(%arg0: i32) -> (i32, i32) {
    %c0_i32 = arith.constant 0 : i32
    %c0_i32_0 = arith.constant 0 : i32
    %c0_i32_1 = arith.constant 0 : i32
    return %c0_i32, %c0_i32_0 : i32, i32
  }
  func.func @transform_16(%arg0: i32) -> (i32, i32) {
    %c0_i32 = arith.constant 0 : i32
    %c0_i32_0 = arith.constant 0 : i32
    %c0_i32_1 = arith.constant 0 : i32
    return %c0_i32, %c0_i32_0 : i32, i32
  }
  func.func @transform_17(%arg0: i32) -> (i32, i32) {
    %c0_i32 = arith.constant 0 : i32
    %c0_i32_0 = arith.constant 0 : i32
    %c0_i32_1 = arith.constant 0 : i32
    return %c0_i32, %c0_i32_0 : i32, i32
  }
  func.func @transform_18(%arg0: i32) -> (i32, i32, i32) {
    %c0_i32 = arith.constant 0 : i32
    %c0_i32_0 = arith.constant 0 : i32
    %c0_i32_1 = arith.constant 0 : i32
    return %arg0, %c0_i32, %c0_i32_0 : i32, i32, i32
  }
}

</mosaic_0001>

<bundles_post_ra>
// kernel: tpu_custom_call.1
= control target key start
LH: loop header
LB: loop body
LE: loop exit
PB: predicated region body
PF: predicated region fallthrough
CT: control target
= control target key end

     0   :  { %s2105_s0 = inlined_call_operand.vmem [shape: f32[2,8,32], index: 0, kind: input, shape index: {}]   ;;  %s2106_s1 = inlined_call_operand.vmem [shape: f32[2,1,32], index: 1, kind: input, shape index: {}]   ;;  %s2107_s2 = inlined_call_operand.vmem [shape: f32[15,128], index: 2, kind: input, shape index: {}]   ;;  %s2108_s3 = inlined_call_operand.vmem [shape: f32[32,32], index: 3, kind: input, shape index: {}]   ;;  %s2109_s4 = inlined_call_operand.vmem [shape: f32[32,32], index: 4, kind: input, shape index: {}]   ;;  %s2110_s5 = inlined_call_operand.vmem [shape: f32[32,16], index: 5, kind: input, shape index: {}]   ;;  %s2111_s6 = inlined_call_operand.vmem [shape: f32[32,32], index: 6, kind: input, shape index: {}]   ;;  %s2112_s7 = inlined_call_operand.vmem [shape: f32[32,32], index: 7, kind: input, shape index: {}]   ;;  %s2113_s8 = inlined_call_operand.vmem [shape: f32[32,8], index: 8, kind: input, shape index: {}]   ;;  %s2114_s9 = inlined_call_operand.vmem [shape: f32[160,32], index: 9, kind: input, shape index: {}]   ;;  %s2115_s10 = inlined_call_operand.vmem [shape: f32[32,32], index: 10, kind: input, shape index: {}]   ;;  %s2116_s11 = inlined_call_operand.vmem [shape: f32[32,128], index: 11, kind: input, shape index: {}]   ;;  %s2117_s12 = inlined_call_operand.vmem [shape: f32[96,32], index: 12, kind: input, shape index: {}]   ;;  %s2118_s13 = inlined_call_operand.vmem [shape: f32[32,32], index: 13, kind: input, shape index: {}]   ;;  %s2119_s14 = inlined_call_operand.vmem [shape: f32[32,64], index: 14, kind: input, shape index: {}]   ;;  %s2120_s15 = inlined_call_operand.vmem [shape: f32[32,32], index: 15, kind: input, shape index: {}]   ;;  %s2121_s16 = inlined_call_operand.vmem [shape: f32[32,32], index: 16, kind: input, shape index: {}]   ;;  %s2122_s17 = inlined_call_operand.vmem [shape: f32[32,1], index: 17, kind: input, shape index: {}]   ;;  %s2123_s18 = inlined_call_operand.hbm [shape: f32[2,1,256], index: 18, kind: output, shape index: {}]  }
   0x1   :  { %2131 = sst [smem:[#allocation9_spill]] %s2105_s0 }
   0x2   :  { %2132 = sst [smem:[#allocation10_spill]] %s2106_s1 }
   0x3   :  { %2133 = sst [smem:[#allocation11_spill]] %s2107_s2 }
   0x4   :  { %2134 = sst [smem:[#allocation12_spill]] %s2108_s3 }
   0x5   :  { %2135 = sst [smem:[#allocation13_spill]] %s2109_s4 }
   0x6   :  { %23 = vsyncpa [#allocation3], 0 }
   0x7   :  { %25 = vsyncpa [#allocation3 + $0x1], 0  ;;  %s1658_s27 = smov 0   ;;  %s1660_s28 = smov 0  }
   0x8   :  { %s1662_s29 = smov 0   ;;  %s1664_s30 = smov 0  }
   0x9 LB: > { %2136 = sst [smem:[#allocation5_spill]] %s1546_s29  ;;  %s1679_s0 = sadd.s32 4294967295, %s1550_s30   ;;  %s1550_s30 = sphi %s1664_s30, %s2150_s30   ;;  %s1546_s29 = sphi %s1662_s29, %s2152_s29   ;;  %s1542_s28 = sphi %s1660_s28, %s2154_s28   ;;  %s1538_s27 = sphi %s1658_s27, %s2153_s27  }
   0xa   : > { %s1361_s19 = sadd.s32 4294967294, %s1550_s30   ;;  %s1683_s1 = sadd.s32 1, %s1550_s30  }
   0xb   : > { %2137 = sst [smem:[#allocation6_spill]] %s1683_s1  ;;  %s426_s20 = sadd.s32 1, %s1546_s29 }
   0xc   : > { %s423_s21 = ssub.s32 %s1550_s30, %s1683_s1  ;;  %p436_p0 = scmp.ne.s32.totalorder %s1546_s29, %s1542_s28 }
   0xd   : > { %p424_p1 = scmp.eq.s32.totalorder %s423_s21, 0  ;;  %p437_p2 = scmp.eq.s32.totalorder %s1679_s0, 1 }
   0xe   : > { %p442_p3 = scmp.ne.s32.totalorder %s1542_s28, %s1538_s27  ;;  %p443_p4 = scmp.eq.s32.totalorder %s1361_s19, 1 }
   0xf   : > { %s1694_s22 = scalar_select %p424_p1, %s1546_s29, %s426_s20  }
  0x10   : > { %p1696_p5 = por %p437_p2, %p436_p0  ;;  %p1700_p6 = por %p443_p4, %p442_p3 }
  0x11   : > { %2138 = sst [smem:[#allocation7_spill]] %s1694_s22  ;;  %p1364_p7 = scmp.ge.s32.totalorder %s1550_s30, 1 }
  0x12   : > { %s2140_s23 = scalar_select %p1700_p6, 1, 0 }
  0x13   : > { %p522_p8 = scmp.lt.s32.totalorder %s1550_s30, 3 }
  0x14   : > { %2141 = sst [smem:[#allocation8_spill]] %s2140_s23 }
  0x15   : > { %p523_p9 = pnand %p1364_p7, %p522_p8 }
  0x16   : > { %s2142_s3 = sld [smem:[#allocation12_spill]] (!%p523_p9)  ;;  %p578_p10 = scmp.lt.s32.totalorder (!%p523_p9), %s1679_s0, 1 }
  0x17   : > { %526 = sbr.rel (%p523_p9) target bundleno = 1354 (0x54a), region = 92  ;;  %s2143_s23 = sld [smem:[#allocation9_spill]] (!%p523_p9) }
  0x18   : > { %s2144_s4 = sld [smem:[#allocation13_spill]] (!%p523_p9)  ;;  %s2129_s24 = smov (!%p523_p9), 48  }
  0x19   : > { %s1557_s19 = smov (!%p523_p9), 32   ;;  %s1558_s20 = smov (!%p523_p9), 8  }
  0x1a   : > { %s1559_s21 = smov (!%p523_p9), 112   ;;  %s1560_s29 = smov (!%p523_p9), 40  }
  0x1b   : > { %s1508_s1 = scalar_lea.hbm (!%p523_p9), %s2123_s18, 4 }
  0x1c   : > { %v590_v0 = vld [vmem:[%s2142_s3 + $0x18] sm:$0xff]  ;;  %v589_v2 = vld [vmem:[%s2142_s3 + $0x10] sm:$0xff]  ;;  %v588_v4 = vld [vmem:[%s2142_s3 + $0x8] sm:$0xff]  ;;  %s1726_s26 = scalar_select %p578_p10, %s1679_s0, 1  ;;  %vm593_vm0 = vcmask 261120   ;;  %vm836_vm7 = vcmask 130048  }
  0x1d   : > { %v702_v1 = vld [vmem:[%s2111_s6 + $0x18] sm:$0xff]  ;;  %609 = vmatpush.msra.mxu0 %v590_v0  ;;  %v701_v3 = vld [vmem:[%s2111_s6 + $0x10] sm:$0xff]  ;;  %v700_v5 = vld [vmem:[%s2111_s6 + $0x8] sm:$0xff]  ;;  %vm839_vm8 = vcmask 392192   ;;  %vm841_vm9 = vcmask 523264   ;;  %vm843_vm10 = vcmask 654336  }
  0x1e   : > { %717 = vmatpush.msra.mxu3 %v702_v1  ;;  %v587_v6 = vld [vmem:[%s2142_s3] sm:$0xff]  ;;  %s1366_s22 = sshll.u32 %s1726_s26, 3  ;;  %v628_v9 = vld [vmem:[%s2144_s4 + $0x18] sm:$0xff]  ;;  %v627_v10 = vld [vmem:[%s2144_s4 + $0x10] sm:$0xff]  ;;  %s1554_s3 = smov 16   ;;  %vm845_vm11 = vcmask 785408  }
  0x1f   : > { %610 = vmatpush.msra.mxu0 %v589_v2  ;;  %v699_v7 = vld [vmem:[%s2111_s6] sm:$0xff]  ;;  %s581_s25 = scalar_lea.vmem %s2143_s23, %s1366_s22  ;;  %646 = vmatpush.msra.mxu1 %v628_v9  ;;  %v626_v11 = vld [vmem:[%s2144_s4 + $0x8] sm:$0xff]  ;;  %v736_v13 = vld [vmem:[%s2112_s7 + $0x18] sm:$0xff]  ;;  %s2145_s23 = sld [smem:[#allocation11_spill]]  ;;  %vm847_vm12 = vcmask 916480   ;;  %vm878_vm13 = vcmask 64512  }
  0x20   : > { %718 = vmatpush.msra.mxu3 %v701_v3  ;;  %v585_v8 = vld [vmem:[%s581_s25] sm:$0xff]  ;;  %v735_v14 = vld [vmem:[%s2112_s7 + $0x10] sm:$0xff]  ;;  %v734_v15 = vld [vmem:[%s2112_s7 + $0x8] sm:$0xff]  ;;  %s1552_s22 = smov 80   ;;  %s2130_s25 = smov 64   ;;  %vm881_vm14 = vcmask 195584  }
  0x21   : > { %611 = vmatpush.msra.mxu0 %v588_v4  ;;  %647 = vmatpush.msra.mxu1 %v627_v10  ;;  %v625_v12 = vld [vmem:[%s2144_s4] sm:$0xff]  ;;  %v665_v37 = vld [vmem:[%s2110_s5 + $0x18] sm:$0xff]  ;;  %v664_v38 = vld [vmem:[%s2110_s5 + $0x10] sm:$0xff]  ;;  %s1555_s4 = smov 96   ;;  %vm884_vm15 = vcmask 326656  }
  0x22   : > { %719 = vmatpush.msra.mxu3 %v700_v5  ;;  %v733_v16 = vld [vmem:[%s2112_s7] sm:$0xff]  ;;  %683 = vmatpush.msra.mxu2 %v665_v37  ;;  %v663_v39 = vld [vmem:[%s2110_s5 + $0x8] sm:$0xff]  ;;  %v773_v41 = vld [vmem:[%s2113_s8 + $0x18] sm:$0xff] }
  0x23   : > { %612 = vmatpush.msra.mxu0 %v587_v6  ;;  %648 = vmatpush.msra.mxu1 %v626_v11  ;;  %v662_v40 = vld [vmem:[%s2110_s5] sm:$0xff]  ;;  %v772_v42 = vld [vmem:[%s2113_s8 + $0x10] sm:$0xff]  ;;  %v771_v43 = vld [vmem:[%s2113_s8 + $0x8] sm:$0xff] }
  0x24   : > { %720 = vmatpush.msra.mxu3 %v699_v7  ;;  %1367 = vmatmul.msk.f32.vlgmr.msra.gmra.mxu0 %vm593_vm0, %v585_v8  ;;  %v770_v44 = vld [vmem:[%s2113_s8] sm:$0xff]  ;;  %v903_v37 = vld [vmem:[%s2114_s9 + $0x70] sm:$0xff] }
  0x25   : > { %1373 = vmatmul.msk.f32.vlgmr.msra.gmra.mxu3 %vm593_vm0, %v585_v8  ;;  %649 = vmatpush.msra.mxu1 %v625_v12  ;;  %v1451_v17 = vld [vmem:[%s2145_s23] ss:$0 sm:$0xff]  ;;  %v1452_v21 = vld [vmem:[%s2145_s23 + $0x3] ss:$0 sm:$0xff]  ;;  %v1453_v45 = vld [vmem:[%s2145_s23 + $0x1] ss:$0 sm:$0xff] }
  0x26   : > { %754 = vmatpush.msrb.mxu0 %v736_v13  ;;  %684 = vmatpush.msra.mxu2 %v664_v38  ;;  %v1454_v49 = vld [vmem:[%s2145_s23 + $0x4] ss:$0 sm:$0xff]  ;;  %v1455_v1 = vld [vmem:[%s2145_s23 + $0x2] ss:$0 sm:$0xff]  ;;  %v1456_v2 = vld [vmem:[%s2145_s23 + $0x5] ss:$0 sm:$0xff] }
  0x27   : > { %791 = vmatpush.msrb.mxu1 %v773_v41  ;;  %v902_v38 = vld [vmem:[%s2114_s9 + $0x68] sm:$0xff]  ;;  %v899_v41 = vld [vmem:[%s2114_s9 + $0x50] sm:$0xff] }
  0x28   : > { %755 = vmatpush.msrb.mxu0 %v735_v14  ;;  %685 = vmatpush.msra.mxu2 %v663_v39  ;;  %v901_v39 = vld [vmem:[%s2114_s9 + $0x60] sm:$0xff] }
  0x29   : > { %792 = vmatpush.msrb.mxu1 %v772_v42  ;;  %v898_v42 = vld [vmem:[%s2114_s9 + $0x48] sm:$0xff] }
  0x2a   : > { %756 = vmatpush.msrb.mxu0 %v734_v15  ;;  %686 = vmatpush.msra.mxu2 %v662_v40  ;;  %v900_v40 = vld [vmem:[%s2114_s9 + $0x58] sm:$0xff] }
  0x2b   : > { %793 = vmatpush.msrb.mxu1 %v771_v43  ;;  %v897_v43 = vld [vmem:[%s2114_s9 + $0x40] sm:$0xff] }
  0x2c   : > { %757 = vmatpush.msrb.mxu0 %v733_v16 }
  0x2d   : > { %794 = vmatpush.msrb.mxu1 %v770_v44  ;;  %v896_v44 = vld [vmem:[%s2114_s9 + $0x38] sm:$0xff] }
  0xa1   : > { %v614_v18 = vpop.f32.mrf.mxu0 }
  0xa2   : > { %v615_v19 = vadd.f32 %v1451_v17, %v614_v18 }
  0xa4   : > { %v617_v20 = vmin.f32 %v615_v19, 0.0  ;;  %vm622_vm1 = vcmp.gt.f32.partialorder %v615_v19, 0.0 }
  0xa6   : > { %v618_v22 = vmul.f32 1.442695, %v617_v20 }
  0xa8   : > { %v722_v23 = vpop.f32.mrf.mxu3  ;;  %1458 = vpow2.f32 %v618_v22 }
  0xa9   : > { %v723_v24 = vadd.f32 %v1452_v21, %v722_v23 }
  0xab   : > { %v725_v25 = vmin.f32 %v723_v24, 0.0  ;;  %vm730_vm2 = vcmp.gt.f32.partialorder %v723_v24, 0.0 }
  0xad   : > { %v726_v26 = vmul.f32 1.442695, %v725_v25 }
  0xae   : > { %v1459_v27 = vpop.eup %1458 }
  0xaf   : > { %1460 = vpow2.f32 %v726_v26  ;;  %v1368_v28 = vadd.f32 -1.0, %v1459_v27 }
  0xb1   : > { %v621_v29 = vmul.f32 1.6732632, %v1368_v28 }
  0xb3   : > { %v623_v30 = vsel %vm622_vm1, %v615_v19, %v621_v29  ;;  %vm887_vm1 = vcmask 457728  }
  0xb4   : > { %v624_v32 = vmul.f32 1.050701, %v623_v30 }
  0xb5   : > { %v1461_v31 = vpop.eup %1460 }
  0xb6   : > { %v1374_v33 = vadd.f32 -1.0, %v1461_v31  ;;  %1369 = vmatmul.msk.f32.vlgmr.msra.gmra.mxu1 %vm593_vm0, %v624_v32 }
  0xb8   : > { %v729_v34 = vmul.f32 1.6732632, %v1374_v33 }
  0xba   : > { %v731_v35 = vsel %vm730_vm2, %v723_v24, %v729_v34 }
  0xbb   : > { %v732_v36 = vmul.f32 1.050701, %v731_v35 }
  0xbd   : > { %1375 = vmatmul.msk.f32.vlgmr.msrb.gmra.mxu0 %vm593_vm0, %v732_v36  ;;  %v904_v36 = vld [vmem:[%s2114_s9 + $0x78] sm:$0xff] }
  0xbe   : > { %913 = vmatpush.msrb.mxu2 %v904_v36  ;;  %v963_v36 = vld [vmem:[%s2115_s10 + $0x10] sm:$0xff] }
  0xc0   : > { %914 = vmatpush.msrb.mxu2 %v903_v37  ;;  %v962_v37 = vld [vmem:[%s2115_s10 + $0x8] sm:$0xff] }
  0xc2   : > { %915 = vmatpush.msrb.mxu2 %v902_v38  ;;  %v961_v38 = vld [vmem:[%s2115_s10] sm:$0xff] }
  0xc4   : > { %916 = vmatpush.msrb.mxu2 %v901_v39  ;;  %v909_v39 = vld [vmem:[%s2145_s23 + $0x6] sm:$0x1] }
  0xc6   : > { %917 = vmatpush.msrb.mxu2 %v900_v40 }
  0xc8   : > { %918 = vmatpush.msrb.mxu2 %v899_v41 }
  0xca   : > { %919 = vmatpush.msrb.mxu2 %v898_v42 }
  0xcc   : > { %920 = vmatpush.msrb.mxu2 %v897_v43  ;;  %v1085_v43 = vld [vmem:[%s2118_s13 + $0x18] sm:$0xff] }
  0xce   : > { %921 = vmatpush.msrb.mxu2 %v896_v44 }
 0x133   : > { %v651_v46 = vpop.f32.mrf.mxu1 }
 0x134   : > { %v652_v47 = vadd.f32 %v1453_v45, %v651_v46  ;;  %v908_v45 = vld [vmem:[%s2114_s9 + $0x98] sm:$0xff]  ;;  %v907_v46 = vld [vmem:[%s2114_s9 + $0x90] sm:$0xff] }
 0x135   : > { %945 = vmatpush.msrb.mxu3 %v908_v45  ;;  %v1084_v45 = vld [vmem:[%s2118_s13 + $0x10] sm:$0xff] }
 0x136   : > { %v654_v48 = vmin.f32 %v652_v47, 0.0  ;;  %vm659_vm3 = vcmp.gt.f32.partialorder %v652_v47, 0.0 }
 0x137   : > { %946 = vmatpush.msrb.mxu3 %v907_v46 }
 0x138   : > { %v655_v50 = vmul.f32 1.442695, %v654_v48  ;;  %v894_v48 = vld [vmem:[%s2114_s9 + $0x28] sm:$0xff] }
 0x13a   : > { %v759_v51 = vpop.f32.mrf.mxu0  ;;  %1462 = vpow2.f32 %v655_v50  ;;  %v906_v50 = vld [vmem:[%s2114_s9 + $0x88] sm:$0xff] }
 0x13b   : > { %v760_v52 = vadd.f32 %v1454_v49, %v759_v51  ;;  %v893_v49 = vld [vmem:[%s2114_s9 + $0x20] sm:$0xff]  ;;  %v892_v51 = vld [vmem:[%s2114_s9 + $0x18] sm:$0xff]  ;;  %947 = vmatpush.msrb.mxu3 %v906_v50 }
 0x13d   : > { %v762_v53 = vmin.f32 %v760_v52, 0.0  ;;  %vm767_vm4 = vcmp.gt.f32.partialorder %v760_v52, 0.0 }
 0x13f   : > { %v763_v54 = vmul.f32 1.442695, %v762_v53  ;;  %v891_v53 = vld [vmem:[%s2114_s9 + $0x10] sm:$0xff] }
 0x140   : > { %v1463_v55 = vpop.eup %1462 }
 0x141   : > { %1464 = vpow2.f32 %v763_v54  ;;  %v1370_v56 = vadd.f32 -1.0, %v1463_v55  ;;  %v1049_v54 = vld [vmem:[%s2117_s12 + $0x58] sm:$0xff] }
 0x143   : > { %v658_v57 = vmul.f32 1.6732632, %v1370_v56  ;;  %v890_v56 = vld [vmem:[%s2114_s9 + $0x8] sm:$0xff] }
 0x145   : > { %v660_v58 = vsel %vm659_vm3, %v652_v47, %v658_v57  ;;  %v895_v47 = vld [vmem:[%s2114_s9 + $0x30] sm:$0xff] }
 0x146   : > { %v661_v60 = vmul.f32 1.050701, %v660_v58  ;;  %922 = vmatpush.msrb.mxu2 %v895_v47  ;;  %v1048_v57 = vld [vmem:[%s2117_s12 + $0x50] sm:$0xff]  ;;  %v889_v58 = vld [vmem:[%s2114_s9] sm:$0xff]  ;;  %v1083_v47 = vld [vmem:[%s2118_s13 + $0x8] sm:$0xff] }
 0x147   : > { %v1465_v59 = vpop.eup %1464 }
 0x148   : > { %v1376_v61 = vadd.f32 -1.0, %v1465_v59  ;;  %1371 = vmatmul.msk.f32.vlgmr.msra.gmra.mxu2 %vm593_vm0, %v661_v60  ;;  %v1047_v59 = vld [vmem:[%s2117_s12 + $0x48] sm:$0xff]  ;;  %v1046_v60 = vld [vmem:[%s2117_s12 + $0x40] sm:$0xff] }
 0x149   : > { %923 = vmatpush.msrb.mxu2 %v894_v48  ;;  %v1082_v48 = vld [vmem:[%s2118_s13] sm:$0xff] }
 0x14a   : > { %v766_v62 = vmul.f32 1.6732632, %v1376_v61  ;;  %v1045_v61 = vld [vmem:[%s2117_s12 + $0x38] sm:$0xff] }
 0x14b   : > { %924 = vmatpush.msrb.mxu2 %v893_v49 }
 0x14c   : > { %v768_v63 = vsel %vm767_vm4, %v760_v52, %v766_v62  ;;  %v905_v52 = vld [vmem:[%s2114_s9 + $0x80] sm:$0xff]  ;;  %v1044_v62 = vld [vmem:[%s2117_s12 + $0x30] sm:$0xff] }
 0x14d   : > { %v769_v0 = vmul.f32 1.050701, %v768_v63  ;;  %925 = vmatpush.msrb.mxu2 %v892_v51  ;;  %948 = vmatpush.msrb.mxu3 %v905_v52  ;;  %v1050_v52 = vld [vmem:[%s2145_s23 + $0x9] sm:$0x1] }
 0x14f   : > { %1377 = vmatmul.msk.f32.vlgmr.msrb.gmra.mxu1 %vm593_vm0, %v769_v0  ;;  %926 = vmatpush.msrb.mxu2 %v891_v53  ;;  %v1043_v0 = vld [vmem:[%s2117_s12 + $0x28] sm:$0xff] }
 0x150   : > { %1058 = vmatpush.msra.mxu3 %v1049_v54 }
 0x151   : > { %927 = vmatpush.msrb.mxu2 %v890_v56 }
 0x152   : > { %1059 = vmatpush.msra.mxu3 %v1048_v57 }
 0x153   : > { %928 = vmatpush.msrb.mxu2 %v889_v58 }
 0x154   : > { %1060 = vmatpush.msra.mxu3 %v1047_v59 }
 0x156   : > { %1061 = vmatpush.msra.mxu3 %v1046_v60  ;;  %v1157_v60 = vld [vmem:[%s2120_s15 + $0x18] sm:$0xff] }
 0x158   : > { %1062 = vmatpush.msra.mxu3 %v1045_v61 }
 0x15a   : > { %1063 = vmatpush.msra.mxu3 %v1044_v62  ;;  %v1156_v62 = vld [vmem:[%s2120_s15 + $0x10] sm:$0xff] }
 0x15c   : > { %1064 = vmatpush.msra.mxu3 %v1043_v0  ;;  %v1154_v0 = vld [vmem:[%s2120_s15] sm:$0xff] }
 0x1cb   : > { %v688_v3 = vpop.f32.mrf.mxu2 }
 0x1cc   : > { %v796_v4 = vpop.f32.mrf.mxu1  ;;  %v689_v5 = vadd.f32 %v1455_v1, %v688_v3  ;;  %v1042_v1 = vld [vmem:[%s2117_s12 + $0x20] sm:$0xff]  ;;  %v1040_v3 = vld [vmem:[%s2117_s12 + $0x10] sm:$0xff] }
 0x1cd   : > { %v797_v6 = vadd.f32 %v1456_v2, %v796_v4  ;;  %v1041_v2 = vld [vmem:[%s2117_s12 + $0x18] sm:$0xff]  ;;  %1065 = vmatpush.msra.mxu3 %v1042_v1 }
 0x1ce   : > { %v691_v7 = vmin.f32 %v689_v5, 0.0  ;;  %vm696_vm5 = vcmp.gt.f32.partialorder %v689_v5, 0.0 }
 0x1cf   : > { %v799_v9 = vmin.f32 %v797_v6, 0.0  ;;  %vm804_vm6 = vcmp.gt.f32.partialorder %v797_v6, 0.0  ;;  %1066 = vmatpush.msra.mxu3 %v1041_v2 }
 0x1d0   : > { %v692_v8 = vmul.f32 1.442695, %v691_v7  ;;  %v1038_v7 = vld [vmem:[%s2117_s12] sm:$0xff] }
 0x1d1   : > { %v800_v10 = vmul.f32 1.442695, %v799_v9  ;;  %1067 = vmatpush.msra.mxu3 %v1040_v3 }
 0x1d2   : > { %1466 = vpow2.f32 %v692_v8 }
 0x1d3   : > { %1468 = vpow2.f32 %v800_v10 }
 0x1d8   : > { %v1467_v11 = vpop.eup %1466 }
 0x1d9   : > { %v1372_v12 = vadd.f32 -1.0, %v1467_v11  ;;  %v1469_v15 = vpop.eup %1468 }
 0x1da   : > { %v1378_v20 = vadd.f32 -1.0, %v1469_v15 }
 0x1db   : > { %v695_v13 = vmul.f32 1.6732632, %v1372_v12 }
 0x1dc   : > { %v803_v21 = vmul.f32 1.6732632, %v1378_v20 }
 0x1dd   : > { %v697_v14 = vsel %vm696_vm5, %v689_v5, %v695_v13 }
 0x1de   : > { %v1810_v16 = vmul.f32 1.050701, %v697_v14  ;;  %v805_v24 = vsel %vm804_vm6, %v797_v6, %v803_v21  ;;  %v1039_v6 = vld [vmem:[%s2117_s12 + $0x8] sm:$0xff] }
 0x1df   : > { %v1820_v26 = vmul.f32 1.050701, %v805_v24  ;;  %1068 = vmatpush.msra.mxu3 %v1039_v6  ;;  %v1000_v6 = vld [vmem:[%s2116_s11 + $0x18] sm:$0xff] }
 0x1e0   : > { %v824_v17 = vrot.slane %v1810_v16, 5  ;;  %v816_v18 = vrot.slane %v1810_v16, 3  ;;  %v808_v19 = vrot.slane %v1810_v16, 1  ;;  %v828_v22 = vrot.slane %v1810_v16, 6  ;;  %1017 = vmatpush.msra.mxu1 %v1000_v6 }
 0x1e1   : > { %v820_v23 = vrot.slane %v1810_v16, 4  ;;  %v812_v25 = vrot.slane %v1810_v16, 2  ;;  %v854_v27 = vrot.slane %v1820_v26, 2  ;;  %v850_v28 = vrot.slane %v1820_v26, 1  ;;  %1069 = vmatpush.msra.mxu3 %v1038_v7  ;;  %v999_v7 = vld [vmem:[%s2116_s11 + $0x10] sm:$0xff] }
 0x1e2   : > { %825 = vrot.lane.b32.xlu2 %v824_v17, %s1552_s22  ;;  %817 = vrot.lane.b32.xlu1 %v816_v18, %s2129_s24  ;;  %v832_v29 = vrot.slane %v1810_v16, 7  ;;  %v866_v30 = vrot.slane %v1820_v26, 5  ;;  %v862_v31 = vrot.slane %v1820_v26, 4  ;;  %v858_v32 = vrot.slane %v1820_v26, 3 }
 0x1e3   : > { %809 = vrot.lane.b32.xlu0 %v808_v19, %s1554_s3  ;;  %v874_v34 = vrot.slane %v1820_v26, 7  ;;  %v870_v35 = vrot.slane %v1820_v26, 6  ;;  %1018 = vmatpush.msra.mxu1 %v999_v7 }
 0x1ea   : > { %829 = vrot.lane.b32.xlu2 %v828_v22, %s1555_s4  ;;  %821 = vrot.lane.b32.xlu1 %v820_v23, %s2130_s25  ;;  %s2146_s4 = sld [smem:[#allocation10_spill]] }
 0x1eb   : > { %813 = vrot.lane.b32.xlu0 %v812_v25, %s1557_s19 }
 0x1f0   : > { %s1832_s24 = scalar_lea.vmem %s2146_s4, %s1726_s26  ;;  %s1398_s26 = sshll.u32 %s1679_s0, 1 }
 0x1f1   : > { %v1457_v33 = vld [vmem:[%s1832_s24] ss:$0 sm:$0xff]  ;;  %s1288_s4 = scalar_lea.hbm %s2123_s18, %s1398_s26 }
 0x1f2   : > { %855 = vrot.lane.b32.xlu2 %v854_v27, %s1554_s3  ;;  %851 = vrot.lane.b32.xlu1 %v850_v28, %s1558_s20  ;;  %s1561_s3 = smov 24   ;;  %s1562_s20 = smov 56   ;;  %v1897_v55 = vld [vmem:[%s1832_s24] sm:$0x1] }
 0x1f3   : > { %833 = vrot.lane.b32.xlu0 %v832_v29, %s1559_s21  ;;  %s2147_s21 = smov 48   ;;  %1379 = vmatmul.msk.f32.vlgmr.msrb.gmra.mxu3 %vm593_vm0, %v1897_v55  ;;  %s2148_s24 = smov 64  }
 0x1fa   : > { %867 = vrot.lane.b32.xlu2 %v866_v30, %s1560_s29  ;;  %863 = vrot.lane.b32.xlu1 %v862_v31, %s1557_s19  ;;  %s575_s19 = sand.u32 1, %s1542_s28  }
 0x1fb   : > { %859 = vrot.lane.b32.xlu0 %v858_v32, %s1561_s3  ;;  %s1365_s29 = sshll.u32 %s575_s19, 1  ;;  %s1278_s0 = scalar_lea.sflag [#allocation3], %s575_s19 }
 0x202   : > { %875 = vrot.lane.b32.xlu1 %v874_v34, %s1562_s20  ;;  %1034 = vrot.lane.b32.xlu2 %v1457_v33, %s2130_s25  ;;  %s1292_s20 = sshll.u32 %s1288_s4, 4  ;;  %s1293_s20 = int_to_ptr.hbm [resolvable:$true] %s1292_s20 }
 0x203   : > { %871 = vrot.lane.b32.xlu0 %v870_v35, %s2147_s21  ;;  %v964_v35 = vld [vmem:[%s2115_s10 + $0x18] sm:$0xff]  ;;  %s1502_s25 = sshra.s32 %s1293_s20, 4  ;;  %s1503_s25 = int_to_ptr.hbm [resolvable:$true] %s1502_s25 }
 0x204   : > { %981 = vmatpush.msra.mxu0 %v964_v35  ;;  %s1504_s21 = scalar_lea.hbm %s1503_s25, 2  ;;  %p1509_p0 = scmp.lt.s32.totalorder %s1503_s25, %s2123_s18 }
 0x205   : > { %p1505_p11 = scmp.ne.s32.totalorder %s1503_s25, %s1504_s21  ;;  %p1510_p1 = scmp.lt.s32.totalorder %s1508_s1, %s1504_s21 }
 0x206   : > { %982 = vmatpush.msra.mxu0 %v963_v36 }
 0x207   : > { %p1506_p12 = pnand %p1505_p11, %p1696_p5  ;;  %p1511_p2 = por %p1510_p1, %p1509_p0 }
 0x208   : > { %983 = vmatpush.msra.mxu0 %v962_v37 }
 0x209   : > { %p1507_p13 = pneg %p1506_p12 }
 0x20a   : > { %984 = vmatpush.msra.mxu0 %v961_v38 }
 0x20b   : > { %p1512_p3 = pnand %p1511_p2, %p1507_p13 }
 0x20c   : > { %1102 = vmatpush.msrb.mxu0 %v1085_v43 }
 0x20e   : > { %1103 = vmatpush.msrb.mxu0 %v1084_v45 }
 0x210   : > { %1104 = vmatpush.msrb.mxu0 %v1083_v47  ;;  %v1226_v47 = vld [vmem:[%s2122_s17 + $0x18] sm:$0xff] }
 0x212   : > { %1105 = vmatpush.msrb.mxu0 %v1082_v48 }
 0x23c   : > { %v826_v63 = vpop.permute.xlu2 %825 }
 0x244   : > { %v830_v8 = vpop.permute.xlu2 %829 }
 0x24c   : > { %v856_v17 = vpop.permute.xlu2 %855 }
 0x254   : > { %v818_v4 = vpop.permute.xlu1 %817  ;;  %v868_v23 = vpop.permute.xlu2 %867 }
 0x255   : > { %v810_v5 = vpop.permute.xlu0 %809 }
 0x256   : > { %v837_v10 = vsel %vm836_vm7, %v1810_v16, %v810_v5 }
 0x25c   : > { %v822_v9 = vpop.permute.xlu1 %821  ;;  %v1035_v32 = vpop.permute.xlu2 %1034 }
 0x25d   : > { %v814_v11 = vpop.permute.xlu0 %813 }
 0x25e   : > { %v838_v12 = vsel %vm593_vm0, %v837_v10, %v814_v11  ;;  %v1121_v10 = vld [vmem:[%s2119_s14 + $0x18] sm:$0xff] }
 0x25f   : > { %v840_v13 = vsel %vm839_vm8, %v838_v12, %v818_v4 }
 0x260   : > { %v842_v14 = vsel %vm841_vm9, %v840_v13, %v822_v9  ;;  %v997_v9 = vld [vmem:[%s2116_s11] sm:$0xff]  ;;  %v1120_v13 = vld [vmem:[%s2119_s14 + $0x10] sm:$0xff] }
 0x261   : > { %v844_v15 = vsel %vm843_vm10, %v842_v14, %v826_v63  ;;  %v1155_v63 = vld [vmem:[%s2120_s15 + $0x8] sm:$0xff] }
 0x262   : > { %v846_v20 = vsel %vm845_vm11, %v844_v15, %v830_v8  ;;  %v998_v8 = vld [vmem:[%s2116_s11 + $0x8] sm:$0xff] }
 0x263   : > { %1019 = vmatpush.msra.mxu1 %v998_v8  ;;  %v1119_v15 = vld [vmem:[%s2119_s14 + $0x8] sm:$0xff] }
 0x264   : > { %v852_v18 = vpop.permute.xlu1 %851 }
 0x265   : > { %v834_v19 = vpop.permute.xlu0 %833  ;;  %v879_v16 = vsel %vm878_vm13, %v1820_v26, %v852_v18  ;;  %1020 = vmatpush.msra.mxu1 %v997_v9  ;;  %v1118_v18 = vld [vmem:[%s2119_s14] sm:$0xff] }
 0x266   : > { %v848_v21 = vsel %vm847_vm12, %v846_v20, %v834_v19  ;;  %v880_v25 = vsel %vm836_vm7, %v879_v16, %v856_v17  ;;  %vm1269_vm12 = vcmask 1040384  }
 0x267   : > { %929 = vmatmul.f32.vlgmr.msrb.gmra.mxu2 %v848_v21  ;;  %1138 = vmatpush.msrb.mxu1 %v1121_v10  ;;  %v1086_v21 = vld [vmem:[%s2145_s23 + $0xa] sm:$0x1] }
 0x269   : > { %1139 = vmatpush.msrb.mxu1 %v1120_v13 }
 0x26b   : > { %1140 = vmatpush.msrb.mxu1 %v1119_v15 }
 0x26c   : > { %v864_v22 = vpop.permute.xlu1 %863 }
 0x26d   : > { %v860_v24 = vpop.permute.xlu0 %859  ;;  %1141 = vmatpush.msrb.mxu1 %v1118_v18 }
 0x26e   : > { %v882_v27 = vsel %vm881_vm14, %v880_v25, %v860_v24 }
 0x26f   : > { %v883_v28 = vsel %vm593_vm0, %v882_v27, %v864_v22 }
 0x270   : > { %v885_v30 = vsel %vm884_vm15, %v883_v28, %v868_v23  ;;  %v1190_v28 = vld [vmem:[%s2121_s16 + $0x18] sm:$0xff] }
 0x274   : > { %v876_v29 = vpop.permute.xlu1 %875 }
 0x275   : > { %v872_v31 = vpop.permute.xlu0 %871 }
 0x276   : > { %v886_v33 = vsel %vm839_vm8, %v885_v30, %v872_v31  ;;  %v950_v41 = vpop.f32.mrf.mxu3  ;;  %v1189_v30 = vld [vmem:[%s2121_s16 + $0x10] sm:$0xff]  ;;  %v1158_v31 = vld [vmem:[%s2145_s23 + $0xc] sm:$0x1] }
 0x277   : > { %v888_v34 = vsel %vm887_vm1, %v886_v33, %v876_v29 }
 0x278   : > { %v1037_v26 = vsel %vm841_vm9, %v888_v34, %v1035_v32  ;;  %v1188_v32 = vld [vmem:[%s2121_s16 + $0x8] sm:$0xff] }
 0x279   : > { %1385 = vmatmul.msk.f32.vlgmr.msra.gmra.mxu3 %vm845_vm11, %v1037_v26  ;;  %v1187_v26 = vld [vmem:[%s2121_s16] sm:$0xff]  ;;  %vm1264_vm11 = vcmask 531456  }
 0x2ea   : > { %v930_v40 = vpop.f32.mrf.mxu2 }
 0x2eb   : > { %v931_v42 = vadd.f32 %v930_v40, %v909_v39 }
 0x2ed   : > { %v951_v44 = vadd.f32 %v950_v41, %v931_v42 }
 0x2ef   : > { %v953_v46 = vmin.f32 %v951_v44, 0.0  ;;  %vm958_vm2 = vcmp.gt.f32.partialorder %v951_v44, 0.0 }
 0x2f1   : > { %v954_v49 = vmul.f32 1.442695, %v953_v46 }
 0x2f3   : > { %1470 = vpow2.f32 %v954_v49  ;;  %v1225_v49 = vld [vmem:[%s2122_s17 + $0x10] sm:$0xff] }
 0x2f9   : > { %v1471_v50 = vpop.eup %1470 }
 0x2fa   : > { %v1380_v51 = vadd.f32 -1.0, %v1471_v50  ;;  %v1224_v50 = vld [vmem:[%s2122_s17 + $0x8] sm:$0xff] }
 0x2fc   : > { %v957_v53 = vmul.f32 1.6732632, %v1380_v51  ;;  %v1071_v54 = vpop.f32.mrf.mxu3  ;;  %v1223_v51 = vld [vmem:[%s2122_s17] sm:$0xff] }
 0x2fd   : > { %v1072_v56 = vadd.f32 %v1071_v54, %v1050_v52 }
 0x2fe   : > { %v959_v57 = vsel %vm958_vm2, %v951_v44, %v957_v53  ;;  %v1191_v53 = vld [vmem:[%s2145_s23 + $0xd] sm:$0x1] }
 0x2ff   : > { %v960_v58 = vmul.f32 1.050701, %v959_v57  ;;  %v1074_v59 = vmin.f32 %v1072_v56, 0.0  ;;  %vm1079_vm3 = vcmp.gt.f32.partialorder %v1072_v56, 0.0 }
 0x301   : > { %v1075_v61 = vmul.f32 1.442695, %v1074_v59  ;;  %1381 = vmatmul.msk.f32.vlgmr.msra.gmra.mxu0 %vm593_vm0, %v960_v58 }
 0x302   : > { %1171 = vmatpush.msra.mxu0 %v1157_v60 }
 0x303   : > { %1472 = vpow2.f32 %v1075_v61 }
 0x304   : > { %1172 = vmatpush.msra.mxu0 %v1156_v62 }
 0x306   : > { %1173 = vmatpush.msra.mxu0 %v1155_v63 }
 0x308   : > { %1174 = vmatpush.msra.mxu0 %v1154_v0  ;;  %v1227_v0 = vld [vmem:[%s2145_s23 + $0xe] sm:$0x1] }
 0x309   : > { %v1473_v1 = vpop.eup %1472 }
 0x30a   : > { %v1386_v2 = vadd.f32 -1.0, %v1473_v1 }
 0x30c   : > { %v1078_v3 = vmul.f32 1.6732632, %v1386_v2 }
 0x30e   : > { %v1080_v4 = vsel %vm1079_vm3, %v1072_v56, %v1078_v3 }
 0x30f   : > { %v1081_v5 = vmul.f32 1.050701, %v1080_v4 }
 0x311   : > { %1387 = vmatmul.msk.f32.vlgmr.msrb.gmra.mxu0 %vm593_vm0, %v1081_v5 }
 0x312   : > { %1243 = vmatpush.msrb.mxu0 %v1226_v47 }
 0x314   : > { %1244 = vmatpush.msrb.mxu0 %v1225_v49 }
 0x316   : > { %1245 = vmatpush.msrb.mxu0 %v1224_v50 }
 0x318   : > { %1246 = vmatpush.msrb.mxu0 %v1223_v51 }
 0x319   : > { %1391 = vmatmul.msk.f32.vlgmr.msra.gmra.mxu0 %vm593_vm0, %v1897_v55  ;;  %v965_v55 = vld [vmem:[%s2145_s23 + $0x7] sm:$0x1] }
 0x37e   : > { %v986_v11 = vpop.f32.mrf.mxu0 }
 0x37f   : > { %v987_v12 = vadd.f32 %v986_v11, %v965_v55  ;;  %v1122_v55 = vld [vmem:[%s2145_s23 + $0xb] sm:$0x1]  ;;  %v1001_v11 = vld [vmem:[%s2145_s23 + $0x8] sm:$0x1] }
 0x381   : > { %v989_v14 = vmin.f32 %v987_v12, 0.0  ;;  %vm994_vm4 = vcmp.gt.f32.partialorder %v987_v12, 0.0 }
 0x383   : > { %v990_v17 = vmul.f32 1.442695, %v989_v14 }
 0x385   : > { %1474 = vpow2.f32 %v990_v17 }
 0x38b   : > { %v1475_v19 = vpop.eup %1474 }
 0x38c   : > { %v1382_v20 = vadd.f32 -1.0, %v1475_v19 }
 0x38e   : > { %v993_v16 = vmul.f32 1.6732632, %v1382_v20  ;;  %v1107_v22 = vpop.f32.mrf.mxu0 }
 0x38f   : > { %v1108_v23 = vadd.f32 %v1107_v22, %v1086_v21 }
 0x390   : > { %v995_v24 = vsel %vm994_vm4, %v987_v12, %v993_v16 }
 0x391   : > { %v996_v25 = vmul.f32 1.050701, %v995_v24  ;;  %v1110_v27 = vmin.f32 %v1108_v23, 0.0  ;;  %vm1115_vm5 = vcmp.gt.f32.partialorder %v1108_v23, 0.0 }
 0x393   : > { %v1111_v29 = vmul.f32 1.442695, %v1110_v27  ;;  %1383 = vmatmul.msk.f32.vlgmr.msra.gmra.mxu1 %vm593_vm0, %v996_v25  ;;  %v1272_v25 = vlaneseq }
 0x394   : > { %1207 = vmatpush.msra.mxu1 %v1190_v28 }
 0x395   : > { %1476 = vpow2.f32 %v1111_v29  ;;  %vm1274_vm13 = vcmp.lt.s32.totalorder %v1272_v25, 256 }
 0x396   : > { %v1176_v33 = vpop.f32.mrf.mxu0  ;;  %1208 = vmatpush.msra.mxu1 %v1189_v30 }
 0x397   : > { %v1177_v34 = vadd.f32 %v1176_v33, %v1158_v31 }
 0x398   : > { %1209 = vmatpush.msra.mxu1 %v1188_v32 }
 0x399   : > { %v1179_v35 = vmin.f32 %v1177_v34, 0.0  ;;  %vm1184_vm6 = vcmp.gt.f32.partialorder %v1177_v34, 0.0 }
 0x39a   : > { %1210 = vmatpush.msra.mxu1 %v1187_v26 }
 0x39b   : > { %v1477_v36 = vpop.eup %1476  ;;  %v1180_v37 = vmul.f32 1.442695, %v1179_v35 }
 0x39c   : > { %v1388_v38 = vadd.f32 -1.0, %v1477_v36 }
 0x39d   : > { %1478 = vpow2.f32 %v1180_v37 }
 0x39e   : > { %v1114_v39 = vmul.f32 1.6732632, %v1388_v38 }
 0x3a0   : > { %v1116_v40 = vsel %vm1115_vm5, %v1108_v23, %v1114_v39 }
 0x3a1   : > { %v1117_v41 = vmul.f32 1.050701, %v1116_v40 }
 0x3a3   : > { %v1479_v42 = vpop.eup %1478  ;;  %1389 = vmatmul.msk.f32.vlgmr.msrb.gmra.mxu1 %vm593_vm0, %v1117_v41 }
 0x3a4   : > { %v1392_v43 = vadd.f32 -1.0, %v1479_v42 }
 0x3a6   : > { %v1183_v44 = vmul.f32 1.6732632, %v1392_v43 }
 0x3a8   : > { %v1185_v45 = vsel %vm1184_vm6, %v1177_v34, %v1183_v44 }
 0x3a9   : > { %v1186_v46 = vmul.f32 1.050701, %v1185_v45 }
 0x3ab   : > { %1393 = vmatmul.msk.f32.vlgmr.msra.gmra.mxu1 %vm593_vm0, %v1186_v46 }
 0x410   : > { %v1022_v48 = vpop.f32.mrf.mxu1 }
 0x411   : > { %v1023_v12 = vadd.f32 %v1022_v48, %v1001_v11 }
 0x413   : > { %v1025_v14 = vmin.f32 %v1023_v12, 0.0  ;;  %vm1030_vm10 = vcmp.gt.f32.partialorder %v1023_v12, 0.0 }
 0x415   : > { %v1026_v17 = vmul.f32 1.442695, %v1025_v14 }
 0x420   : > { %v1143_v52 = vpop.f32.mrf.mxu1 }
 0x421   : > { %v1144_v10 = vadd.f32 %v1143_v52, %v1122_v55 }
 0x423   : > { %v1146_v13 = vmin.f32 %v1144_v10, 0.0 }
 0x425   : > { %v1147_v15 = vmul.f32 1.442695, %v1146_v13 }
 0x428   : > { %v1212_v54 = vpop.f32.mrf.mxu1 }
 0x429   : > { %v1213_v56 = vadd.f32 %v1212_v54, %v1191_v53 }
 0x42b   : > { %v1215_v57 = vmin.f32 %v1213_v56, 0.0  ;;  %vm1220_vm7 = vcmp.gt.f32.partialorder %v1213_v56, 0.0 }
 0x42d   : > { %v1216_v58 = vmul.f32 1.442695, %v1215_v57 }
 0x42f   : > { %1480 = vpow2.f32 %v1216_v58 }
 0x435   : > { %v1481_v59 = vpop.eup %1480 }
 0x436   : > { %v1394_v60 = vadd.f32 -1.0, %v1481_v59 }
 0x438   : > { %v1219_v61 = vmul.f32 1.6732632, %v1394_v60 }
 0x43a   : > { %v1221_v62 = vsel %vm1220_vm7, %v1213_v56, %v1219_v61 }
 0x43b   : > { %v1222_v63 = vmul.f32 1.050701, %v1221_v62 }
 0x43d   : > { %1395 = vmatmul.msk.f32.vlgmr.msrb.gmra.mxu0 %vm593_vm0, %v1222_v63  ;;  %vm1151_vm0 = vcmp.gt.f32.partialorder %v1144_v10, 0.0 }
 0x4ba   : > { %v1248_v1 = vpop.f32.mrf.mxu0 }
 0x4bb   : > { %v1249_v2 = vadd.f32 %v1248_v1, %v1227_v0 }
 0x4bd   : > { %v1251_v3 = vmin.f32 %v1249_v2, 0.0  ;;  %vm1256_vm8 = vcmp.gt.f32.partialorder %v1249_v2, 0.0 }
 0x4bf   : > { %v1252_v4 = vmul.f32 1.442695, %v1251_v3 }
 0x4c1   : > { %1482 = vpow2.f32 %v1252_v4 }
 0x4c2   : > { %1484 = vpow2.f32 %v1147_v15 }
 0x4c3   : > { %1486 = vpow2.f32 %v1026_v17 }
 0x4c7   : > { %v1483_v5 = vpop.eup %1482 }
 0x4c8   : > { %v1396_v6 = vadd.f32 -1.0, %v1483_v5  ;;  %v1485_v18 = vpop.eup %1484 }
 0x4c9   : > { %v1390_v19 = vadd.f32 -1.0, %v1485_v18  ;;  %v1487_v20 = vpop.eup %1486 }
 0x4ca   : > { %v1255_v7 = vmul.f32 1.6732632, %v1396_v6  ;;  %v1384_v21 = vadd.f32 -1.0, %v1487_v20 }
 0x4cb   : > { %v1150_v16 = vmul.f32 1.6732632, %v1390_v19 }
 0x4cc   : > { %v1257_v8 = vsel %vm1256_vm8, %v1249_v2, %v1255_v7  ;;  %v1029_v22 = vmul.f32 1.6732632, %v1384_v21 }
 0x4cd   : > { %v1258_v9 = vmul.f32 1.050701, %v1257_v8  ;;  %v1152_v23 = vsel %vm1151_vm0, %v1144_v10, %v1150_v16 }
 0x4ce   : > { %v1153_v24 = vmul.f32 1.050701, %v1152_v23  ;;  %v1031_v27 = vsel %vm1030_vm10, %v1023_v12, %v1029_v22 }
 0x4cf   : > { %1260 = vrot.lane.b32.xlu0 %v1258_v9, %s2148_s24  ;;  %s577_s24 = scalar_lea.vmem [#allocation2], %s1365_s29  ;;  %v1032_v31 = vmul.f32 1.050701, %v1031_v27 }
 0x4d0   : > { %s1290_s3 = sshll.u32 %s577_s24, 4  ;;  %s1291_s3 = int_to_ptr.vmem [resolvable:$true] %s1290_s3 }
 0x541   : > { %v1261_v28 = vpop.permute.xlu0 %1260 }
 0x542   : > { %v1263_v29 = vsel %vm841_vm9, %v1153_v24, %v1261_v28 }
 0x543   : > { %v1265_v30 = vsel %vm1264_vm11, %v1263_v29, 0.0 }
 0x544   : > { %v1268_v32 = vrot.slane %v1265_v30, 7 }
 0x546   : > { %v1270_v33 = vsel %vm1269_vm12, %v1032_v31, %v1268_v32 }
 0x547   : > { %1276 = vst.msk [vmem:[%s577_s24] sm:$0x3] %vm1274_vm13, %v1270_v33 }
 0x548   : > { %1515 = shalt.err (!%p1512_p3)
}
 0x549   : > { %1401 = dma.vmem_to_hbm [thread:$0]  (%p1696_p5), %s1291_s3, 32, %s1293_s20, %s1278_s0  }
 0x54a PF: > { %p1407_p4 = scmp.ge.s32.totalorder %s1550_s30, 2  ;;  %s1304_s24 = sand.u32 1, %s1538_s27  }
 0x54b   : > { %s1305_s29 = scalar_lea.sflag [#allocation3], %s1304_s24 }
 0x54c   : > { %p1404_p7 = pnand %p1407_p4, %p1700_p6 }
 0x54e   : > { %p1405_p8 = pneg %p1404_p7 }
 0x550   : > { %1533 = dma.done.wait (%p1405_p8), %s1305_s29, 32  }
 0x551   : > { %1535 = vsyncadd (%p1405_p8), %s1305_s29, 4294967264  ;;  %s2150_s30 = sld [smem:[#allocation6_spill]]  ;;  %s2153_s27 = smov %s1542_s28 }
 0x552   : > { %s2151_s25 = sld [smem:[#allocation5_spill]] }
 0x553   : > { %s2152_s29 = sld [smem:[#allocation7_spill]] }
 0x557   : > { %p28_p9 = scmp.ge.s32.totalorder %s2150_s30, 4  }
 0x558   : > { %s2154_s28 = smov %s2151_s25 }
 0x559   :  { %30 = sbr.rel (!%p28_p9) target bundleno = 9 (0x9), region = 130 }
 0x55e   :  { %1311 = vsyncpa [#allocation3], 1 }
 0x55f   :  { %1313 = vsyncpa [#allocation3 + $0x1], 1 }

// kernel: tpu_custom_call.1
= control target key start
LH: loop header
LB: loop body
LE: loop exit
PB: predicated region body
PF: predicated region fallthrough
CT: control target
= control target key end

     0   :  { %s2105_s0 = inlined_call_operand.vmem [shape: f32[2,8,32], index: 0, kind: input, shape index: {}]   ;;  %s2106_s1 = inlined_call_operand.vmem [shape: f32[2,1,32], index: 1, kind: input, shape index: {}]   ;;  %s2107_s2 = inlined_call_operand.vmem [shape: f32[15,128], index: 2, kind: input, shape index: {}]   ;;  %s2108_s3 = inlined_call_operand.vmem [shape: f32[32,32], index: 3, kind: input, shape index: {}]   ;;  %s2109_s4 = inlined_call_operand.vmem [shape: f32[32,32], index: 4, kind: input, shape index: {}]   ;;  %s2110_s5 = inlined_call_operand.vmem [shape: f32[32,16], index: 5, kind: input, shape index: {}]   ;;  %s2111_s6 = inlined_call_operand.vmem [shape: f32[32,32], index: 6, kind: input, shape index: {}]   ;;  %s2112_s7 = inlined_call_operand.vmem [shape: f32[32,32], index: 7, kind: input, shape index: {}]   ;;  %s2113_s8 = inlined_call_operand.vmem [shape: f32[32,8], index: 8, kind: input, shape index: {}]   ;;  %s2114_s9 = inlined_call_operand.vmem [shape: f32[160,32], index: 9, kind: input, shape index: {}]   ;;  %s2115_s10 = inlined_call_operand.vmem [shape: f32[32,32], index: 10, kind: input, shape index: {}]   ;;  %s2116_s11 = inlined_call_operand.vmem [shape: f32[32,128], index: 11, kind: input, shape index: {}]   ;;  %s2117_s12 = inlined_call_operand.vmem [shape: f32[96,32], index: 12, kind: input, shape index: {}]   ;;  %s2118_s13 = inlined_call_operand.vmem [shape: f32[32,32], index: 13, kind: input, shape index: {}]   ;;  %s2119_s14 = inlined_call_operand.vmem [shape: f32[32,64], index: 14, kind: input, shape index: {}]   ;;  %s2120_s15 = inlined_call_operand.vmem [shape: f32[32,32], index: 15, kind: input, shape index: {}]   ;;  %s2121_s16 = inlined_call_operand.vmem [shape: f32[32,32], index: 16, kind: input, shape index: {}]   ;;  %s2122_s17 = inlined_call_operand.vmem [shape: f32[32,1], index: 17, kind: input, shape index: {}]   ;;  %s2123_s18 = inlined_call_operand.hbm [shape: f32[2,1,256], index: 18, kind: output, shape index: {}]  }
   0x1   :  { %2131 = sst [smem:[#allocation9_spill]] %s2105_s0 }
   0x2   :  { %2132 = sst [smem:[#allocation10_spill]] %s2106_s1 }
   0x3   :  { %2133 = sst [smem:[#allocation11_spill]] %s2107_s2 }
   0x4   :  { %2134 = sst [smem:[#allocation12_spill]] %s2108_s3 }
   0x5   :  { %2135 = sst [smem:[#allocation13_spill]] %s2109_s4 }
   0x6   :  { %23 = vsyncpa [#allocation3], 0 }
   0x7   :  { %25 = vsyncpa [#allocation3 + $0x1], 0  ;;  %s1658_s27 = smov 0   ;;  %s1660_s28 = smov 0  }
   0x8   :  { %s1662_s29 = smov 0   ;;  %s1664_s30 = smov 0  }
   0x9 LB: > { %2136 = sst [smem:[#allocation5_spill]] %s1546_s29  ;;  %s1679_s0 = sadd.s32 4294967295, %s1550_s30   ;;  %s1550_s30 = sphi %s1664_s30, %s2150_s30   ;;  %s1546_s29 = sphi %s1662_s29, %s2152_s29   ;;  %s1542_s28 = sphi %s1660_s28, %s2154_s28   ;;  %s1538_s27 = sphi %s1658_s27, %s2153_s27  }
   0xa   : > { %s1361_s19 = sadd.s32 4294967294, %s1550_s30   ;;  %s1683_s1 = sadd.s32 1, %s1550_s30  }
   0xb   : > { %2137 = sst [smem:[#allocation6_spill]] %s1683_s1  ;;  %s426_s20 = sadd.s32 1, %s1546_s29 }
   0xc   : > { %s423_s21 = ssub.s32 %s1550_s30, %s1683_s1  ;;  %p436_p0 = scmp.ne.s32.totalorder %s1546_s29, %s1542_s28 }
   0xd   : > { %p424_p1 = scmp.eq.s32.totalorder %s423_s21, 0  ;;  %p437_p2 = scmp.eq.s32.totalorder %s1679_s0, 1 }
   0xe   : > { %p442_p3 = scmp.ne.s32.totalorder %s1542_s28, %s1538_s27  ;;  %p443_p4 = scmp.eq.s32.totalorder %s1361_s19, 1 }
   0xf   : > { %s1694_s22 = scalar_select %p424_p1, %s1546_s29, %s426_s20  }
  0x10   : > { %p1696_p5 = por %p437_p2, %p436_p0  ;;  %p1700_p6 = por %p443_p4, %p442_p3 }
  0x11   : > { %2138 = sst [smem:[#allocation7_spill]] %s1694_s22  ;;  %p1364_p7 = scmp.ge.s32.totalorder %s1550_s30, 1 }
  0x12   : > { %s2140_s23 = scalar_select %p1700_p6, 1, 0 }
  0x13   : > { %p522_p8 = scmp.lt.s32.totalorder %s1550_s30, 3 }
  0x14   : > { %2141 = sst [smem:[#allocation8_spill]] %s2140_s23 }
  0x15   : > { %p523_p9 = pnand %p1364_p7, %p522_p8 }
  0x16   : > { %s2142_s3 = sld [smem:[#allocation12_spill]] (!%p523_p9)  ;;  %p578_p10 = scmp.lt.s32.totalorder (!%p523_p9), %s1679_s0, 1 }
  0x17   : > { %526 = sbr.rel (%p523_p9) target bundleno = 1354 (0x54a), region = 92  ;;  %s2143_s23 = sld [smem:[#allocation9_spill]] (!%p523_p9) }
  0x18   : > { %s2144_s4 = sld [smem:[#allocation13_spill]] (!%p523_p9)  ;;  %s2129_s24 = smov (!%p523_p9), 48  }
  0x19   : > { %s1557_s19 = smov (!%p523_p9), 32   ;;  %s1558_s20 = smov (!%p523_p9), 8  }
  0x1a   : > { %s1559_s21 = smov (!%p523_p9), 112   ;;  %s1560_s29 = smov (!%p523_p9), 40  }
  0x1b   : > { %s1508_s1 = scalar_lea.hbm (!%p523_p9), %s2123_s18, 4 }
  0x1c   : > { %v590_v0 = vld [vmem:[%s2142_s3 + $0x18] sm:$0xff]  ;;  %v589_v2 = vld [vmem:[%s2142_s3 + $0x10] sm:$0xff]  ;;  %v588_v4 = vld [vmem:[%s2142_s3 + $0x8] sm:$0xff]  ;;  %s1726_s26 = scalar_select %p578_p10, %s1679_s0, 1  ;;  %vm593_vm0 = vcmask 261120   ;;  %vm836_vm7 = vcmask 130048  }
  0x1d   : > { %v702_v1 = vld [vmem:[%s2111_s6 + $0x18] sm:$0xff]  ;;  %609 = vmatpush.msra.mxu0 %v590_v0  ;;  %v701_v3 = vld [vmem:[%s2111_s6 + $0x10] sm:$0xff]  ;;  %v700_v5 = vld [vmem:[%s2111_s6 + $0x8] sm:$0xff]  ;;  %vm839_vm8 = vcmask 392192   ;;  %vm841_vm9 = vcmask 523264   ;;  %vm843_vm10 = vcmask 654336  }
  0x1e   : > { %717 = vmatpush.msra.mxu3 %v702_v1  ;;  %v587_v6 = vld [vmem:[%s2142_s3] sm:$0xff]  ;;  %s1366_s22 = sshll.u32 %s1726_s26, 3  ;;  %v628_v9 = vld [vmem:[%s2144_s4 + $0x18] sm:$0xff]  ;;  %v627_v10 = vld [vmem:[%s2144_s4 + $0x10] sm:$0xff]  ;;  %s1554_s3 = smov 16   ;;  %vm845_vm11 = vcmask 785408  }
  0x1f   : > { %610 = vmatpush.msra.mxu0 %v589_v2  ;;  %v699_v7 = vld [vmem:[%s2111_s6] sm:$0xff]  ;;  %s581_s25 = scalar_lea.vmem %s2143_s23, %s1366_s22  ;;  %646 = vmatpush.msra.mxu1 %v628_v9  ;;  %v626_v11 = vld [vmem:[%s2144_s4 + $0x8] sm:$0xff]  ;;  %v736_v13 = vld [vmem:[%s2112_s7 + $0x18] sm:$0xff]  ;;  %s2145_s23 = sld [smem:[#allocation11_spill]]  ;;  %vm847_vm12 = vcmask 916480   ;;  %vm878_vm13 = vcmask 64512  }
  0x20   : > { %718 = vmatpush.msra.mxu3 %v701_v3  ;;  %v585_v8 = vld [vmem:[%s581_s25] sm:$0xff]  ;;  %v735_v14 = vld [vmem:[%s2112_s7 + $0x10] sm:$0xff]  ;;  %v734_v15 = vld [vmem:[%s2112_s7 + $0x8] sm:$0xff]  ;;  %s1552_s22 = smov 80   ;;  %s2130_s25 = smov 64   ;;  %vm881_vm14 = vcmask 195584  }
  0x21   : > { %611 = vmatpush.msra.mxu0 %v588_v4  ;;  %647 = vmatpush.msra.mxu1 %v627_v10  ;;  %v625_v12 = vld [vmem:[%s2144_s4] sm:$0xff]  ;;  %v665_v37 = vld [vmem:[%s2110_s5 + $0x18] sm:$0xff]  ;;  %v664_v38 = vld [vmem:[%s2110_s5 + $0x10] sm:$0xff]  ;;  %s1555_s4 = smov 96   ;;  %vm884_vm15 = vcmask 326656  }
  0x22   : > { %719 = vmatpush.msra.mxu3 %v700_v5  ;;  %v733_v16 = vld [vmem:[%s2112_s7] sm:$0xff]  ;;  %683 = vmatpush.msra.mxu2 %v665_v37  ;;  %v663_v39 = vld [vmem:[%s2110_s5 + $0x8] sm:$0xff]  ;;  %v773_v41 = vld [vmem:[%s2113_s8 + $0x18] sm:$0xff] }
  0x23   : > { %612 = vmatpush.msra.mxu0 %v587_v6  ;;  %648 = vmatpush.msra.mxu1 %v626_v11  ;;  %v662_v40 = vld [vmem:[%s2110_s5] sm:$0xff]  ;;  %v772_v42 = vld [vmem:[%s2113_s8 + $0x10] sm:$0xff]  ;;  %v771_v43 = vld [vmem:[%s2113_s8 + $0x8] sm:$0xff] }
  0x24   : > { %720 = vmatpush.msra.mxu3 %v699_v7  ;;  %1367 = vmatmul.msk.f32.vlgmr.msra.gmra.mxu0 %vm593_vm0, %v585_v8  ;;  %v770_v44 = vld [vmem:[%s2113_s8] sm:$0xff]  ;;  %v903_v37 = vld [vmem:[%s2114_s9 + $0x70] sm:$0xff] }
  0x25   : > { %1373 = vmatmul.msk.f32.vlgmr.msra.gmra.mxu3 %vm593_vm0, %v585_v8  ;;  %649 = vmatpush.msra.mxu1 %v625_v12  ;;  %v1451_v17 = vld [vmem:[%s2145_s23] ss:$0 sm:$0xff]  ;;  %v1452_v21 = vld [vmem:[%s2145_s23 + $0x3] ss:$0 sm:$0xff]  ;;  %v1453_v45 = vld [vmem:[%s2145_s23 + $0x1] ss:$0 sm:$0xff] }
  0x26   : > { %754 = vmatpush.msrb.mxu0 %v736_v13  ;;  %684 = vmatpush.msra.mxu2 %v664_v38  ;;  %v1454_v49 = vld [vmem:[%s2145_s23 + $0x4] ss:$0 sm:$0xff]  ;;  %v1455_v1 = vld [vmem:[%s2145_s23 + $0x2] ss:$0 sm:$0xff]  ;;  %v1456_v2 = vld [vmem:[%s2145_s23 + $0x5] ss:$0 sm:$0xff] }
  0x27   : > { %791 = vmatpush.msrb.mxu1 %v773_v41  ;;  %v902_v38 = vld [vmem:[%s2114_s9 + $0x68] sm:$0xff]  ;;  %v899_v41 = vld [vmem:[%s2114_s9 + $0x50] sm:$0xff] }
  0x28   : > { %755 = vmatpush.msrb.mxu0 %v735_v14  ;;  %685 = vmatpush.msra.mxu2 %v663_v39  ;;  %v901_v39 = vld [vmem:[%s2114_s9 + $0x60] sm:$0xff] }
  0x29   : > { %792 = vmatpush.msrb.mxu1 %v772_v42  ;;  %v898_v42 = vld [vmem:[%s2114_s9 + $0x48] sm:$0xff] }
  0x2a   : > { %756 = vmatpush.msrb.mxu0 %v734_v15  ;;  %686 = vmatpush.msra.mxu2 %v662_v40  ;;  %v900_v40 = vld [vmem:[%s2114_s9 + $0x58] sm:$0xff] }
  0x2b   : > { %793 = vmatpush.msrb.mxu1 %v771_v43  ;;  %v897_v43 = vld [vmem:[%s2114_s9 + $0x40] sm:$0xff] }
  0x2c   : > { %757 = vmatpush.msrb.mxu0 %v733_v16 }
  0x2d   : > { %794 = vmatpush.msrb.mxu1 %v770_v44  ;;  %v896_v44 = vld [vmem:[%s2114_s9 + $0x38] sm:$0xff] }
  0xa1   : > { %v614_v18 = vpop.f32.mrf.mxu0 }
  0xa2   : > { %v615_v19 = vadd.f32 %v1451_v17, %v614_v18 }
  0xa4   : > { %v617_v20 = vmin.f32 %v615_v19, 0.0  ;;  %vm622_vm1 = vcmp.gt.f32.partialorder %v615_v19, 0.0 }
  0xa6   : > { %v618_v22 = vmul.f32 1.442695, %v617_v20 }
  0xa8   : > { %v722_v23 = vpop.f32.mrf.mxu3  ;;  %1458 = vpow2.f32 %v618_v22 }
  0xa9   : > { %v723_v24 = vadd.f32 %v1452_v21, %v722_v23 }
  0xab   : > { %v725_v25 = vmin.f32 %v723_v24, 0.0  ;;  %vm730_vm2 = vcmp.gt.f32.partialorder %v723_v24, 0.0 }
  0xad   : > { %v726_v26 = vmul.f32 1.442695, %v725_v25 }
  0xae   : > { %v1459_v27 = vpop.eup %1458 }
  0xaf   : > { %1460 = vpow2.f32 %v726_v26  ;;  %v1368_v28 = vadd.f32 -1.0, %v1459_v27 }
  0xb1   : > { %v621_v29 = vmul.f32 1.6732632, %v1368_v28 }
  0xb3   : > { %v623_v30 = vsel %vm622_vm1, %v615_v19, %v621_v29  ;;  %vm887_vm1 = vcmask 457728  }
  0xb4   : > { %v624_v32 = vmul.f32 1.050701, %v623_v30 }
  0xb5   : > { %v1461_v31 = vpop.eup %1460 }
  0xb6   : > { %v1374_v33 = vadd.f32 -1.0, %v1461_v31  ;;  %1369 = vmatmul.msk.f32.vlgmr.msra.gmra.mxu1 %vm593_vm0, %v624_v32 }
  0xb8   : > { %v729_v34 = vmul.f32 1.6732632, %v1374_v33 }
  0xba   : > { %v731_v35 = vsel %vm730_vm2, %v723_v24, %v729_v34 }
  0xbb   : > { %v732_v36 = vmul.f32 1.050701, %v731_v35 }
  0xbd   : > { %1375 = vmatmul.msk.f32.vlgmr.msrb.gmra.mxu0 %vm593_vm0, %v732_v36  ;;  %v904_v36 = vld [vmem:[%s2114_s9 + $0x78] sm:$0xff] }
  0xbe   : > { %913 = vmatpush.msrb.mxu2 %v904_v36  ;;  %v963_v36 = vld [vmem:[%s2115_s10 + $0x10] sm:$0xff] }
  0xc0   : > { %914 = vmatpush.msrb.mxu2 %v903_v37  ;;  %v962_v37 = vld [vmem:[%s2115_s10 + $0x8] sm:$0xff] }
  0xc2   : > { %915 = vmatpush.msrb.mxu2 %v902_v38  ;;  %v961_v38 = vld [vmem:[%s2115_s10] sm:$0xff] }
  0xc4   : > { %916 = vmatpush.msrb.mxu2 %v901_v39  ;;  %v909_v39 = vld [vmem:[%s2145_s23 + $0x6] sm:$0x1] }
  0xc6   : > { %917 = vmatpush.msrb.mxu2 %v900_v40 }
  0xc8   : > { %918 = vmatpush.msrb.mxu2 %v899_v41 }
  0xca   : > { %919 = vmatpush.msrb.mxu2 %v898_v42 }
  0xcc   : > { %920 = vmatpush.msrb.mxu2 %v897_v43  ;;  %v1085_v43 = vld [vmem:[%s2118_s13 + $0x18] sm:$0xff] }
  0xce   : > { %921 = vmatpush.msrb.mxu2 %v896_v44 }
 0x133   : > { %v651_v46 = vpop.f32.mrf.mxu1 }
 0x134   : > { %v652_v47 = vadd.f32 %v1453_v45, %v651_v46  ;;  %v908_v45 = vld [vmem:[%s2114_s9 + $0x98] sm:$0xff]  ;;  %v907_v46 = vld [vmem:[%s2114_s9 + $0x90] sm:$0xff] }
 0x135   : > { %945 = vmatpush.msrb.mxu3 %v908_v45  ;;  %v1084_v45 = vld [vmem:[%s2118_s13 + $0x10] sm:$0xff] }
 0x136   : > { %v654_v48 = vmin.f32 %v652_v47, 0.0  ;;  %vm659_vm3 = vcmp.gt.f32.partialorder %v652_v47, 0.0 }
 0x137   : > { %946 = vmatpush.msrb.mxu3 %v907_v46 }
 0x138   : > { %v655_v50 = vmul.f32 1.442695, %v654_v48  ;;  %v894_v48 = vld [vmem:[%s2114_s9 + $0x28] sm:$0xff] }
 0x13a   : > { %v759_v51 = vpop.f32.mrf.mxu0  ;;  %1462 = vpow2.f32 %v655_v50  ;;  %v906_v50 = vld [vmem:[%s2114_s9 + $0x88] sm:$0xff] }
 0x13b   : > { %v760_v52 = vadd.f32 %v1454_v49, %v759_v51  ;;  %v893_v49 = vld [vmem:[%s2114_s9 + $0x20] sm:$0xff]  ;;  %v892_v51 = vld [vmem:[%s2114_s9 + $0x18] sm:$0xff]  ;;  %947 = vmatpush.msrb.mxu3 %v906_v50 }
 0x13d   : > { %v762_v53 = vmin.f32 %v760_v52, 0.0  ;;  %vm767_vm4 = vcmp.gt.f32.partialorder %v760_v52, 0.0 }
 0x13f   : > { %v763_v54 = vmul.f32 1.442695, %v762_v53  ;;  %v891_v53 = vld [vmem:[%s2114_s9 + $0x10] sm:$0xff] }
 0x140   : > { %v1463_v55 = vpop.eup %1462 }
 0x141   : > { %1464 = vpow2.f32 %v763_v54  ;;  %v1370_v56 = vadd.f32 -1.0, %v1463_v55  ;;  %v1049_v54 = vld [vmem:[%s2117_s12 + $0x58] sm:$0xff] }
 0x143   : > { %v658_v57 = vmul.f32 1.6732632, %v1370_v56  ;;  %v890_v56 = vld [vmem:[%s2114_s9 + $0x8] sm:$0xff] }
 0x145   : > { %v660_v58 = vsel %vm659_vm3, %v652_v47, %v658_v57  ;;  %v895_v47 = vld [vmem:[%s2114_s9 + $0x30] sm:$0xff] }
 0x146   : > { %v661_v60 = vmul.f32 1.050701, %v660_v58  ;;  %922 = vmatpush.msrb.mxu2 %v895_v47  ;;  %v1048_v57 = vld [vmem:[%s2117_s12 + $0x50] sm:$0xff]  ;;  %v889_v58 = vld [vmem:[%s2114_s9] sm:$0xff]  ;;  %v1083_v47 = vld [vmem:[%s2118_s13 + $0x8] sm:$0xff] }
 0x147   : > { %v1465_v59 = vpop.eup %1464 }
 0x148   : > { %v1376_v61 = vadd.f32 -1.0, %v1465_v59  ;;  %1371 = vmatmul.msk.f32.vlgmr.msra.gmra.mxu2 %vm593_vm0, %v661_v60  ;;  %v1047_v59 = vld [vmem:[%s2117_s12 + $0x48] sm:$0xff]  ;;  %v1046_v60 = vld [vmem:[%s2117_s12 + $0x40] sm:$0xff] }
 0x149   : > { %923 = vmatpush.msrb.mxu2 %v894_v48  ;;  %v1082_v48 = vld [vmem:[%s2118_s13] sm:$0xff] }
 0x14a   : > { %v766_v62 = vmul.f32 1.6732632, %v1376_v61  ;;  %v1045_v61 = vld [vmem:[%s2117_s12 + $0x38] sm:$0xff] }
 0x14b   : > { %924 = vmatpush.msrb.mxu2 %v893_v49 }
 0x14c   : > { %v768_v63 = vsel %vm767_vm4, %v760_v52, %v766_v62  ;;  %v905_v52 = vld [vmem:[%s2114_s9 + $0x80] sm:$0xff]  ;;  %v1044_v62 = vld [vmem:[%s2117_s12 + $0x30] sm:$0xff] }
 0x14d   : > { %v769_v0 = vmul.f32 1.050701, %v768_v63  ;;  %925 = vmatpush.msrb.mxu2 %v892_v51  ;;  %948 = vmatpush.msrb.mxu3 %v905_v52  ;;  %v1050_v52 = vld [vmem:[%s2145_s23 + $0x9] sm:$0x1] }
 0x14f   : > { %1377 = vmatmul.msk.f32.vlgmr.msrb.gmra.mxu1 %vm593_vm0, %v769_v0  ;;  %926 = vmatpush.msrb.mxu2 %v891_v53  ;;  %v1043_v0 = vld [vmem:[%s2117_s12 + $0x28] sm:$0xff] }
 0x150   : > { %1058 = vmatpush.msra.mxu3 %v1049_v54 }
 0x151   : > { %927 = vmatpush.msrb.mxu2 %v890_v56 }
 0x152   : > { %1059 = vmatpush.msra.mxu3 %v1048_v57 }
 0x153   : > { %928 = vmatpush.msrb.mxu2 %v889_v58 }
 0x154   : > { %1060 = vmatpush.msra.mxu3 %v1047_v59 }
 0x156   : > { %1061 = vmatpush.msra.mxu3 %v1046_v60  ;;  %v1157_v60 = vld [vmem:[%s2120_s15 + $0x18] sm:$0xff] }
 0x158   : > { %1062 = vmatpush.msra.mxu3 %v1045_v61 }
 0x15a   : > { %1063 = vmatpush.msra.mxu3 %v1044_v62  ;;  %v1156_v62 = vld [vmem:[%s2120_s15 + $0x10] sm:$0xff] }
 0x15c   : > { %1064 = vmatpush.msra.mxu3 %v1043_v0  ;;  %v1154_v0 = vld [vmem:[%s2120_s15] sm:$0xff] }
 0x1cb   : > { %v688_v3 = vpop.f32.mrf.mxu2 }
 0x1cc   : > { %v796_v4 = vpop.f32.mrf.mxu1  ;;  %v689_v5 = vadd.f32 %v1455_v1, %v688_v3  ;;  %v1042_v1 = vld [vmem:[%s2117_s12 + $0x20] sm:$0xff]  ;;  %v1040_v3 = vld [vmem:[%s2117_s12 + $0x10] sm:$0xff] }
 0x1cd   : > { %v797_v6 = vadd.f32 %v1456_v2, %v796_v4  ;;  %v1041_v2 = vld [vmem:[%s2117_s12 + $0x18] sm:$0xff]  ;;  %1065 = vmatpush.msra.mxu3 %v1042_v1 }
 0x1ce   : > { %v691_v7 = vmin.f32 %v689_v5, 0.0  ;;  %vm696_vm5 = vcmp.gt.f32.partialorder %v689_v5, 0.0 }
 0x1cf   : > { %v799_v9 = vmin.f32 %v797_v6, 0.0  ;;  %vm804_vm6 = vcmp.gt.f32.partialorder %v797_v6, 0.0  ;;  %1066 = vmatpush.msra.mxu3 %v1041_v2 }
 0x1d0   : > { %v692_v8 = vmul.f32 1.442695, %v691_v7  ;;  %v1038_v7 = vld [vmem:[%s2117_s12] sm:$0xff] }
 0x1d1   : > { %v800_v10 = vmul.f32 1.442695, %v799_v9  ;;  %1067 = vmatpush.msra.mxu3 %v1040_v3 }
 0x1d2   : > { %1466 = vpow2.f32 %v692_v8 }
 0x1d3   : > { %1468 = vpow2.f32 %v800_v10 }
 0x1d8   : > { %v1467_v11 = vpop.eup %1466 }
 0x1d9   : > { %v1372_v12 = vadd.f32 -1.0, %v1467_v11  ;;  %v1469_v15 = vpop.eup %1468 }
 0x1da   : > { %v1378_v20 = vadd.f32 -1.0, %v1469_v15 }
 0x1db   : > { %v695_v13 = vmul.f32 1.6732632, %v1372_v12 }
 0x1dc   : > { %v803_v21 = vmul.f32 1.6732632, %v1378_v20 }
 0x1dd   : > { %v697_v14 = vsel %vm696_vm5, %v689_v5, %v695_v13 }
 0x1de   : > { %v1810_v16 = vmul.f32 1.050701, %v697_v14  ;;  %v805_v24 = vsel %vm804_vm6, %v797_v6, %v803_v21  ;;  %v1039_v6 = vld [vmem:[%s2117_s12 + $0x8] sm:$0xff] }
 0x1df   : > { %v1820_v26 = vmul.f32 1.050701, %v805_v24  ;;  %1068 = vmatpush.msra.mxu3 %v1039_v6  ;;  %v1000_v6 = vld [vmem:[%s2116_s11 + $0x18] sm:$0xff] }
 0x1e0   : > { %v824_v17 = vrot.slane %v1810_v16, 5  ;;  %v816_v18 = vrot.slane %v1810_v16, 3  ;;  %v808_v19 = vrot.slane %v1810_v16, 1  ;;  %v828_v22 = vrot.slane %v1810_v16, 6  ;;  %1017 = vmatpush.msra.mxu1 %v1000_v6 }
 0x1e1   : > { %v820_v23 = vrot.slane %v1810_v16, 4  ;;  %v812_v25 = vrot.slane %v1810_v16, 2  ;;  %v854_v27 = vrot.slane %v1820_v26, 2  ;;  %v850_v28 = vrot.slane %v1820_v26, 1  ;;  %1069 = vmatpush.msra.mxu3 %v1038_v7  ;;  %v999_v7 = vld [vmem:[%s2116_s11 + $0x10] sm:$0xff] }
 0x1e2   : > { %825 = vrot.lane.b32.xlu2 %v824_v17, %s1552_s22  ;;  %817 = vrot.lane.b32.xlu1 %v816_v18, %s2129_s24  ;;  %v832_v29 = vrot.slane %v1810_v16, 7  ;;  %v866_v30 = vrot.slane %v1820_v26, 5  ;;  %v862_v31 = vrot.slane %v1820_v26, 4  ;;  %v858_v32 = vrot.slane %v1820_v26, 3 }
 0x1e3   : > { %809 = vrot.lane.b32.xlu0 %v808_v19, %s1554_s3  ;;  %v874_v34 = vrot.slane %v1820_v26, 7  ;;  %v870_v35 = vrot.slane %v1820_v26, 6  ;;  %1018 = vmatpush.msra.mxu1 %v999_v7 }
 0x1ea   : > { %829 = vrot.lane.b32.xlu2 %v828_v22, %s1555_s4  ;;  %821 = vrot.lane.b32.xlu1 %v820_v23, %s2130_s25  ;;  %s2146_s4 = sld [smem:[#allocation10_spill]] }
 0x1eb   : > { %813 = vrot.lane.b32.xlu0 %v812_v25, %s1557_s19 }
 0x1f0   : > { %s1832_s24 = scalar_lea.vmem %s2146_s4, %s1726_s26  ;;  %s1398_s26 = sshll.u32 %s1679_s0, 1 }
 0x1f1   : > { %v1457_v33 = vld [vmem:[%s1832_s24] ss:$0 sm:$0xff]  ;;  %s1288_s4 = scalar_lea.hbm %s2123_s18, %s1398_s26 }
 0x1f2   : > { %855 = vrot.lane.b32.xlu2 %v854_v27, %s1554_s3  ;;  %851 = vrot.lane.b32.xlu1 %v850_v28, %s1558_s20  ;;  %s1561_s3 = smov 24   ;;  %s1562_s20 = smov 56   ;;  %v1897_v55 = vld [vmem:[%s1832_s24] sm:$0x1] }
 0x1f3   : > { %833 = vrot.lane.b32.xlu0 %v832_v29, %s1559_s21  ;;  %s2147_s21 = smov 48   ;;  %1379 = vmatmul.msk.f32.vlgmr.msrb.gmra.mxu3 %vm593_vm0, %v1897_v55  ;;  %s2148_s24 = smov 64  }
 0x1fa   : > { %867 = vrot.lane.b32.xlu2 %v866_v30, %s1560_s29  ;;  %863 = vrot.lane.b32.xlu1 %v862_v31, %s1557_s19  ;;  %s575_s19 = sand.u32 1, %s1542_s28  }
 0x1fb   : > { %859 = vrot.lane.b32.xlu0 %v858_v32, %s1561_s3  ;;  %s1365_s29 = sshll.u32 %s575_s19, 1  ;;  %s1278_s0 = scalar_lea.sflag [#allocation3], %s575_s19 }
 0x202   : > { %875 = vrot.lane.b32.xlu1 %v874_v34, %s1562_s20  ;;  %1034 = vrot.lane.b32.xlu2 %v1457_v33, %s2130_s25  ;;  %s1292_s20 = sshll.u32 %s1288_s4, 4  ;;  %s1293_s20 = int_to_ptr.hbm [resolvable:$true] %s1292_s20 }
 0x203   : > { %871 = vrot.lane.b32.xlu0 %v870_v35, %s2147_s21  ;;  %v964_v35 = vld [vmem:[%s2115_s10 + $0x18] sm:$0xff]  ;;  %s1502_s25 = sshra.s32 %s1293_s20, 4  ;;  %s1503_s25 = int_to_ptr.hbm [resolvable:$true] %s1502_s25 }
 0x204   : > { %981 = vmatpush.msra.mxu0 %v964_v35  ;;  %s1504_s21 = scalar_lea.hbm %s1503_s25, 2  ;;  %p1509_p0 = scmp.lt.s32.totalorder %s1503_s25, %s2123_s18 }
 0x205   : > { %p1505_p11 = scmp.ne.s32.totalorder %s1503_s25, %s1504_s21  ;;  %p1510_p1 = scmp.lt.s32.totalorder %s1508_s1, %s1504_s21 }
 0x206   : > { %982 = vmatpush.msra.mxu0 %v963_v36 }
 0x207   : > { %p1506_p12 = pnand %p1505_p11, %p1696_p5  ;;  %p1511_p2 = por %p1510_p1, %p1509_p0 }
 0x208   : > { %983 = vmatpush.msra.mxu0 %v962_v37 }
 0x209   : > { %p1507_p13 = pneg %p1506_p12 }
 0x20a   : > { %984 = vmatpush.msra.mxu0 %v961_v38 }
 0x20b   : > { %p1512_p3 = pnand %p1511_p2, %p1507_p13 }
 0x20c   : > { %1102 = vmatpush.msrb.mxu0 %v1085_v43 }
 0x20e   : > { %1103 = vmatpush.msrb.mxu0 %v1084_v45 }
 0x210   : > { %1104 = vmatpush.msrb.mxu0 %v1083_v47  ;;  %v1226_v47 = vld [vmem:[%s2122_s17 + $0x18] sm:$0xff] }
 0x212   : > { %1105 = vmatpush.msrb.mxu0 %v1082_v48 }
 0x23c   : > { %v826_v63 = vpop.permute.xlu2 %825 }
 0x244   : > { %v830_v8 = vpop.permute.xlu2 %829 }
 0x24c   : > { %v856_v17 = vpop.permute.xlu2 %855 }
 0x254   : > { %v818_v4 = vpop.permute.xlu1 %817  ;;  %v868_v23 = vpop.permute.xlu2 %867 }
 0x255   : > { %v810_v5 = vpop.permute.xlu0 %809 }
 0x256   : > { %v837_v10 = vsel %vm836_vm7, %v1810_v16, %v810_v5 }
 0x25c   : > { %v822_v9 = vpop.permute.xlu1 %821  ;;  %v1035_v32 = vpop.permute.xlu2 %1034 }
 0x25d   : > { %v814_v11 = vpop.permute.xlu0 %813 }
 0x25e   : > { %v838_v12 = vsel %vm593_vm0, %v837_v10, %v814_v11  ;;  %v1121_v10 = vld [vmem:[%s2119_s14 + $0x18] sm:$0xff] }
 0x25f   : > { %v840_v13 = vsel %vm839_vm8, %v838_v12, %v818_v4 }
 0x260   : > { %v842_v14 = vsel %vm841_vm9, %v840_v13, %v822_v9  ;;  %v997_v9 = vld [vmem:[%s2116_s11] sm:$0xff]  ;;  %v1120_v13 = vld [vmem:[%s2119_s14 + $0x10] sm:$0xff] }
 0x261   : > { %v844_v15 = vsel %vm843_vm10, %v842_v14, %v826_v63  ;;  %v1155_v63 = vld [vmem:[%s2120_s15 + $0x8] sm:$0xff] }
 0x262   : > { %v846_v20 = vsel %vm845_vm11, %v844_v15, %v830_v8  ;;  %v998_v8 = vld [vmem:[%s2116_s11 + $0x8] sm:$0xff] }
 0x263   : > { %1019 = vmatpush.msra.mxu1 %v998_v8  ;;  %v1119_v15 = vld [vmem:[%s2119_s14 + $0x8] sm:$0xff] }
 0x264   : > { %v852_v18 = vpop.permute.xlu1 %851 }
 0x265   : > { %v834_v19 = vpop.permute.xlu0 %833  ;;  %v879_v16 = vsel %vm878_vm13, %v1820_v26, %v852_v18  ;;  %1020 = vmatpush.msra.mxu1 %v997_v9  ;;  %v1118_v18 = vld [vmem:[%s2119_s14] sm:$0xff] }
 0x266   : > { %v848_v21 = vsel %vm847_vm12, %v846_v20, %v834_v19  ;;  %v880_v25 = vsel %vm836_vm7, %v879_v16, %v856_v17  ;;  %vm1269_vm12 = vcmask 1040384  }
 0x267   : > { %929 = vmatmul.f32.vlgmr.msrb.gmra.mxu2 %v848_v21  ;;  %1138 = vmatpush.msrb.mxu1 %v1121_v10  ;;  %v1086_v21 = vld [vmem:[%s2145_s23 + $0xa] sm:$0x1] }
 0x269   : > { %1139 = vmatpush.msrb.mxu1 %v1120_v13 }
 0x26b   : > { %1140 = vmatpush.msrb.mxu1 %v1119_v15 }
 0x26c   : > { %v864_v22 = vpop.permute.xlu1 %863 }
 0x26d   : > { %v860_v24 = vpop.permute.xlu0 %859  ;;  %1141 = vmatpush.msrb.mxu1 %v1118_v18 }
 0x26e   : > { %v882_v27 = vsel %vm881_vm14, %v880_v25, %v860_v24 }
 0x26f   : > { %v883_v28 = vsel %vm593_vm0, %v882_v27, %v864_v22 }
 0x270   : > { %v885_v30 = vsel %vm884_vm15, %v883_v28, %v868_v23  ;;  %v1190_v28 = vld [vmem:[%s2121_s16 + $0x18] sm:$0xff] }
 0x274   : > { %v876_v29 = vpop.permute.xlu1 %875 }
 0x275   : > { %v872_v31 = vpop.permute.xlu0 %871 }
 0x276   : > { %v886_v33 = vsel %vm839_vm8, %v885_v30, %v872_v31  ;;  %v950_v41 = vpop.f32.mrf.mxu3  ;;  %v1189_v30 = vld [vmem:[%s2121_s16 + $0x10] sm:$0xff]  ;;  %v1158_v31 = vld [vmem:[%s2145_s23 + $0xc] sm:$0x1] }
 0x277   : > { %v888_v34 = vsel %vm887_vm1, %v886_v33, %v876_v29 }
 0x278   : > { %v1037_v26 = vsel %vm841_vm9, %v888_v34, %v1035_v32  ;;  %v1188_v32 = vld [vmem:[%s2121_s16 + $0x8] sm:$0xff] }
 0x279   : > { %1385 = vmatmul.msk.f32.vlgmr.msra.gmra.mxu3 %vm845_vm11, %v1037_v26  ;;  %v1187_v26 = vld [vmem:[%s2121_s16] sm:$0xff]  ;;  %vm1264_vm11 = vcmask 531456  }
 0x2ea   : > { %v930_v40 = vpop.f32.mrf.mxu2 }
 0x2eb   : > { %v931_v42 = vadd.f32 %v930_v40, %v909_v39 }
 0x2ed   : > { %v951_v44 = vadd.f32 %v950_v41, %v931_v42 }
 0x2ef   : > { %v953_v46 = vmin.f32 %v951_v44, 0.0  ;;  %vm958_vm2 = vcmp.gt.f32.partialorder %v951_v44, 0.0 }
 0x2f1   : > { %v954_v49 = vmul.f32 1.442695, %v953_v46 }
 0x2f3   : > { %1470 = vpow2.f32 %v954_v49  ;;  %v1225_v49 = vld [vmem:[%s2122_s17 + $0x10] sm:$0xff] }
 0x2f9   : > { %v1471_v50 = vpop.eup %1470 }
 0x2fa   : > { %v1380_v51 = vadd.f32 -1.0, %v1471_v50  ;;  %v1224_v50 = vld [vmem:[%s2122_s17 + $0x8] sm:$0xff] }
 0x2fc   : > { %v957_v53 = vmul.f32 1.6732632, %v1380_v51  ;;  %v1071_v54 = vpop.f32.mrf.mxu3  ;;  %v1223_v51 = vld [vmem:[%s2122_s17] sm:$0xff] }
 0x2fd   : > { %v1072_v56 = vadd.f32 %v1071_v54, %v1050_v52 }
 0x2fe   : > { %v959_v57 = vsel %vm958_vm2, %v951_v44, %v957_v53  ;;  %v1191_v53 = vld [vmem:[%s2145_s23 + $0xd] sm:$0x1] }
 0x2ff   : > { %v960_v58 = vmul.f32 1.050701, %v959_v57  ;;  %v1074_v59 = vmin.f32 %v1072_v56, 0.0  ;;  %vm1079_vm3 = vcmp.gt.f32.partialorder %v1072_v56, 0.0 }
 0x301   : > { %v1075_v61 = vmul.f32 1.442695, %v1074_v59  ;;  %1381 = vmatmul.msk.f32.vlgmr.msra.gmra.mxu0 %vm593_vm0, %v960_v58 }
 0x302   : > { %1171 = vmatpush.msra.mxu0 %v1157_v60 }
 0x303   : > { %1472 = vpow2.f32 %v1075_v61 }
 0x304   : > { %1172 = vmatpush.msra.mxu0 %v1156_v62 }
 0x306   : > { %1173 = vmatpush.msra.mxu0 %v1155_v63 }
 0x308   : > { %1174 = vmatpush.msra.mxu0 %v1154_v0  ;;  %v1227_v0 = vld [vmem:[%s2145_s23 + $0xe] sm:$0x1] }
 0x309   : > { %v1473_v1 = vpop.eup %1472 }
 0x30a   : > { %v1386_v2 = vadd.f32 -1.0, %v1473_v1 }
 0x30c   : > { %v1078_v3 = vmul.f32 1.6732632, %v1386_v2 }
 0x30e   : > { %v1080_v4 = vsel %vm1079_vm3, %v1072_v56, %v1078_v3 }
 0x30f   : > { %v1081_v5 = vmul.f32 1.050701, %v1080_v4 }
 0x311   : > { %1387 = vmatmul.msk.f32.vlgmr.msrb.gmra.mxu0 %vm593_vm0, %v1081_v5 }
 0x312   : > { %1243 = vmatpush.msrb.mxu0 %v1226_v47 }
 0x314   : > { %1244 = vmatpush.msrb.mxu0 %v1225_v49 }
 0x316   : > { %1245 = vmatpush.msrb.mxu0 %v1224_v50 }
 0x318   : > { %1246 = vmatpush.msrb.mxu0 %v1223_v51 }
 0x319   : > { %1391 = vmatmul.msk.f32.vlgmr.msra.gmra.mxu0 %vm593_vm0, %v1897_v55  ;;  %v965_v55 = vld [vmem:[%s2145_s23 + $0x7] sm:$0x1] }
 0x37e   : > { %v986_v11 = vpop.f32.mrf.mxu0 }
 0x37f   : > { %v987_v12 = vadd.f32 %v986_v11, %v965_v55  ;;  %v1122_v55 = vld [vmem:[%s2145_s23 + $0xb] sm:$0x1]  ;;  %v1001_v11 = vld [vmem:[%s2145_s23 + $0x8] sm:$0x1] }
 0x381   : > { %v989_v14 = vmin.f32 %v987_v12, 0.0  ;;  %vm994_vm4 = vcmp.gt.f32.partialorder %v987_v12, 0.0 }
 0x383   : > { %v990_v17 = vmul.f32 1.442695, %v989_v14 }
 0x385   : > { %1474 = vpow2.f32 %v990_v17 }
 0x38b   : > { %v1475_v19 = vpop.eup %1474 }
 0x38c   : > { %v1382_v20 = vadd.f32 -1.0, %v1475_v19 }
 0x38e   : > { %v993_v16 = vmul.f32 1.6732632, %v1382_v20  ;;  %v1107_v22 = vpop.f32.mrf.mxu0 }
 0x38f   : > { %v1108_v23 = vadd.f32 %v1107_v22, %v1086_v21 }
 0x390   : > { %v995_v24 = vsel %vm994_vm4, %v987_v12, %v993_v16 }
 0x391   : > { %v996_v25 = vmul.f32 1.050701, %v995_v24  ;;  %v1110_v27 = vmin.f32 %v1108_v23, 0.0  ;;  %vm1115_vm5 = vcmp.gt.f32.partialorder %v1108_v23, 0.0 }
 0x393   : > { %v1111_v29 = vmul.f32 1.442695, %v1110_v27  ;;  %1383 = vmatmul.msk.f32.vlgmr.msra.gmra.mxu1 %vm593_vm0, %v996_v25  ;;  %v1272_v25 = vlaneseq }
 0x394   : > { %1207 = vmatpush.msra.mxu1 %v1190_v28 }
 0x395   : > { %1476 = vpow2.f32 %v1111_v29  ;;  %vm1274_vm13 = vcmp.lt.s32.totalorder %v1272_v25, 256 }
 0x396   : > { %v1176_v33 = vpop.f32.mrf.mxu0  ;;  %1208 = vmatpush.msra.mxu1 %v1189_v30 }
 0x397   : > { %v1177_v34 = vadd.f32 %v1176_v33, %v1158_v31 }
 0x398   : > { %1209 = vmatpush.msra.mxu1 %v1188_v32 }
 0x399   : > { %v1179_v35 = vmin.f32 %v1177_v34, 0.0  ;;  %vm1184_vm6 = vcmp.gt.f32.partialorder %v1177_v34, 0.0 }
 0x39a   : > { %1210 = vmatpush.msra.mxu1 %v1187_v26 }
 0x39b   : > { %v1477_v36 = vpop.eup %1476  ;;  %v1180_v37 = vmul.f32 1.442695, %v1179_v35 }
 0x39c   : > { %v1388_v38 = vadd.f32 -1.0, %v1477_v36 }
 0x39d   : > { %1478 = vpow2.f32 %v1180_v37 }
 0x39e   : > { %v1114_v39 = vmul.f32 1.6732632, %v1388_v38 }
 0x3a0   : > { %v1116_v40 = vsel %vm1115_vm5, %v1108_v23, %v1114_v39 }
 0x3a1   : > { %v1117_v41 = vmul.f32 1.050701, %v1116_v40 }
 0x3a3   : > { %v1479_v42 = vpop.eup %1478  ;;  %1389 = vmatmul.msk.f32.vlgmr.msrb.gmra.mxu1 %vm593_vm0, %v1117_v41 }
 0x3a4   : > { %v1392_v43 = vadd.f32 -1.0, %v1479_v42 }
 0x3a6   : > { %v1183_v44 = vmul.f32 1.6732632, %v1392_v43 }
 0x3a8   : > { %v1185_v45 = vsel %vm1184_vm6, %v1177_v34, %v1183_v44 }
 0x3a9   : > { %v1186_v46 = vmul.f32 1.050701, %v1185_v45 }
 0x3ab   : > { %1393 = vmatmul.msk.f32.vlgmr.msra.gmra.mxu1 %vm593_vm0, %v1186_v46 }
 0x410   : > { %v1022_v48 = vpop.f32.mrf.mxu1 }
 0x411   : > { %v1023_v12 = vadd.f32 %v1022_v48, %v1001_v11 }
 0x413   : > { %v1025_v14 = vmin.f32 %v1023_v12, 0.0  ;;  %vm1030_vm10 = vcmp.gt.f32.partialorder %v1023_v12, 0.0 }
 0x415   : > { %v1026_v17 = vmul.f32 1.442695, %v1025_v14 }
 0x420   : > { %v1143_v52 = vpop.f32.mrf.mxu1 }
 0x421   : > { %v1144_v10 = vadd.f32 %v1143_v52, %v1122_v55 }
 0x423   : > { %v1146_v13 = vmin.f32 %v1144_v10, 0.0 }
 0x425   : > { %v1147_v15 = vmul.f32 1.442695, %v1146_v13 }
 0x428   : > { %v1212_v54 = vpop.f32.mrf.mxu1 }
 0x429   : > { %v1213_v56 = vadd.f32 %v1212_v54, %v1191_v53 }
 0x42b   : > { %v1215_v57 = vmin.f32 %v1213_v56, 0.0  ;;  %vm1220_vm7 = vcmp.gt.f32.partialorder %v1213_v56, 0.0 }
 0x42d   : > { %v1216_v58 = vmul.f32 1.442695, %v1215_v57 }
 0x42f   : > { %1480 = vpow2.f32 %v1216_v58 }
 0x435   : > { %v1481_v59 = vpop.eup %1480 }
 0x436   : > { %v1394_v60 = vadd.f32 -1.0, %v1481_v59 }
 0x438   : > { %v1219_v61 = vmul.f32 1.6732632, %v1394_v60 }
 0x43a   : > { %v1221_v62 = vsel %vm1220_vm7, %v1213_v56, %v1219_v61 }
 0x43b   : > { %v1222_v63 = vmul.f32 1.050701, %v1221_v62 }
 0x43d   : > { %1395 = vmatmul.msk.f32.vlgmr.msrb.gmra.mxu0 %vm593_vm0, %v1222_v63  ;;  %vm1151_vm0 = vcmp.gt.f32.partialorder %v1144_v10, 0.0 }
 0x4ba   : > { %v1248_v1 = vpop.f32.mrf.mxu0 }
 0x4bb   : > { %v1249_v2 = vadd.f32 %v1248_v1, %v1227_v0 }
 0x4bd   : > { %v1251_v3 = vmin.f32 %v1249_v2, 0.0  ;;  %vm1256_vm8 = vcmp.gt.f32.partialorder %v1249_v2, 0.0 }
 0x4bf   : > { %v1252_v4 = vmul.f32 1.442695, %v1251_v3 }
 0x4c1   : > { %1482 = vpow2.f32 %v1252_v4 }
 0x4c2   : > { %1484 = vpow2.f32 %v1147_v15 }
 0x4c3   : > { %1486 = vpow2.f32 %v1026_v17 }
 0x4c7   : > { %v1483_v5 = vpop.eup %1482 }
 0x4c8   : > { %v1396_v6 = vadd.f32 -1.0, %v1483_v5  ;;  %v1485_v18 = vpop.eup %1484 }
 0x4c9   : > { %v1390_v19 = vadd.f32 -1.0, %v1485_v18  ;;  %v1487_v20 = vpop.eup %1486 }
 0x4ca   : > { %v1255_v7 = vmul.f32 1.6732632, %v1396_v6  ;;  %v1384_v21 = vadd.f32 -1.0, %v1487_v20 }
 0x4cb   : > { %v1150_v16 = vmul.f32 1.6732632, %v1390_v19 }
 0x4cc   : > { %v1257_v8 = vsel %vm1256_vm8, %v1249_v2, %v1255_v7  ;;  %v1029_v22 = vmul.f32 1.6732632, %v1384_v21 }
 0x4cd   : > { %v1258_v9 = vmul.f32 1.050701, %v1257_v8  ;;  %v1152_v23 = vsel %vm1151_vm0, %v1144_v10, %v1150_v16 }
 0x4ce   : > { %v1153_v24 = vmul.f32 1.050701, %v1152_v23  ;;  %v1031_v27 = vsel %vm1030_vm10, %v1023_v12, %v1029_v22 }
 0x4cf   : > { %1260 = vrot.lane.b32.xlu0 %v1258_v9, %s2148_s24  ;;  %s577_s24 = scalar_lea.vmem [#allocation2], %s1365_s29  ;;  %v1032_v31 = vmul.f32 1.050701, %v1031_v27 }
 0x4d0   : > { %s1290_s3 = sshll.u32 %s577_s24, 4  ;;  %s1291_s3 = int_to_ptr.vmem [resolvable:$true] %s1290_s3 }
 0x541   : > { %v1261_v28 = vpop.permute.xlu0 %1260 }
 0x542   : > { %v1263_v29 = vsel %vm841_vm9, %v1153_v24, %v1261_v28 }
 0x543   : > { %v1265_v30 = vsel %vm1264_vm11, %v1263_v29, 0.0 }
 0x544   : > { %v1268_v32 = vrot.slane %v1265_v30, 7 }
 0x546   : > { %v1270_v33 = vsel %vm1269_vm12, %v1032_v31, %v1268_v32 }
 0x547   : > { %1276 = vst.msk [vmem:[%s577_s24] sm:$0x3] %vm1274_vm13, %v1270_v33 }
 0x548   : > { %1515 = shalt.err (!%p1512_p3)
}
 0x549   : > { %1401 = dma.vmem_to_hbm [thread:$0]  (%p1696_p5), %s1291_s3, 32, %s1293_s20, %s1278_s0  }
 0x54a PF: > { %p1407_p4 = scmp.ge.s32.totalorder %s1550_s30, 2  ;;  %s1304_s24 = sand.u32 1, %s1538_s27  }
 0x54b   : > { %s1305_s29 = scalar_lea.sflag [#allocation3], %s1304_s24 }
 0x54c   : > { %p1404_p7 = pnand %p1407_p4, %p1700_p6 }
 0x54e   : > { %p1405_p8 = pneg %p1404_p7 }
 0x550   : > { %1533 = dma.done.wait (%p1405_p8), %s1305_s29, 32  }
 0x551   : > { %1535 = vsyncadd (%p1405_p8), %s1305_s29, 4294967264  ;;  %s2150_s30 = sld [smem:[#allocation6_spill]]  ;;  %s2153_s27 = smov %s1542_s28 }
 0x552   : > { %s2151_s25 = sld [smem:[#allocation5_spill]] }
 0x553   : > { %s2152_s29 = sld [smem:[#allocation7_spill]] }
 0x557   : > { %p28_p9 = scmp.ge.s32.totalorder %s2150_s30, 4  }
 0x558   : > { %s2154_s28 = smov %s2151_s25 }
 0x559   :  { %30 = sbr.rel (!%p28_p9) target bundleno = 9 (0x9), region = 130 }
 0x55e   :  { %1311 = vsyncpa [#allocation3], 1 }
 0x55f   :  { %1313 = vsyncpa [#allocation3 + $0x1], 1 }

</bundles_post_ra>
